<compile_context>
chip_gen: v5e
topology: v5e:2x2
jax: 0.10.0
libtpu: 0.0.40
codegen_flags: <defaults>
</compile_context>

<pallas_src>
import jax
import jax.numpy as jnp
from jax import lax
from jax.experimental import pallas as pl
from jax.experimental.pallas import tpu as pltpu


# ---------------------------------------------------------------------------
# Fused ResidualBlock kernel:
#   conv3x3 + bias + ReLU + conv3x3 + bias + residual add + ReLU,
# im2col (single big-K matmul per conv), in-kernel halo padding, and the
# output is concat([input, residual]) so no JAX-level concatenate is needed.
# ---------------------------------------------------------------------------
def _make_resblock_kernel(H, W, Cc, K=3, pad=1):
    def im2col(padded):  # padded: (Hp, Wp, Cc) f32 value
        cols = [padded[ky:ky + H, kx:kx + W, :].reshape(H * W, Cc)
                for ky in range(K) for kx in range(K)]
        # (H*W, K*K*Cc): contraction depth 9*Cc feeds the MXU much better than Cc
        return jnp.concatenate(cols, axis=-1).astype(jnp.bfloat16)

    def kernel(x_ref, w1_ref, b1_ref, w2_ref, b2_ref, o_ref, xpad_ref, hpad_ref):
        x = x_ref[0]                                        # (H, W, Cc) f32
        # In-kernel halo padding (no HBM jnp.pad round trip).
        xpad_ref[...] = jnp.zeros_like(xpad_ref)
        xpad_ref[pl.ds(pad, H), pl.ds(pad, W), :] = x

        p1 = im2col(xpad_ref[...])                          # (H*W, 9*Cc) bf16
        h = jnp.dot(p1, w1_ref[...], preferred_element_type=jnp.float32)
        h = jnp.maximum(h + b1_ref[...], 0.0)               # (H*W, Cc) f32

        # Intermediate activation never leaves VMEM.
        hpad_ref[...] = jnp.zeros_like(hpad_ref)
        hpad_ref[pl.ds(pad, H), pl.ds(pad, W), :] = h.reshape(H, W, Cc)

        p2 = im2col(hpad_ref[...])                          # (H*W, 9*Cc) bf16
        r = jnp.dot(p2, w2_ref[...], preferred_element_type=jnp.float32)
        r = jnp.maximum(r + b2_ref[...] + x.reshape(H * W, Cc), 0.0)

        # Write concat([input, residual]) directly -> concat is free, and the
        # store lane width is 2*Cc (32/64/128) instead of Cc.
        out = jnp.concatenate([x, r.reshape(H, W, Cc)], axis=-1)  # (H, W, 2*Cc)
        o_ref[0] = out.astype(o_ref.dtype)

    return kernel


def fused_resblock(x, w1, b1, w2, b2):
    """x: (N,H,W,Cc) f32, w*: (9*Cc, Cc) bf16, b*: (1, Cc) f32.
    Returns concat([x, residual_block(x)], axis=-1): (N,H,W,2*Cc)."""
    N, H, W, Cc = x.shape
    pad = 1
    Hp, Wp = H + 2 * pad, W + 2 * pad
    kernel = _make_resblock_kernel(H, W, Cc, K=3, pad=pad)
    return pl.pallas_call(
        kernel,
        out_shape=jax.ShapeDtypeStruct((N, H, W, 2 * Cc), x.dtype),
        grid=(N,),
        in_specs=[
            pl.BlockSpec((1, H, W, Cc), lambda n: (n, 0, 0, 0)),
            pl.BlockSpec((9 * Cc, Cc), lambda n: (0, 0)),
            pl.BlockSpec((1, Cc), lambda n: (0, 0)),
            pl.BlockSpec((9 * Cc, Cc), lambda n: (0, 0)),
            pl.BlockSpec((1, Cc), lambda n: (0, 0)),
        ],
        out_specs=pl.BlockSpec((1, H, W, 2 * Cc), lambda n: (n, 0, 0, 0)),
        scratch_shapes=[pltpu.VMEM((Hp, Wp, Cc), jnp.float32),
                        pltpu.VMEM((Hp, Wp, Cc), jnp.float32)],
        compiler_params=pltpu.CompilerParams(
            dimension_semantics=("parallel",),
            vmem_limit_bytes=32 * 1024 * 1024),
    )(x, w1, b1, w2, b2)


# ---------------------------------------------------------------------------
# Fused "g" (1x1 conv + ReLU) + CALayer kernel:
#   g = relu(c3 @ Wg + bg)  (stays in VMEM, never written to HBM)
#   global avg-pool + 3 squeeze matmuls (center taps of the dilated 3x3 convs,
#   exact because the pooled input is 1x1 with pad==dilation) + excitation
#   (cat-as-sum) + sigmoid + channel rescale.
# ---------------------------------------------------------------------------
def _make_gca_kernel(H, W, C8, C, Cr):
    inv_hw = 1.0 / float(H * W)

    def kernel(c3_ref, wg_ref, bg_ref, w1_ref, b1_ref, w2_ref, b2_ref,
               w3_ref, b3_ref, w4_ref, b4_ref, o_ref):
        xc = c3_ref[0].reshape(H * W, C8).astype(jnp.bfloat16)     # K = 8*C
        g = jnp.dot(xc, wg_ref[...], preferred_element_type=jnp.float32)
        g = jnp.maximum(g + bg_ref[...], 0.0)                      # (H*W, C) f32

        y = jnp.sum(g, axis=0, keepdims=True) * inv_hw             # (1, C)

        def squeeze(w_ref, b_ref):
            return jnp.maximum(
                jnp.dot(y, w_ref[...], preferred_element_type=jnp.float32)
                + b_ref[...], 0.0)                                 # (1, Cr)

        s1 = squeeze(w1_ref, b1_ref)
        s2 = squeeze(w2_ref, b2_ref)
        s3 = squeeze(w3_ref, b3_ref)
        # cat([s1,s2,s3]) @ W4 == sum of per-chunk matmuls (exact, no lane concat)
        s = (jnp.dot(s1, w4_ref[0:Cr, :], preferred_element_type=jnp.float32)
             + jnp.dot(s2, w4_ref[Cr:2 * Cr, :], preferred_element_type=jnp.float32)
             + jnp.dot(s3, w4_ref[2 * Cr:3 * Cr, :], preferred_element_type=jnp.float32)
             + b4_ref[...])
        s = jax.nn.sigmoid(s)                                      # (1, C)

        o_ref[0] = (g * s).reshape(H, W, C).astype(o_ref.dtype)

    return kernel


def gca_pallas(c3, wg, bg, w1, b1, w2, b2, w3, b3, w4, b4):
    N, H, W, C8 = c3.shape
    C = wg.shape[1]
    Cr = w1.shape[1]
    kernel = _make_gca_kernel(H, W, C8, C, Cr)

    def full(shape):
        return pl.BlockSpec(shape, lambda n: (0,) * len(shape))

    in_specs = [
        pl.BlockSpec((1, H, W, C8), lambda n: (n, 0, 0, 0)),
        full((C8, C)), full((1, C)),
        full((C, Cr)), full((1, Cr)),
        full((C, Cr)), full((1, Cr)),
        full((C, Cr)), full((1, Cr)),
        full((3 * Cr, C)), full((1, C)),
    ]
    return pl.pallas_call(
        kernel,
        out_shape=jax.ShapeDtypeStruct((N, H, W, C), jnp.float32),
        grid=(N,),
        in_specs=in_specs,
        out_specs=pl.BlockSpec((1, H, W, C), lambda n: (n, 0, 0, 0)),
        compiler_params=pltpu.CompilerParams(
            dimension_semantics=("parallel",),
            vmem_limit_bytes=32 * 1024 * 1024),
    )(c3, wg, bg, w1, b1, w2, b2, w3, b3, w4, b4)


# ---------------------------------------------------------------------------
# Weight prepacking (done ONCE, outside the per-call path):
#   OIHW 3x3 -> im2col-packed (9*Cin, Cout) bf16; 1x1 g conv -> (8C, C) bf16;
#   CALayer dilated 3x3 convs -> center-tap (Cin, Cout) f32 matmuls (exact,
#   because the pooled input is 1x1 with pad == dilation); biases -> (1, Cout).
# ---------------------------------------------------------------------------
def _pack_conv3(w_oihw):
    w = jnp.transpose(w_oihw, (2, 3, 1, 0))                 # (ky, kx, cin, cout)
    K, _, Cin, Cout = w.shape
    return w.reshape(K * K * Cin, Cout).astype(jnp.bfloat16)


def _center_tap(w_oihw):
    k = w_oihw.shape[-1]
    return jnp.transpose(w_oihw[:, :, k // 2, k // 2], (1, 0)).astype(jnp.float32)


def prepack_params(P):
    def b2(b):
        return b.reshape(1, -1).astype(jnp.float32)

    def res(p):
        return {"w1": _pack_conv3(p["c1"]["w"]), "b1": b2(p["c1"]["b"]),
                "w2": _pack_conv3(p["c2"]["w"]), "b2": b2(p["c2"]["b"])}

    ca = P["ca"]
    return {
        "r1": res(P["r1"]), "r2": res(P["r2"]), "r3": res(P["r3"]),
        "g": {"w": jnp.transpose(P["g"]["w"][:, :, 0, 0], (1, 0)).astype(jnp.bfloat16),
              "b": b2(P["g"]["b"])},
        "ca": {"w1": _center_tap(ca["c1"]["w"]), "b1": b2(ca["c1"]["b"]),
               "w2": _center_tap(ca["c2"]["w"]), "b2": b2(ca["c2"]["b"]),
               "w3": _center_tap(ca["c3"]["w"]), "b3": b2(ca["c3"]["b"]),
               "w4": _center_tap(ca["c4"]["w"]), "b4": b2(ca["c4"]["b"])},
    }


# ---------------------------------------------------------------------------
# Block forward (Pallas) and pure-JAX reference
# ---------------------------------------------------------------------------
@jax.jit
def block_forward_pallas(x_nchw, PP):
    x = jnp.transpose(x_nchw, (0, 2, 3, 1))                 # NCHW -> NHWC
    r = PP["r1"]
    c1 = fused_resblock(x, r["w1"], r["b1"], r["w2"], r["b2"])    # (N,H,W,2C)
    r = PP["r2"]
    c2 = fused_resblock(c1, r["w1"], r["b1"], r["w2"], r["b2"])   # (N,H,W,4C)
    r = PP["r3"]
    c3 = fused_resblock(c2, r["w1"], r["b1"], r["w2"], r["b2"])   # (N,H,W,8C)
    ca = PP["ca"]
    out = gca_pallas(c3, PP["g"]["w"], PP["g"]["b"],
                     ca["w1"], ca["b1"], ca["w2"], ca["b2"],
                     ca["w3"], ca["b3"], ca["w4"], ca["b4"])
    return jnp.transpose(out, (0, 3, 1, 2))                 # NHWC -> NCHW


def _oihw_to_hwio(w):
    return jnp.transpose(w, (2, 3, 1, 0))


def _conv_ref(x, w_oihw, b, *, pad, dilation=1):
    y = lax.conv_general_dilated(
        x, _oihw_to_hwio(w_oihw), window_strides=(1, 1),
        padding=[(pad, pad), (pad, pad)],
        rhs_dilation=(dilation, dilation),
        dimension_numbers=("NHWC", "HWIO", "NHWC"),
        precision=lax.Precision.HIGHEST)
    return y + b.reshape(1, 1, 1, -1)


@jax.jit
def block_forward_ref(x_nchw, P):
    x = jnp.transpose(x_nchw, (0, 2, 3, 1))

    def residual_block(inp, p):
        h = jax.nn.relu(_conv_ref(inp, p["c1"]["w"], p["c1"]["b"], pad=1))
        h = _conv_ref(h, p["c2"]["w"], p["c2"]["b"], pad=1)
        return jax.nn.relu(h + inp)

    c0 = x
    r1 = residual_block(c0, P["r1"]); c1 = jnp.concatenate([c0, r1], axis=-1)
    r2 = residual_block(c1, P["r2"]); c2 = jnp.concatenate([c1, r2], axis=-1)
    r3 = residual_block(c2, P["r3"]); c3 = jnp.concatenate([c2, r3], axis=-1)
    g = jax.nn.relu(_conv_ref(c3, P["g"]["w"], P["g"]["b"], pad=0))

    ca = P["ca"]
    y = jnp.mean(g, axis=(1, 2), keepdims=True)
    a1 = jax.nn.relu(_conv_ref(y, ca["c1"]["w"], ca["c1"]["b"], pad=3, dilation=3))
    a2 = jax.nn.relu(_conv_ref(y, ca["c2"]["w"], ca["c2"]["b"], pad=5, dilation=5))
    a3 = jax.nn.relu(_conv_ref(y, ca["c3"]["w"], ca["c3"]["b"], pad=7, dilation=7))
    cc = jnp.concatenate([a1, a2, a3], axis=-1)
    s = jax.nn.sigmoid(_conv_ref(cc, ca["c4"]["w"], ca["c4"]["b"], pad=1))
    return jnp.transpose(g * s, (0, 3, 1, 2))


def init_params(key, C):
    keys = iter(jax.random.split(key, 22))  # 11 convs * (weight, bias)

    def conv(cout, cin, k, scale=0.05):
        w = scale * jax.random.normal(next(keys), (cout, cin, k, k), jnp.float32)
        b = scale * jax.random.normal(next(keys), (cout,), jnp.float32)
        return {"w": w, "b": b}

    Cr = C // 16  # CALayer reduction=16
    return {
        "r1": {"c1": conv(C, C, 3), "c2": conv(C, C, 3)},
        "r2": {"c1": conv(2 * C, 2 * C, 3), "c2": conv(2 * C, 2 * C, 3)},
        "r3": {"c1": conv(4 * C, 4 * C, 3), "c2": conv(4 * C, 4 * C, 3)},
        "g": conv(C, 8 * C, 1),
        "ca": {"c1": conv(Cr, C, 3), "c2": conv(Cr, C, 3), "c3": conv(Cr, C, 3),
               "c4": conv(C, 3 * Cr, 3)},
    }


if __name__ == "__main__":
    # C must be >= 16 so the CALayer reduction (C // 16) is non-degenerate.
    N, C, H, W = 2, 16, 8, 8
    key = jax.random.PRNGKey(0)
    k_x, k_p = jax.random.split(key)
    x = jax.random.normal(k_x, (N, C, H, W), jnp.float32)
    params = init_params(k_p, C)
    packed = prepack_params(params)          # one-time weight prepack (bf16/im2col)

    out = block_forward_pallas(x, packed)
    out = jax.block_until_ready(out)

    ref = block_forward_ref(x, params)
    rel_err = float(jnp.max(jnp.abs(out - ref)) / (jnp.max(jnp.abs(ref)) + 1e-6))
    assert out.shape == (N, C, H, W), out.shape
    # bf16 MXU operands with f32 accumulation + f32 epilogue: expected rel err
    # is O(1e-3); 2e-2 leaves margin without masking indexing bugs.
    assert rel_err < 2e-2, f"relative error too large: {rel_err}"
    print("KERNEL_OK")
</pallas_src>

<mosaic_0001>
module attributes {stable_mosaic.version = 11 : i64} {
  func.func @kernel(%arg0: i32, %arg1: memref<1x8x8x16xf32, #tpu.memory_space<vmem>>, %arg2: memref<144x16xbf16, #tpu.memory_space<vmem>>, %arg3: memref<1x16xf32, #tpu.memory_space<vmem>>, %arg4: memref<144x16xbf16, #tpu.memory_space<vmem>>, %arg5: memref<1x16xf32, #tpu.memory_space<vmem>>, %arg6: memref<1x8x8x32xf32, #tpu.memory_space<vmem>>, %arg7: memref<10x10x16xf32, #tpu.memory_space<vmem>>, %arg8: memref<10x10x16xf32, #tpu.memory_space<vmem>>) attributes {dimension_semantics = [#tpu.dimension_semantics<parallel>], iteration_bounds = array<i64: 2>, scalar_prefetch = 0 : i64, scratch_operands = 2 : i64, tpu.core_type = #tpu.core_type<tc>, window_params = [{transform_indices = @transform_0, window_bounds = array<i64: 1, 8, 8, 16>}, {pipeline_mode = #tpu.pipeline_mode<synchronous>, transform_indices = @transform_1, window_bounds = array<i64: 144, 16>}, {pipeline_mode = #tpu.pipeline_mode<synchronous>, transform_indices = @transform_2, window_bounds = array<i64: 1, 16>}, {pipeline_mode = #tpu.pipeline_mode<synchronous>, transform_indices = @transform_3, window_bounds = array<i64: 144, 16>}, {pipeline_mode = #tpu.pipeline_mode<synchronous>, transform_indices = @transform_4, window_bounds = array<i64: 1, 16>}, {transform_indices = @transform_5, window_bounds = array<i64: 1, 8, 8, 32>}]} {
    %c0 = arith.constant 0 : index
    %c0_0 = arith.constant 0 : index
    %c0_1 = arith.constant 0 : index
    %c0_2 = arith.constant 0 : index
    %0 = vector.load %arg1[%c0, %c0_0, %c0_1, %c0_2] : memref<1x8x8x16xf32, #tpu.memory_space<vmem>>, vector<1x8x8x16xf32>
    %1 = vector.shape_cast %0 : vector<1x8x8x16xf32> to vector<8x8x16xf32>
    %cst = arith.constant 0.000000e+00 : f32
    %2 = vector.broadcast %cst : f32 to vector<10x10x16xf32>
    %c0_3 = arith.constant 0 : index
    %c0_4 = arith.constant 0 : index
    %c0_5 = arith.constant 0 : index
    %3 = vector.load %arg7[%c0_3, %c0_4, %c0_5] : memref<10x10x16xf32, #tpu.memory_space<vmem>>, vector<10x10x16xf32>
    tpu.vector_store %arg7[%c0_3, %c0_4, %c0_5], %2 {strides = array<i32>} : memref<10x10x16xf32, #tpu.memory_space<vmem>>, vector<10x10x16xf32>,
    %c1 = arith.constant 1 : index
    %c1_6 = arith.constant 1 : index
    %c0_7 = arith.constant 0 : index
    %4 = vector.load %arg7[%c1, %c1_6, %c0_7] : memref<10x10x16xf32, #tpu.memory_space<vmem>>, vector<8x8x16xf32>
    tpu.vector_store %arg7[%c1, %c1_6, %c0_7], %1 {strides = array<i32>} : memref<10x10x16xf32, #tpu.memory_space<vmem>>, vector<8x8x16xf32>,
    %c0_8 = arith.constant 0 : index
    %c0_9 = arith.constant 0 : index
    %c0_10 = arith.constant 0 : index
    %5 = vector.load %arg7[%c0_8, %c0_9, %c0_10] : memref<10x10x16xf32, #tpu.memory_space<vmem>>, vector<10x10x16xf32>
    %6 = vector.extract_strided_slice %5 {offsets = [0, 0, 0], sizes = [8, 8, 16], strides = [1, 1, 1]} : vector<10x10x16xf32> to vector<8x8x16xf32>
    %7 = vector.shape_cast %6 : vector<8x8x16xf32> to vector<64x16xf32>
    %8 = vector.extract_strided_slice %5 {offsets = [0, 1, 0], sizes = [8, 8, 16], strides = [1, 1, 1]} : vector<10x10x16xf32> to vector<8x8x16xf32>
    %9 = vector.shape_cast %8 : vector<8x8x16xf32> to vector<64x16xf32>
    %10 = vector.extract_strided_slice %5 {offsets = [0, 2, 0], sizes = [8, 8, 16], strides = [1, 1, 1]} : vector<10x10x16xf32> to vector<8x8x16xf32>
    %11 = vector.shape_cast %10 : vector<8x8x16xf32> to vector<64x16xf32>
    %12 = vector.extract_strided_slice %5 {offsets = [1, 0, 0], sizes = [8, 8, 16], strides = [1, 1, 1]} : vector<10x10x16xf32> to vector<8x8x16xf32>
    %13 = vector.shape_cast %12 : vector<8x8x16xf32> to vector<64x16xf32>
    %14 = vector.extract_strided_slice %5 {offsets = [1, 1, 0], sizes = [8, 8, 16], strides = [1, 1, 1]} : vector<10x10x16xf32> to vector<8x8x16xf32>
    %15 = vector.shape_cast %14 : vector<8x8x16xf32> to vector<64x16xf32>
    %16 = vector.extract_strided_slice %5 {offsets = [1, 2, 0], sizes = [8, 8, 16], strides = [1, 1, 1]} : vector<10x10x16xf32> to vector<8x8x16xf32>
    %17 = vector.shape_cast %16 : vector<8x8x16xf32> to vector<64x16xf32>
    %18 = vector.extract_strided_slice %5 {offsets = [2, 0, 0], sizes = [8, 8, 16], strides = [1, 1, 1]} : vector<10x10x16xf32> to vector<8x8x16xf32>
    %19 = vector.shape_cast %18 : vector<8x8x16xf32> to vector<64x16xf32>
    %20 = vector.extract_strided_slice %5 {offsets = [2, 1, 0], sizes = [8, 8, 16], strides = [1, 1, 1]} : vector<10x10x16xf32> to vector<8x8x16xf32>
    %21 = vector.shape_cast %20 : vector<8x8x16xf32> to vector<64x16xf32>
    %22 = vector.extract_strided_slice %5 {offsets = [2, 2, 0], sizes = [8, 8, 16], strides = [1, 1, 1]} : vector<10x10x16xf32> to vector<8x8x16xf32>
    %23 = vector.shape_cast %22 : vector<8x8x16xf32> to vector<64x16xf32>
    %24 = tpu.concatenate %7, %9, %11, %13, %15, %17, %19, %21, %23 in 1 : vector<64x16xf32>, vector<64x16xf32>, vector<64x16xf32>, vector<64x16xf32>, vector<64x16xf32>, vector<64x16xf32>, vector<64x16xf32>, vector<64x16xf32>, vector<64x16xf32> -> vector<64x144xf32>
    %25 = arith.truncf %24 : vector<64x144xf32> to vector<64x144xbf16>
    %c0_11 = arith.constant 0 : index
    %c0_12 = arith.constant 0 : index
    %26 = vector.load %arg2[%c0_11, %c0_12] : memref<144x16xbf16, #tpu.memory_space<vmem>>, vector<144x16xbf16>
    %cst_13 = arith.constant dense<0.000000e+00> : vector<64x16xf32>
    %27 = tpu.matmul %25, %26, %cst_13 {dimension_numbers = #tpu.dot_dimension_numbers<[1], [0], [0], [1], [0, 0, 1, 1], [], []>} : vector<64x144xbf16>, vector<144x16xbf16>, vector<64x16xf32> -> vector<64x16xf32>
    %c0_14 = arith.constant 0 : index
    %c0_15 = arith.constant 0 : index
    %28 = vector.load %arg3[%c0_14, %c0_15] : memref<1x16xf32, #tpu.memory_space<vmem>>, vector<1x16xf32>
    %29 = vector.broadcast %28 : vector<1x16xf32> to vector<64x16xf32>
    %30 = arith.addf %27, %29 : vector<64x16xf32>
    %cst_16 = arith.constant 0.000000e+00 : f32
    %31 = vector.broadcast %cst_16 : f32 to vector<64x16xf32>
    %32 = arith.maximumf %30, %31 : vector<64x16xf32>
    %cst_17 = arith.constant 0.000000e+00 : f32
    %33 = vector.broadcast %cst_17 : f32 to vector<10x10x16xf32>
    %c0_18 = arith.constant 0 : index
    %c0_19 = arith.constant 0 : index
    %c0_20 = arith.constant 0 : index
    %34 = vector.load %arg8[%c0_18, %c0_19, %c0_20] : memref<10x10x16xf32, #tpu.memory_space<vmem>>, vector<10x10x16xf32>
    tpu.vector_store %arg8[%c0_18, %c0_19, %c0_20], %33 {strides = array<i32>} : memref<10x10x16xf32, #tpu.memory_space<vmem>>, vector<10x10x16xf32>,
    %35 = vector.shape_cast %32 : vector<64x16xf32> to vector<8x8x16xf32>
    %c1_21 = arith.constant 1 : index
    %c1_22 = arith.constant 1 : index
    %c0_23 = arith.constant 0 : index
    %36 = vector.load %arg8[%c1_21, %c1_22, %c0_23] : memref<10x10x16xf32, #tpu.memory_space<vmem>>, vector<8x8x16xf32>
    tpu.vector_store %arg8[%c1_21, %c1_22, %c0_23], %35 {strides = array<i32>} : memref<10x10x16xf32, #tpu.memory_space<vmem>>, vector<8x8x16xf32>,
    %c0_24 = arith.constant 0 : index
    %c0_25 = arith.constant 0 : index
    %c0_26 = arith.constant 0 : index
    %37 = vector.load %arg8[%c0_24, %c0_25, %c0_26] : memref<10x10x16xf32, #tpu.memory_space<vmem>>, vector<10x10x16xf32>
    %38 = vector.extract_strided_slice %37 {offsets = [0, 0, 0], sizes = [8, 8, 16], strides = [1, 1, 1]} : vector<10x10x16xf32> to vector<8x8x16xf32>
    %39 = vector.shape_cast %38 : vector<8x8x16xf32> to vector<64x16xf32>
    %40 = vector.extract_strided_slice %37 {offsets = [0, 1, 0], sizes = [8, 8, 16], strides = [1, 1, 1]} : vector<10x10x16xf32> to vector<8x8x16xf32>
    %41 = vector.shape_cast %40 : vector<8x8x16xf32> to vector<64x16xf32>
    %42 = vector.extract_strided_slice %37 {offsets = [0, 2, 0], sizes = [8, 8, 16], strides = [1, 1, 1]} : vector<10x10x16xf32> to vector<8x8x16xf32>
    %43 = vector.shape_cast %42 : vector<8x8x16xf32> to vector<64x16xf32>
    %44 = vector.extract_strided_slice %37 {offsets = [1, 0, 0], sizes = [8, 8, 16], strides = [1, 1, 1]} : vector<10x10x16xf32> to vector<8x8x16xf32>
    %45 = vector.shape_cast %44 : vector<8x8x16xf32> to vector<64x16xf32>
    %46 = vector.extract_strided_slice %37 {offsets = [1, 1, 0], sizes = [8, 8, 16], strides = [1, 1, 1]} : vector<10x10x16xf32> to vector<8x8x16xf32>
    %47 = vector.shape_cast %46 : vector<8x8x16xf32> to vector<64x16xf32>
    %48 = vector.extract_strided_slice %37 {offsets = [1, 2, 0], sizes = [8, 8, 16], strides = [1, 1, 1]} : vector<10x10x16xf32> to vector<8x8x16xf32>
    %49 = vector.shape_cast %48 : vector<8x8x16xf32> to vector<64x16xf32>
    %50 = vector.extract_strided_slice %37 {offsets = [2, 0, 0], sizes = [8, 8, 16], strides = [1, 1, 1]} : vector<10x10x16xf32> to vector<8x8x16xf32>
    %51 = vector.shape_cast %50 : vector<8x8x16xf32> to vector<64x16xf32>
    %52 = vector.extract_strided_slice %37 {offsets = [2, 1, 0], sizes = [8, 8, 16], strides = [1, 1, 1]} : vector<10x10x16xf32> to vector<8x8x16xf32>
    %53 = vector.shape_cast %52 : vector<8x8x16xf32> to vector<64x16xf32>
    %54 = vector.extract_strided_slice %37 {offsets = [2, 2, 0], sizes = [8, 8, 16], strides = [1, 1, 1]} : vector<10x10x16xf32> to vector<8x8x16xf32>
    %55 = vector.shape_cast %54 : vector<8x8x16xf32> to vector<64x16xf32>
    %56 = tpu.concatenate %39, %41, %43, %45, %47, %49, %51, %53, %55 in 1 : vector<64x16xf32>, vector<64x16xf32>, vector<64x16xf32>, vector<64x16xf32>, vector<64x16xf32>, vector<64x16xf32>, vector<64x16xf32>, vector<64x16xf32>, vector<64x16xf32> -> vector<64x144xf32>
    %57 = arith.truncf %56 : vector<64x144xf32> to vector<64x144xbf16>
    %c0_27 = arith.constant 0 : index
    %c0_28 = arith.constant 0 : index
    %58 = vector.load %arg4[%c0_27, %c0_28] : memref<144x16xbf16, #tpu.memory_space<vmem>>, vector<144x16xbf16>
    %cst_29 = arith.constant dense<0.000000e+00> : vector<64x16xf32>
    %59 = tpu.matmul %57, %58, %cst_29 {dimension_numbers = #tpu.dot_dimension_numbers<[1], [0], [0], [1], [0, 0, 1, 1], [], []>} : vector<64x144xbf16>, vector<144x16xbf16>, vector<64x16xf32> -> vector<64x16xf32>
    %c0_30 = arith.constant 0 : index
    %c0_31 = arith.constant 0 : index
    %60 = vector.load %arg5[%c0_30, %c0_31] : memref<1x16xf32, #tpu.memory_space<vmem>>, vector<1x16xf32>
    %61 = vector.broadcast %60 : vector<1x16xf32> to vector<64x16xf32>
    %62 = arith.addf %59, %61 : vector<64x16xf32>
    %63 = vector.shape_cast %1 : vector<8x8x16xf32> to vector<64x16xf32>
    %64 = arith.addf %62, %63 : vector<64x16xf32>
    %cst_32 = arith.constant 0.000000e+00 : f32
    %65 = vector.broadcast %cst_32 : f32 to vector<64x16xf32>
    %66 = arith.maximumf %64, %65 : vector<64x16xf32>
    %67 = vector.shape_cast %66 : vector<64x16xf32> to vector<8x8x16xf32>
    %68 = tpu.concatenate %1, %67 in 2 : vector<8x8x16xf32>, vector<8x8x16xf32> -> vector<8x8x32xf32>
    %c0_33 = arith.constant 0 : index
    %c0_34 = arith.constant 0 : index
    %c0_35 = arith.constant 0 : index
    %c0_36 = arith.constant 0 : index
    %69 = vector.load %arg6[%c0_33, %c0_34, %c0_35, %c0_36] : memref<1x8x8x32xf32, #tpu.memory_space<vmem>>, vector<1x8x8x32xf32>
    %70 = vector.shape_cast %69 : vector<1x8x8x32xf32> to vector<8x8x32xf32>
    %71 = vector.shape_cast %68 : vector<8x8x32xf32> to vector<1x8x8x32xf32>
    tpu.vector_store %arg6[%c0_33, %c0_34, %c0_35, %c0_36], %71 {strides = array<i32>} : memref<1x8x8x32xf32, #tpu.memory_space<vmem>>, vector<1x8x8x32xf32>,
    return
  }
  func.func @transform_0(%arg0: i32) -> (i32, i32, i32, i32) {
    %c0_i32 = arith.constant 0 : i32
    %c0_i32_0 = arith.constant 0 : i32
    %c0_i32_1 = arith.constant 0 : i32
    %c0_i32_2 = arith.constant 0 : i32
    return %arg0, %c0_i32, %c0_i32_0, %c0_i32_1 : i32, i32, i32, i32
  }
  func.func @transform_1(%arg0: i32) -> (i32, i32) {
    %c0_i32 = arith.constant 0 : i32
    %c0_i32_0 = arith.constant 0 : i32
    %c0_i32_1 = arith.constant 0 : i32
    return %c0_i32, %c0_i32_0 : i32, i32
  }
  func.func @transform_2(%arg0: i32) -> (i32, i32) {
    %c0_i32 = arith.constant 0 : i32
    %c0_i32_0 = arith.constant 0 : i32
    %c0_i32_1 = arith.constant 0 : i32
    return %c0_i32, %c0_i32_0 : i32, i32
  }
  func.func @transform_3(%arg0: i32) -> (i32, i32) {
    %c0_i32 = arith.constant 0 : i32
    %c0_i32_0 = arith.constant 0 : i32
    %c0_i32_1 = arith.constant 0 : i32
    return %c0_i32, %c0_i32_0 : i32, i32
  }
  func.func @transform_4(%arg0: i32) -> (i32, i32) {
    %c0_i32 = arith.constant 0 : i32
    %c0_i32_0 = arith.constant 0 : i32
    %c0_i32_1 = arith.constant 0 : i32
    return %c0_i32, %c0_i32_0 : i32, i32
  }
  func.func @transform_5(%arg0: i32) -> (i32, i32, i32, i32) {
    %c0_i32 = arith.constant 0 : i32
    %c0_i32_0 = arith.constant 0 : i32
    %c0_i32_1 = arith.constant 0 : i32
    %c0_i32_2 = arith.constant 0 : i32
    return %arg0, %c0_i32, %c0_i32_0, %c0_i32_1 : i32, i32, i32, i32
  }
}

module attributes {stable_mosaic.version = 11 : i64} {
  func.func @kernel(%arg0: i32, %arg1: memref<1x8x8x32xf32, #tpu.memory_space<vmem>>, %arg2: memref<288x32xbf16, #tpu.memory_space<vmem>>, %arg3: memref<1x32xf32, #tpu.memory_space<vmem>>, %arg4: memref<288x32xbf16, #tpu.memory_space<vmem>>, %arg5: memref<1x32xf32, #tpu.memory_space<vmem>>, %arg6: memref<1x8x8x64xf32, #tpu.memory_space<vmem>>, %arg7: memref<10x10x32xf32, #tpu.memory_space<vmem>>, %arg8: memref<10x10x32xf32, #tpu.memory_space<vmem>>) attributes {dimension_semantics = [#tpu.dimension_semantics<parallel>], iteration_bounds = array<i64: 2>, scalar_prefetch = 0 : i64, scratch_operands = 2 : i64, tpu.core_type = #tpu.core_type<tc>, window_params = [{transform_indices = @transform_0, window_bounds = array<i64: 1, 8, 8, 32>}, {pipeline_mode = #tpu.pipeline_mode<synchronous>, transform_indices = @transform_1, window_bounds = array<i64: 288, 32>}, {pipeline_mode = #tpu.pipeline_mode<synchronous>, transform_indices = @transform_2, window_bounds = array<i64: 1, 32>}, {pipeline_mode = #tpu.pipeline_mode<synchronous>, transform_indices = @transform_3, window_bounds = array<i64: 288, 32>}, {pipeline_mode = #tpu.pipeline_mode<synchronous>, transform_indices = @transform_4, window_bounds = array<i64: 1, 32>}, {transform_indices = @transform_5, window_bounds = array<i64: 1, 8, 8, 64>}]} {
    %c0 = arith.constant 0 : index
    %c0_0 = arith.constant 0 : index
    %c0_1 = arith.constant 0 : index
    %c0_2 = arith.constant 0 : index
    %0 = vector.load %arg1[%c0, %c0_0, %c0_1, %c0_2] : memref<1x8x8x32xf32, #tpu.memory_space<vmem>>, vector<1x8x8x32xf32>
    %1 = vector.shape_cast %0 : vector<1x8x8x32xf32> to vector<8x8x32xf32>
    %cst = arith.constant 0.000000e+00 : f32
    %2 = vector.broadcast %cst : f32 to vector<10x10x32xf32>
    %c0_3 = arith.constant 0 : index
    %c0_4 = arith.constant 0 : index
    %c0_5 = arith.constant 0 : index
    %3 = vector.load %arg7[%c0_3, %c0_4, %c0_5] : memref<10x10x32xf32, #tpu.memory_space<vmem>>, vector<10x10x32xf32>
    tpu.vector_store %arg7[%c0_3, %c0_4, %c0_5], %2 {strides = array<i32>} : memref<10x10x32xf32, #tpu.memory_space<vmem>>, vector<10x10x32xf32>,
    %c1 = arith.constant 1 : index
    %c1_6 = arith.constant 1 : index
    %c0_7 = arith.constant 0 : index
    %4 = vector.load %arg7[%c1, %c1_6, %c0_7] : memref<10x10x32xf32, #tpu.memory_space<vmem>>, vector<8x8x32xf32>
    tpu.vector_store %arg7[%c1, %c1_6, %c0_7], %1 {strides = array<i32>} : memref<10x10x32xf32, #tpu.memory_space<vmem>>, vector<8x8x32xf32>,
    %c0_8 = arith.constant 0 : index
    %c0_9 = arith.constant 0 : index
    %c0_10 = arith.constant 0 : index
    %5 = vector.load %arg7[%c0_8, %c0_9, %c0_10] : memref<10x10x32xf32, #tpu.memory_space<vmem>>, vector<10x10x32xf32>
    %6 = vector.extract_strided_slice %5 {offsets = [0, 0, 0], sizes = [8, 8, 32], strides = [1, 1, 1]} : vector<10x10x32xf32> to vector<8x8x32xf32>
    %7 = vector.shape_cast %6 : vector<8x8x32xf32> to vector<64x32xf32>
    %8 = vector.extract_strided_slice %5 {offsets = [0, 1, 0], sizes = [8, 8, 32], strides = [1, 1, 1]} : vector<10x10x32xf32> to vector<8x8x32xf32>
    %9 = vector.shape_cast %8 : vector<8x8x32xf32> to vector<64x32xf32>
    %10 = vector.extract_strided_slice %5 {offsets = [0, 2, 0], sizes = [8, 8, 32], strides = [1, 1, 1]} : vector<10x10x32xf32> to vector<8x8x32xf32>
    %11 = vector.shape_cast %10 : vector<8x8x32xf32> to vector<64x32xf32>
    %12 = vector.extract_strided_slice %5 {offsets = [1, 0, 0], sizes = [8, 8, 32], strides = [1, 1, 1]} : vector<10x10x32xf32> to vector<8x8x32xf32>
    %13 = vector.shape_cast %12 : vector<8x8x32xf32> to vector<64x32xf32>
    %14 = vector.extract_strided_slice %5 {offsets = [1, 1, 0], sizes = [8, 8, 32], strides = [1, 1, 1]} : vector<10x10x32xf32> to vector<8x8x32xf32>
    %15 = vector.shape_cast %14 : vector<8x8x32xf32> to vector<64x32xf32>
    %16 = vector.extract_strided_slice %5 {offsets = [1, 2, 0], sizes = [8, 8, 32], strides = [1, 1, 1]} : vector<10x10x32xf32> to vector<8x8x32xf32>
    %17 = vector.shape_cast %16 : vector<8x8x32xf32> to vector<64x32xf32>
    %18 = vector.extract_strided_slice %5 {offsets = [2, 0, 0], sizes = [8, 8, 32], strides = [1, 1, 1]} : vector<10x10x32xf32> to vector<8x8x32xf32>
    %19 = vector.shape_cast %18 : vector<8x8x32xf32> to vector<64x32xf32>
    %20 = vector.extract_strided_slice %5 {offsets = [2, 1, 0], sizes = [8, 8, 32], strides = [1, 1, 1]} : vector<10x10x32xf32> to vector<8x8x32xf32>
    %21 = vector.shape_cast %20 : vector<8x8x32xf32> to vector<64x32xf32>
    %22 = vector.extract_strided_slice %5 {offsets = [2, 2, 0], sizes = [8, 8, 32], strides = [1, 1, 1]} : vector<10x10x32xf32> to vector<8x8x32xf32>
    %23 = vector.shape_cast %22 : vector<8x8x32xf32> to vector<64x32xf32>
    %24 = tpu.concatenate %7, %9, %11, %13, %15, %17, %19, %21, %23 in 1 : vector<64x32xf32>, vector<64x32xf32>, vector<64x32xf32>, vector<64x32xf32>, vector<64x32xf32>, vector<64x32xf32>, vector<64x32xf32>, vector<64x32xf32>, vector<64x32xf32> -> vector<64x288xf32>
    %25 = arith.truncf %24 : vector<64x288xf32> to vector<64x288xbf16>
    %c0_11 = arith.constant 0 : index
    %c0_12 = arith.constant 0 : index
    %26 = vector.load %arg2[%c0_11, %c0_12] : memref<288x32xbf16, #tpu.memory_space<vmem>>, vector<288x32xbf16>
    %cst_13 = arith.constant dense<0.000000e+00> : vector<64x32xf32>
    %27 = tpu.matmul %25, %26, %cst_13 {dimension_numbers = #tpu.dot_dimension_numbers<[1], [0], [0], [1], [0, 0, 1, 1], [], []>} : vector<64x288xbf16>, vector<288x32xbf16>, vector<64x32xf32> -> vector<64x32xf32>
    %c0_14 = arith.constant 0 : index
    %c0_15 = arith.constant 0 : index
    %28 = vector.load %arg3[%c0_14, %c0_15] : memref<1x32xf32, #tpu.memory_space<vmem>>, vector<1x32xf32>
    %29 = vector.broadcast %28 : vector<1x32xf32> to vector<64x32xf32>
    %30 = arith.addf %27, %29 : vector<64x32xf32>
    %cst_16 = arith.constant 0.000000e+00 : f32
    %31 = vector.broadcast %cst_16 : f32 to vector<64x32xf32>
    %32 = arith.maximumf %30, %31 : vector<64x32xf32>
    %cst_17 = arith.constant 0.000000e+00 : f32
    %33 = vector.broadcast %cst_17 : f32 to vector<10x10x32xf32>
    %c0_18 = arith.constant 0 : index
    %c0_19 = arith.constant 0 : index
    %c0_20 = arith.constant 0 : index
    %34 = vector.load %arg8[%c0_18, %c0_19, %c0_20] : memref<10x10x32xf32, #tpu.memory_space<vmem>>, vector<10x10x32xf32>
    tpu.vector_store %arg8[%c0_18, %c0_19, %c0_20], %33 {strides = array<i32>} : memref<10x10x32xf32, #tpu.memory_space<vmem>>, vector<10x10x32xf32>,
    %35 = vector.shape_cast %32 : vector<64x32xf32> to vector<8x8x32xf32>
    %c1_21 = arith.constant 1 : index
    %c1_22 = arith.constant 1 : index
    %c0_23 = arith.constant 0 : index
    %36 = vector.load %arg8[%c1_21, %c1_22, %c0_23] : memref<10x10x32xf32, #tpu.memory_space<vmem>>, vector<8x8x32xf32>
    tpu.vector_store %arg8[%c1_21, %c1_22, %c0_23], %35 {strides = array<i32>} : memref<10x10x32xf32, #tpu.memory_space<vmem>>, vector<8x8x32xf32>,
    %c0_24 = arith.constant 0 : index
    %c0_25 = arith.constant 0 : index
    %c0_26 = arith.constant 0 : index
    %37 = vector.load %arg8[%c0_24, %c0_25, %c0_26] : memref<10x10x32xf32, #tpu.memory_space<vmem>>, vector<10x10x32xf32>
    %38 = vector.extract_strided_slice %37 {offsets = [0, 0, 0], sizes = [8, 8, 32], strides = [1, 1, 1]} : vector<10x10x32xf32> to vector<8x8x32xf32>
    %39 = vector.shape_cast %38 : vector<8x8x32xf32> to vector<64x32xf32>
    %40 = vector.extract_strided_slice %37 {offsets = [0, 1, 0], sizes = [8, 8, 32], strides = [1, 1, 1]} : vector<10x10x32xf32> to vector<8x8x32xf32>
    %41 = vector.shape_cast %40 : vector<8x8x32xf32> to vector<64x32xf32>
    %42 = vector.extract_strided_slice %37 {offsets = [0, 2, 0], sizes = [8, 8, 32], strides = [1, 1, 1]} : vector<10x10x32xf32> to vector<8x8x32xf32>
    %43 = vector.shape_cast %42 : vector<8x8x32xf32> to vector<64x32xf32>
    %44 = vector.extract_strided_slice %37 {offsets = [1, 0, 0], sizes = [8, 8, 32], strides = [1, 1, 1]} : vector<10x10x32xf32> to vector<8x8x32xf32>
    %45 = vector.shape_cast %44 : vector<8x8x32xf32> to vector<64x32xf32>
    %46 = vector.extract_strided_slice %37 {offsets = [1, 1, 0], sizes = [8, 8, 32], strides = [1, 1, 1]} : vector<10x10x32xf32> to vector<8x8x32xf32>
    %47 = vector.shape_cast %46 : vector<8x8x32xf32> to vector<64x32xf32>
    %48 = vector.extract_strided_slice %37 {offsets = [1, 2, 0], sizes = [8, 8, 32], strides = [1, 1, 1]} : vector<10x10x32xf32> to vector<8x8x32xf32>
    %49 = vector.shape_cast %48 : vector<8x8x32xf32> to vector<64x32xf32>
    %50 = vector.extract_strided_slice %37 {offsets = [2, 0, 0], sizes = [8, 8, 32], strides = [1, 1, 1]} : vector<10x10x32xf32> to vector<8x8x32xf32>
    %51 = vector.shape_cast %50 : vector<8x8x32xf32> to vector<64x32xf32>
    %52 = vector.extract_strided_slice %37 {offsets = [2, 1, 0], sizes = [8, 8, 32], strides = [1, 1, 1]} : vector<10x10x32xf32> to vector<8x8x32xf32>
    %53 = vector.shape_cast %52 : vector<8x8x32xf32> to vector<64x32xf32>
    %54 = vector.extract_strided_slice %37 {offsets = [2, 2, 0], sizes = [8, 8, 32], strides = [1, 1, 1]} : vector<10x10x32xf32> to vector<8x8x32xf32>
    %55 = vector.shape_cast %54 : vector<8x8x32xf32> to vector<64x32xf32>
    %56 = tpu.concatenate %39, %41, %43, %45, %47, %49, %51, %53, %55 in 1 : vector<64x32xf32>, vector<64x32xf32>, vector<64x32xf32>, vector<64x32xf32>, vector<64x32xf32>, vector<64x32xf32>, vector<64x32xf32>, vector<64x32xf32>, vector<64x32xf32> -> vector<64x288xf32>
    %57 = arith.truncf %56 : vector<64x288xf32> to vector<64x288xbf16>
    %c0_27 = arith.constant 0 : index
    %c0_28 = arith.constant 0 : index
    %58 = vector.load %arg4[%c0_27, %c0_28] : memref<288x32xbf16, #tpu.memory_space<vmem>>, vector<288x32xbf16>
    %cst_29 = arith.constant dense<0.000000e+00> : vector<64x32xf32>
    %59 = tpu.matmul %57, %58, %cst_29 {dimension_numbers = #tpu.dot_dimension_numbers<[1], [0], [0], [1], [0, 0, 1, 1], [], []>} : vector<64x288xbf16>, vector<288x32xbf16>, vector<64x32xf32> -> vector<64x32xf32>
    %c0_30 = arith.constant 0 : index
    %c0_31 = arith.constant 0 : index
    %60 = vector.load %arg5[%c0_30, %c0_31] : memref<1x32xf32, #tpu.memory_space<vmem>>, vector<1x32xf32>
    %61 = vector.broadcast %60 : vector<1x32xf32> to vector<64x32xf32>
    %62 = arith.addf %59, %61 : vector<64x32xf32>
    %63 = vector.shape_cast %1 : vector<8x8x32xf32> to vector<64x32xf32>
    %64 = arith.addf %62, %63 : vector<64x32xf32>
    %cst_32 = arith.constant 0.000000e+00 : f32
    %65 = vector.broadcast %cst_32 : f32 to vector<64x32xf32>
    %66 = arith.maximumf %64, %65 : vector<64x32xf32>
    %67 = vector.shape_cast %66 : vector<64x32xf32> to vector<8x8x32xf32>
    %68 = tpu.concatenate %1, %67 in 2 : vector<8x8x32xf32>, vector<8x8x32xf32> -> vector<8x8x64xf32>
    %c0_33 = arith.constant 0 : index
    %c0_34 = arith.constant 0 : index
    %c0_35 = arith.constant 0 : index
    %c0_36 = arith.constant 0 : index
    %69 = vector.load %arg6[%c0_33, %c0_34, %c0_35, %c0_36] : memref<1x8x8x64xf32, #tpu.memory_space<vmem>>, vector<1x8x8x64xf32>
    %70 = vector.shape_cast %69 : vector<1x8x8x64xf32> to vector<8x8x64xf32>
    %71 = vector.shape_cast %68 : vector<8x8x64xf32> to vector<1x8x8x64xf32>
    tpu.vector_store %arg6[%c0_33, %c0_34, %c0_35, %c0_36], %71 {strides = array<i32>} : memref<1x8x8x64xf32, #tpu.memory_space<vmem>>, vector<1x8x8x64xf32>,
    return
  }
  func.func @transform_0(%arg0: i32) -> (i32, i32, i32, i32) {
    %c0_i32 = arith.constant 0 : i32
    %c0_i32_0 = arith.constant 0 : i32
    %c0_i32_1 = arith.constant 0 : i32
    %c0_i32_2 = arith.constant 0 : i32
    return %arg0, %c0_i32, %c0_i32_0, %c0_i32_1 : i32, i32, i32, i32
  }
  func.func @transform_1(%arg0: i32) -> (i32, i32) {
    %c0_i32 = arith.constant 0 : i32
    %c0_i32_0 = arith.constant 0 : i32
    %c0_i32_1 = arith.constant 0 : i32
    return %c0_i32, %c0_i32_0 : i32, i32
  }
  func.func @transform_2(%arg0: i32) -> (i32, i32) {
    %c0_i32 = arith.constant 0 : i32
    %c0_i32_0 = arith.constant 0 : i32
    %c0_i32_1 = arith.constant 0 : i32
    return %c0_i32, %c0_i32_0 : i32, i32
  }
  func.func @transform_3(%arg0: i32) -> (i32, i32) {
    %c0_i32 = arith.constant 0 : i32
    %c0_i32_0 = arith.constant 0 : i32
    %c0_i32_1 = arith.constant 0 : i32
    return %c0_i32, %c0_i32_0 : i32, i32
  }
  func.func @transform_4(%arg0: i32) -> (i32, i32) {
    %c0_i32 = arith.constant 0 : i32
    %c0_i32_0 = arith.constant 0 : i32
    %c0_i32_1 = arith.constant 0 : i32
    return %c0_i32, %c0_i32_0 : i32, i32
  }
  func.func @transform_5(%arg0: i32) -> (i32, i32, i32, i32) {
    %c0_i32 = arith.constant 0 : i32
    %c0_i32_0 = arith.constant 0 : i32
    %c0_i32_1 = arith.constant 0 : i32
    %c0_i32_2 = arith.constant 0 : i32
    return %arg0, %c0_i32, %c0_i32_0, %c0_i32_1 : i32, i32, i32, i32
  }
}

module attributes {stable_mosaic.version = 11 : i64} {
  func.func @kernel(%arg0: i32, %arg1: memref<1x8x8x64xf32, #tpu.memory_space<vmem>>, %arg2: memref<576x64xbf16, #tpu.memory_space<vmem>>, %arg3: memref<1x64xf32, #tpu.memory_space<vmem>>, %arg4: memref<576x64xbf16, #tpu.memory_space<vmem>>, %arg5: memref<1x64xf32, #tpu.memory_space<vmem>>, %arg6: memref<1x8x8x128xf32, #tpu.memory_space<vmem>>, %arg7: memref<10x10x64xf32, #tpu.memory_space<vmem>>, %arg8: memref<10x10x64xf32, #tpu.memory_space<vmem>>) attributes {dimension_semantics = [#tpu.dimension_semantics<parallel>], iteration_bounds = array<i64: 2>, scalar_prefetch = 0 : i64, scratch_operands = 2 : i64, tpu.core_type = #tpu.core_type<tc>, window_params = [{transform_indices = @transform_0, window_bounds = array<i64: 1, 8, 8, 64>}, {pipeline_mode = #tpu.pipeline_mode<synchronous>, transform_indices = @transform_1, window_bounds = array<i64: 576, 64>}, {pipeline_mode = #tpu.pipeline_mode<synchronous>, transform_indices = @transform_2, window_bounds = array<i64: 1, 64>}, {pipeline_mode = #tpu.pipeline_mode<synchronous>, transform_indices = @transform_3, window_bounds = array<i64: 576, 64>}, {pipeline_mode = #tpu.pipeline_mode<synchronous>, transform_indices = @transform_4, window_bounds = array<i64: 1, 64>}, {transform_indices = @transform_5, window_bounds = array<i64: 1, 8, 8, 128>}]} {
    %c0 = arith.constant 0 : index
    %c0_0 = arith.constant 0 : index
    %c0_1 = arith.constant 0 : index
    %c0_2 = arith.constant 0 : index
    %0 = vector.load %arg1[%c0, %c0_0, %c0_1, %c0_2] : memref<1x8x8x64xf32, #tpu.memory_space<vmem>>, vector<1x8x8x64xf32>
    %1 = vector.shape_cast %0 : vector<1x8x8x64xf32> to vector<8x8x64xf32>
    %cst = arith.constant 0.000000e+00 : f32
    %2 = vector.broadcast %cst : f32 to vector<10x10x64xf32>
    %c0_3 = arith.constant 0 : index
    %c0_4 = arith.constant 0 : index
    %c0_5 = arith.constant 0 : index
    %3 = vector.load %arg7[%c0_3, %c0_4, %c0_5] : memref<10x10x64xf32, #tpu.memory_space<vmem>>, vector<10x10x64xf32>
    tpu.vector_store %arg7[%c0_3, %c0_4, %c0_5], %2 {strides = array<i32>} : memref<10x10x64xf32, #tpu.memory_space<vmem>>, vector<10x10x64xf32>,
    %c1 = arith.constant 1 : index
    %c1_6 = arith.constant 1 : index
    %c0_7 = arith.constant 0 : index
    %4 = vector.load %arg7[%c1, %c1_6, %c0_7] : memref<10x10x64xf32, #tpu.memory_space<vmem>>, vector<8x8x64xf32>
    tpu.vector_store %arg7[%c1, %c1_6, %c0_7], %1 {strides = array<i32>} : memref<10x10x64xf32, #tpu.memory_space<vmem>>, vector<8x8x64xf32>,
    %c0_8 = arith.constant 0 : index
    %c0_9 = arith.constant 0 : index
    %c0_10 = arith.constant 0 : index
    %5 = vector.load %arg7[%c0_8, %c0_9, %c0_10] : memref<10x10x64xf32, #tpu.memory_space<vmem>>, vector<10x10x64xf32>
    %6 = vector.extract_strided_slice %5 {offsets = [0, 0, 0], sizes = [8, 8, 64], strides = [1, 1, 1]} : vector<10x10x64xf32> to vector<8x8x64xf32>
    %7 = vector.shape_cast %6 : vector<8x8x64xf32> to vector<64x64xf32>
    %8 = vector.extract_strided_slice %5 {offsets = [0, 1, 0], sizes = [8, 8, 64], strides = [1, 1, 1]} : vector<10x10x64xf32> to vector<8x8x64xf32>
    %9 = vector.shape_cast %8 : vector<8x8x64xf32> to vector<64x64xf32>
    %10 = vector.extract_strided_slice %5 {offsets = [0, 2, 0], sizes = [8, 8, 64], strides = [1, 1, 1]} : vector<10x10x64xf32> to vector<8x8x64xf32>
    %11 = vector.shape_cast %10 : vector<8x8x64xf32> to vector<64x64xf32>
    %12 = vector.extract_strided_slice %5 {offsets = [1, 0, 0], sizes = [8, 8, 64], strides = [1, 1, 1]} : vector<10x10x64xf32> to vector<8x8x64xf32>
    %13 = vector.shape_cast %12 : vector<8x8x64xf32> to vector<64x64xf32>
    %14 = vector.extract_strided_slice %5 {offsets = [1, 1, 0], sizes = [8, 8, 64], strides = [1, 1, 1]} : vector<10x10x64xf32> to vector<8x8x64xf32>
    %15 = vector.shape_cast %14 : vector<8x8x64xf32> to vector<64x64xf32>
    %16 = vector.extract_strided_slice %5 {offsets = [1, 2, 0], sizes = [8, 8, 64], strides = [1, 1, 1]} : vector<10x10x64xf32> to vector<8x8x64xf32>
    %17 = vector.shape_cast %16 : vector<8x8x64xf32> to vector<64x64xf32>
    %18 = vector.extract_strided_slice %5 {offsets = [2, 0, 0], sizes = [8, 8, 64], strides = [1, 1, 1]} : vector<10x10x64xf32> to vector<8x8x64xf32>
    %19 = vector.shape_cast %18 : vector<8x8x64xf32> to vector<64x64xf32>
    %20 = vector.extract_strided_slice %5 {offsets = [2, 1, 0], sizes = [8, 8, 64], strides = [1, 1, 1]} : vector<10x10x64xf32> to vector<8x8x64xf32>
    %21 = vector.shape_cast %20 : vector<8x8x64xf32> to vector<64x64xf32>
    %22 = vector.extract_strided_slice %5 {offsets = [2, 2, 0], sizes = [8, 8, 64], strides = [1, 1, 1]} : vector<10x10x64xf32> to vector<8x8x64xf32>
    %23 = vector.shape_cast %22 : vector<8x8x64xf32> to vector<64x64xf32>
    %24 = tpu.concatenate %7, %9, %11, %13, %15, %17, %19, %21, %23 in 1 : vector<64x64xf32>, vector<64x64xf32>, vector<64x64xf32>, vector<64x64xf32>, vector<64x64xf32>, vector<64x64xf32>, vector<64x64xf32>, vector<64x64xf32>, vector<64x64xf32> -> vector<64x576xf32>
    %25 = arith.truncf %24 : vector<64x576xf32> to vector<64x576xbf16>
    %c0_11 = arith.constant 0 : index
    %c0_12 = arith.constant 0 : index
    %26 = vector.load %arg2[%c0_11, %c0_12] : memref<576x64xbf16, #tpu.memory_space<vmem>>, vector<576x64xbf16>
    %cst_13 = arith.constant dense<0.000000e+00> : vector<64x64xf32>
    %27 = tpu.matmul %25, %26, %cst_13 {dimension_numbers = #tpu.dot_dimension_numbers<[1], [0], [0], [1], [0, 0, 1, 1], [], []>} : vector<64x576xbf16>, vector<576x64xbf16>, vector<64x64xf32> -> vector<64x64xf32>
    %c0_14 = arith.constant 0 : index
    %c0_15 = arith.constant 0 : index
    %28 = vector.load %arg3[%c0_14, %c0_15] : memref<1x64xf32, #tpu.memory_space<vmem>>, vector<1x64xf32>
    %29 = vector.broadcast %28 : vector<1x64xf32> to vector<64x64xf32>
    %30 = arith.addf %27, %29 : vector<64x64xf32>
    %cst_16 = arith.constant 0.000000e+00 : f32
    %31 = vector.broadcast %cst_16 : f32 to vector<64x64xf32>
    %32 = arith.maximumf %30, %31 : vector<64x64xf32>
    %cst_17 = arith.constant 0.000000e+00 : f32
    %33 = vector.broadcast %cst_17 : f32 to vector<10x10x64xf32>
    %c0_18 = arith.constant 0 : index
    %c0_19 = arith.constant 0 : index
    %c0_20 = arith.constant 0 : index
    %34 = vector.load %arg8[%c0_18, %c0_19, %c0_20] : memref<10x10x64xf32, #tpu.memory_space<vmem>>, vector<10x10x64xf32>
    tpu.vector_store %arg8[%c0_18, %c0_19, %c0_20], %33 {strides = array<i32>} : memref<10x10x64xf32, #tpu.memory_space<vmem>>, vector<10x10x64xf32>,
    %35 = vector.shape_cast %32 : vector<64x64xf32> to vector<8x8x64xf32>
    %c1_21 = arith.constant 1 : index
    %c1_22 = arith.constant 1 : index
    %c0_23 = arith.constant 0 : index
    %36 = vector.load %arg8[%c1_21, %c1_22, %c0_23] : memref<10x10x64xf32, #tpu.memory_space<vmem>>, vector<8x8x64xf32>
    tpu.vector_store %arg8[%c1_21, %c1_22, %c0_23], %35 {strides = array<i32>} : memref<10x10x64xf32, #tpu.memory_space<vmem>>, vector<8x8x64xf32>,
    %c0_24 = arith.constant 0 : index
    %c0_25 = arith.constant 0 : index
    %c0_26 = arith.constant 0 : index
    %37 = vector.load %arg8[%c0_24, %c0_25, %c0_26] : memref<10x10x64xf32, #tpu.memory_space<vmem>>, vector<10x10x64xf32>
    %38 = vector.extract_strided_slice %37 {offsets = [0, 0, 0], sizes = [8, 8, 64], strides = [1, 1, 1]} : vector<10x10x64xf32> to vector<8x8x64xf32>
    %39 = vector.shape_cast %38 : vector<8x8x64xf32> to vector<64x64xf32>
    %40 = vector.extract_strided_slice %37 {offsets = [0, 1, 0], sizes = [8, 8, 64], strides = [1, 1, 1]} : vector<10x10x64xf32> to vector<8x8x64xf32>
    %41 = vector.shape_cast %40 : vector<8x8x64xf32> to vector<64x64xf32>
    %42 = vector.extract_strided_slice %37 {offsets = [0, 2, 0], sizes = [8, 8, 64], strides = [1, 1, 1]} : vector<10x10x64xf32> to vector<8x8x64xf32>
    %43 = vector.shape_cast %42 : vector<8x8x64xf32> to vector<64x64xf32>
    %44 = vector.extract_strided_slice %37 {offsets = [1, 0, 0], sizes = [8, 8, 64], strides = [1, 1, 1]} : vector<10x10x64xf32> to vector<8x8x64xf32>
    %45 = vector.shape_cast %44 : vector<8x8x64xf32> to vector<64x64xf32>
    %46 = vector.extract_strided_slice %37 {offsets = [1, 1, 0], sizes = [8, 8, 64], strides = [1, 1, 1]} : vector<10x10x64xf32> to vector<8x8x64xf32>
    %47 = vector.shape_cast %46 : vector<8x8x64xf32> to vector<64x64xf32>
    %48 = vector.extract_strided_slice %37 {offsets = [1, 2, 0], sizes = [8, 8, 64], strides = [1, 1, 1]} : vector<10x10x64xf32> to vector<8x8x64xf32>
    %49 = vector.shape_cast %48 : vector<8x8x64xf32> to vector<64x64xf32>
    %50 = vector.extract_strided_slice %37 {offsets = [2, 0, 0], sizes = [8, 8, 64], strides = [1, 1, 1]} : vector<10x10x64xf32> to vector<8x8x64xf32>
    %51 = vector.shape_cast %50 : vector<8x8x64xf32> to vector<64x64xf32>
    %52 = vector.extract_strided_slice %37 {offsets = [2, 1, 0], sizes = [8, 8, 64], strides = [1, 1, 1]} : vector<10x10x64xf32> to vector<8x8x64xf32>
    %53 = vector.shape_cast %52 : vector<8x8x64xf32> to vector<64x64xf32>
    %54 = vector.extract_strided_slice %37 {offsets = [2, 2, 0], sizes = [8, 8, 64], strides = [1, 1, 1]} : vector<10x10x64xf32> to vector<8x8x64xf32>
    %55 = vector.shape_cast %54 : vector<8x8x64xf32> to vector<64x64xf32>
    %56 = tpu.concatenate %39, %41, %43, %45, %47, %49, %51, %53, %55 in 1 : vector<64x64xf32>, vector<64x64xf32>, vector<64x64xf32>, vector<64x64xf32>, vector<64x64xf32>, vector<64x64xf32>, vector<64x64xf32>, vector<64x64xf32>, vector<64x64xf32> -> vector<64x576xf32>
    %57 = arith.truncf %56 : vector<64x576xf32> to vector<64x576xbf16>
    %c0_27 = arith.constant 0 : index
    %c0_28 = arith.constant 0 : index
    %58 = vector.load %arg4[%c0_27, %c0_28] : memref<576x64xbf16, #tpu.memory_space<vmem>>, vector<576x64xbf16>
    %cst_29 = arith.constant dense<0.000000e+00> : vector<64x64xf32>
    %59 = tpu.matmul %57, %58, %cst_29 {dimension_numbers = #tpu.dot_dimension_numbers<[1], [0], [0], [1], [0, 0, 1, 1], [], []>} : vector<64x576xbf16>, vector<576x64xbf16>, vector<64x64xf32> -> vector<64x64xf32>
    %c0_30 = arith.constant 0 : index
    %c0_31 = arith.constant 0 : index
    %60 = vector.load %arg5[%c0_30, %c0_31] : memref<1x64xf32, #tpu.memory_space<vmem>>, vector<1x64xf32>
    %61 = vector.broadcast %60 : vector<1x64xf32> to vector<64x64xf32>
    %62 = arith.addf %59, %61 : vector<64x64xf32>
    %63 = vector.shape_cast %1 : vector<8x8x64xf32> to vector<64x64xf32>
    %64 = arith.addf %62, %63 : vector<64x64xf32>
    %cst_32 = arith.constant 0.000000e+00 : f32
    %65 = vector.broadcast %cst_32 : f32 to vector<64x64xf32>
    %66 = arith.maximumf %64, %65 : vector<64x64xf32>
    %67 = vector.shape_cast %66 : vector<64x64xf32> to vector<8x8x64xf32>
    %68 = tpu.concatenate %1, %67 in 2 : vector<8x8x64xf32>, vector<8x8x64xf32> -> vector<8x8x128xf32>
    %c0_33 = arith.constant 0 : index
    %c0_34 = arith.constant 0 : index
    %c0_35 = arith.constant 0 : index
    %c0_36 = arith.constant 0 : index
    %69 = vector.load %arg6[%c0_33, %c0_34, %c0_35, %c0_36] : memref<1x8x8x128xf32, #tpu.memory_space<vmem>>, vector<1x8x8x128xf32>
    %70 = vector.shape_cast %69 : vector<1x8x8x128xf32> to vector<8x8x128xf32>
    %71 = vector.shape_cast %68 : vector<8x8x128xf32> to vector<1x8x8x128xf32>
    tpu.vector_store %arg6[%c0_33, %c0_34, %c0_35, %c0_36], %71 {strides = array<i32>} : memref<1x8x8x128xf32, #tpu.memory_space<vmem>>, vector<1x8x8x128xf32>,
    return
  }
  func.func @transform_0(%arg0: i32) -> (i32, i32, i32, i32) {
    %c0_i32 = arith.constant 0 : i32
    %c0_i32_0 = arith.constant 0 : i32
    %c0_i32_1 = arith.constant 0 : i32
    %c0_i32_2 = arith.constant 0 : i32
    return %arg0, %c0_i32, %c0_i32_0, %c0_i32_1 : i32, i32, i32, i32
  }
  func.func @transform_1(%arg0: i32) -> (i32, i32) {
    %c0_i32 = arith.constant 0 : i32
    %c0_i32_0 = arith.constant 0 : i32
    %c0_i32_1 = arith.constant 0 : i32
    return %c0_i32, %c0_i32_0 : i32, i32
  }
  func.func @transform_2(%arg0: i32) -> (i32, i32) {
    %c0_i32 = arith.constant 0 : i32
    %c0_i32_0 = arith.constant 0 : i32
    %c0_i32_1 = arith.constant 0 : i32
    return %c0_i32, %c0_i32_0 : i32, i32
  }
  func.func @transform_3(%arg0: i32) -> (i32, i32) {
    %c0_i32 = arith.constant 0 : i32
    %c0_i32_0 = arith.constant 0 : i32
    %c0_i32_1 = arith.constant 0 : i32
    return %c0_i32, %c0_i32_0 : i32, i32
  }
  func.func @transform_4(%arg0: i32) -> (i32, i32) {
    %c0_i32 = arith.constant 0 : i32
    %c0_i32_0 = arith.constant 0 : i32
    %c0_i32_1 = arith.constant 0 : i32
    return %c0_i32, %c0_i32_0 : i32, i32
  }
  func.func @transform_5(%arg0: i32) -> (i32, i32, i32, i32) {
    %c0_i32 = arith.constant 0 : i32
    %c0_i32_0 = arith.constant 0 : i32
    %c0_i32_1 = arith.constant 0 : i32
    %c0_i32_2 = arith.constant 0 : i32
    return %arg0, %c0_i32, %c0_i32_0, %c0_i32_1 : i32, i32, i32, i32
  }
}

module attributes {stable_mosaic.version = 11 : i64} {
  func.func @kernel(%arg0: i32, %arg1: memref<1x8x8x128xf32, #tpu.memory_space<vmem>>, %arg2: memref<128x16xbf16, #tpu.memory_space<vmem>>, %arg3: memref<1x16xf32, #tpu.memory_space<vmem>>, %arg4: memref<16x1xf32, #tpu.memory_space<vmem>>, %arg5: memref<1x1xf32, #tpu.memory_space<vmem>>, %arg6: memref<16x1xf32, #tpu.memory_space<vmem>>, %arg7: memref<1x1xf32, #tpu.memory_space<vmem>>, %arg8: memref<16x1xf32, #tpu.memory_space<vmem>>, %arg9: memref<1x1xf32, #tpu.memory_space<vmem>>, %arg10: memref<3x16xf32, #tpu.memory_space<vmem>>, %arg11: memref<1x16xf32, #tpu.memory_space<vmem>>, %arg12: memref<1x8x8x16xf32, #tpu.memory_space<vmem>>) attributes {dimension_semantics = [#tpu.dimension_semantics<parallel>], iteration_bounds = array<i64: 2>, scalar_prefetch = 0 : i64, scratch_operands = 0 : i64, tpu.core_type = #tpu.core_type<tc>, window_params = [{transform_indices = @transform_0, window_bounds = array<i64: 1, 8, 8, 128>}, {pipeline_mode = #tpu.pipeline_mode<synchronous>, transform_indices = @transform_1, window_bounds = array<i64: 128, 16>}, {pipeline_mode = #tpu.pipeline_mode<synchronous>, transform_indices = @transform_2, window_bounds = array<i64: 1, 16>}, {pipeline_mode = #tpu.pipeline_mode<synchronous>, transform_indices = @transform_3, window_bounds = array<i64: 16, 1>}, {pipeline_mode = #tpu.pipeline_mode<synchronous>, transform_indices = @transform_4, window_bounds = array<i64: 1, 1>}, {pipeline_mode = #tpu.pipeline_mode<synchronous>, transform_indices = @transform_5, window_bounds = array<i64: 16, 1>}, {pipeline_mode = #tpu.pipeline_mode<synchronous>, transform_indices = @transform_6, window_bounds = array<i64: 1, 1>}, {pipeline_mode = #tpu.pipeline_mode<synchronous>, transform_indices = @transform_7, window_bounds = array<i64: 16, 1>}, {pipeline_mode = #tpu.pipeline_mode<synchronous>, transform_indices = @transform_8, window_bounds = array<i64: 1, 1>}, {pipeline_mode = #tpu.pipeline_mode<synchronous>, transform_indices = @transform_9, window_bounds = array<i64: 3, 16>}, {pipeline_mode = #tpu.pipeline_mode<synchronous>, transform_indices = @transform_10, window_bounds = array<i64: 1, 16>}, {transform_indices = @transform_11, window_bounds = array<i64: 1, 8, 8, 16>}]} {
    %c0 = arith.constant 0 : index
    %c0_0 = arith.constant 0 : index
    %c0_1 = arith.constant 0 : index
    %c0_2 = arith.constant 0 : index
    %0 = vector.load %arg1[%c0, %c0_0, %c0_1, %c0_2] : memref<1x8x8x128xf32, #tpu.memory_space<vmem>>, vector<1x8x8x128xf32>
    %1 = vector.shape_cast %0 : vector<1x8x8x128xf32> to vector<8x8x128xf32>
    %2 = vector.shape_cast %1 : vector<8x8x128xf32> to vector<64x128xf32>
    %3 = arith.truncf %2 : vector<64x128xf32> to vector<64x128xbf16>
    %c0_3 = arith.constant 0 : index
    %c0_4 = arith.constant 0 : index
    %4 = vector.load %arg2[%c0_3, %c0_4] : memref<128x16xbf16, #tpu.memory_space<vmem>>, vector<128x16xbf16>
    %cst = arith.constant dense<0.000000e+00> : vector<64x16xf32>
    %5 = tpu.matmul %3, %4, %cst {dimension_numbers = #tpu.dot_dimension_numbers<[1], [0], [0], [1], [0, 0, 1, 1], [], []>} : vector<64x128xbf16>, vector<128x16xbf16>, vector<64x16xf32> -> vector<64x16xf32>
    %c0_5 = arith.constant 0 : index
    %c0_6 = arith.constant 0 : index
    %6 = vector.load %arg3[%c0_5, %c0_6] : memref<1x16xf32, #tpu.memory_space<vmem>>, vector<1x16xf32>
    %7 = vector.broadcast %6 : vector<1x16xf32> to vector<64x16xf32>
    %8 = arith.addf %5, %7 : vector<64x16xf32>
    %cst_7 = arith.constant 0.000000e+00 : f32
    %9 = vector.broadcast %cst_7 : f32 to vector<64x16xf32>
    %10 = arith.maximumf %8, %9 : vector<64x16xf32>
    %cst_8 = arith.constant dense<0.000000e+00> : vector<16xf32>
    %11 = vector.multi_reduction <add>, %10, %cst_8 [0] : vector<64x16xf32> to vector<16xf32>
    %12 = vector.shape_cast %11 : vector<16xf32> to vector<1x16xf32>
    %cst_9 = arith.constant 1.562500e-02 : f32
    %13 = vector.broadcast %cst_9 : f32 to vector<1x16xf32>
    %14 = arith.mulf %12, %13 : vector<1x16xf32>
    %c0_10 = arith.constant 0 : index
    %c0_11 = arith.constant 0 : index
    %15 = vector.load %arg4[%c0_10, %c0_11] : memref<16x1xf32, #tpu.memory_space<vmem>>, vector<16x1xf32>
    %cst_12 = arith.constant dense<0.000000e+00> : vector<1x1xf32>
    %16 = tpu.matmul %14, %15, %cst_12 {dimension_numbers = #tpu.dot_dimension_numbers<[1], [0], [0], [1], [0, 0, 1, 1], [], []>} : vector<1x16xf32>, vector<16x1xf32>, vector<1x1xf32> -> vector<1x1xf32>
    %c0_13 = arith.constant 0 : index
    %c0_14 = arith.constant 0 : index
    %17 = vector.load %arg5[%c0_13, %c0_14] : memref<1x1xf32, #tpu.memory_space<vmem>>, vector<1x1xf32>
    %18 = arith.addf %16, %17 : vector<1x1xf32>
    %cst_15 = arith.constant 0.000000e+00 : f32
    %19 = vector.broadcast %cst_15 : f32 to vector<1x1xf32>
    %20 = arith.maximumf %18, %19 : vector<1x1xf32>
    %c0_16 = arith.constant 0 : index
    %c0_17 = arith.constant 0 : index
    %21 = vector.load %arg6[%c0_16, %c0_17] : memref<16x1xf32, #tpu.memory_space<vmem>>, vector<16x1xf32>
    %cst_18 = arith.constant dense<0.000000e+00> : vector<1x1xf32>
    %22 = tpu.matmul %14, %21, %cst_18 {dimension_numbers = #tpu.dot_dimension_numbers<[1], [0], [0], [1], [0, 0, 1, 1], [], []>} : vector<1x16xf32>, vector<16x1xf32>, vector<1x1xf32> -> vector<1x1xf32>
    %c0_19 = arith.constant 0 : index
    %c0_20 = arith.constant 0 : index
    %23 = vector.load %arg7[%c0_19, %c0_20] : memref<1x1xf32, #tpu.memory_space<vmem>>, vector<1x1xf32>
    %24 = arith.addf %22, %23 : vector<1x1xf32>
    %cst_21 = arith.constant 0.000000e+00 : f32
    %25 = vector.broadcast %cst_21 : f32 to vector<1x1xf32>
    %26 = arith.maximumf %24, %25 : vector<1x1xf32>
    %c0_22 = arith.constant 0 : index
    %c0_23 = arith.constant 0 : index
    %27 = vector.load %arg8[%c0_22, %c0_23] : memref<16x1xf32, #tpu.memory_space<vmem>>, vector<16x1xf32>
    %cst_24 = arith.constant dense<0.000000e+00> : vector<1x1xf32>
    %28 = tpu.matmul %14, %27, %cst_24 {dimension_numbers = #tpu.dot_dimension_numbers<[1], [0], [0], [1], [0, 0, 1, 1], [], []>} : vector<1x16xf32>, vector<16x1xf32>, vector<1x1xf32> -> vector<1x1xf32>
    %c0_25 = arith.constant 0 : index
    %c0_26 = arith.constant 0 : index
    %29 = vector.load %arg9[%c0_25, %c0_26] : memref<1x1xf32, #tpu.memory_space<vmem>>, vector<1x1xf32>
    %30 = arith.addf %28, %29 : vector<1x1xf32>
    %cst_27 = arith.constant 0.000000e+00 : f32
    %31 = vector.broadcast %cst_27 : f32 to vector<1x1xf32>
    %32 = arith.maximumf %30, %31 : vector<1x1xf32>
    %c0_28 = arith.constant 0 : index
    %c0_29 = arith.constant 0 : index
    %33 = vector.load %arg10[%c0_28, %c0_29] : memref<3x16xf32, #tpu.memory_space<vmem>>, vector<1x16xf32>
    %cst_30 = arith.constant dense<0.000000e+00> : vector<1x16xf32>
    %34 = tpu.matmul %20, %33, %cst_30 {dimension_numbers = #tpu.dot_dimension_numbers<[1], [0], [0], [1], [0, 0, 1, 1], [], []>} : vector<1x1xf32>, vector<1x16xf32>, vector<1x16xf32> -> vector<1x16xf32>
    %c1 = arith.constant 1 : index
    %c0_31 = arith.constant 0 : index
    %35 = vector.load %arg10[%c1, %c0_31] : memref<3x16xf32, #tpu.memory_space<vmem>>, vector<1x16xf32>
    %cst_32 = arith.constant dense<0.000000e+00> : vector<1x16xf32>
    %36 = tpu.matmul %26, %35, %cst_32 {dimension_numbers = #tpu.dot_dimension_numbers<[1], [0], [0], [1], [0, 0, 1, 1], [], []>} : vector<1x1xf32>, vector<1x16xf32>, vector<1x16xf32> -> vector<1x16xf32>
    %37 = arith.addf %34, %36 : vector<1x16xf32>
    %c2 = arith.constant 2 : index
    %c0_33 = arith.constant 0 : index
    %38 = vector.load %arg10[%c2, %c0_33] : memref<3x16xf32, #tpu.memory_space<vmem>>, vector<1x16xf32>
    %cst_34 = arith.constant dense<0.000000e+00> : vector<1x16xf32>
    %39 = tpu.matmul %32, %38, %cst_34 {dimension_numbers = #tpu.dot_dimension_numbers<[1], [0], [0], [1], [0, 0, 1, 1], [], []>} : vector<1x1xf32>, vector<1x16xf32>, vector<1x16xf32> -> vector<1x16xf32>
    %40 = arith.addf %37, %39 : vector<1x16xf32>
    %c0_35 = arith.constant 0 : index
    %c0_36 = arith.constant 0 : index
    %41 = vector.load %arg11[%c0_35, %c0_36] : memref<1x16xf32, #tpu.memory_space<vmem>>, vector<1x16xf32>
    %42 = arith.addf %40, %41 : vector<1x16xf32>
    %43 = arith.negf %42 : vector<1x16xf32>
    %44 = math.exp %43 : vector<1x16xf32>
    %cst_37 = arith.constant 1.000000e+00 : f32
    %45 = vector.broadcast %cst_37 : f32 to vector<1x16xf32>
    %46 = arith.addf %45, %44 : vector<1x16xf32>
    %47 = arith.divf %45, %46 : vector<1x16xf32>
    %48 = vector.broadcast %47 : vector<1x16xf32> to vector<64x16xf32>
    %49 = arith.mulf %10, %48 : vector<64x16xf32>
    %50 = vector.shape_cast %49 : vector<64x16xf32> to vector<8x8x16xf32>
    %c0_38 = arith.constant 0 : index
    %c0_39 = arith.constant 0 : index
    %c0_40 = arith.constant 0 : index
    %c0_41 = arith.constant 0 : index
    %51 = vector.load %arg12[%c0_38, %c0_39, %c0_40, %c0_41] : memref<1x8x8x16xf32, #tpu.memory_space<vmem>>, vector<1x8x8x16xf32>
    %52 = vector.shape_cast %51 : vector<1x8x8x16xf32> to vector<8x8x16xf32>
    %53 = vector.shape_cast %50 : vector<8x8x16xf32> to vector<1x8x8x16xf32>
    tpu.vector_store %arg12[%c0_38, %c0_39, %c0_40, %c0_41], %53 {strides = array<i32>} : memref<1x8x8x16xf32, #tpu.memory_space<vmem>>, vector<1x8x8x16xf32>,
    return
  }
  func.func @transform_0(%arg0: i32) -> (i32, i32, i32, i32) {
    %c0_i32 = arith.constant 0 : i32
    %c0_i32_0 = arith.constant 0 : i32
    %c0_i32_1 = arith.constant 0 : i32
    %c0_i32_2 = arith.constant 0 : i32
    return %arg0, %c0_i32, %c0_i32_0, %c0_i32_1 : i32, i32, i32, i32
  }
  func.func @transform_1(%arg0: i32) -> (i32, i32) {
    %c0_i32 = arith.constant 0 : i32
    %c0_i32_0 = arith.constant 0 : i32
    %c0_i32_1 = arith.constant 0 : i32
    return %c0_i32, %c0_i32_0 : i32, i32
  }
  func.func @transform_2(%arg0: i32) -> (i32, i32) {
    %c0_i32 = arith.constant 0 : i32
    %c0_i32_0 = arith.constant 0 : i32
    %c0_i32_1 = arith.constant 0 : i32
    return %c0_i32, %c0_i32_0 : i32, i32
  }
  func.func @transform_3(%arg0: i32) -> (i32, i32) {
    %c0_i32 = arith.constant 0 : i32
    %c0_i32_0 = arith.constant 0 : i32
    %c0_i32_1 = arith.constant 0 : i32
    return %c0_i32, %c0_i32_0 : i32, i32
  }
  func.func @transform_4(%arg0: i32) -> (i32, i32) {
    %c0_i32 = arith.constant 0 : i32
    %c0_i32_0 = arith.constant 0 : i32
    %c0_i32_1 = arith.constant 0 : i32
    return %c0_i32, %c0_i32_0 : i32, i32
  }
  func.func @transform_5(%arg0: i32) -> (i32, i32) {
    %c0_i32 = arith.constant 0 : i32
    %c0_i32_0 = arith.constant 0 : i32
    %c0_i32_1 = arith.constant 0 : i32
    return %c0_i32, %c0_i32_0 : i32, i32
  }
  func.func @transform_6(%arg0: i32) -> (i32, i32) {
    %c0_i32 = arith.constant 0 : i32
    %c0_i32_0 = arith.constant 0 : i32
    %c0_i32_1 = arith.constant 0 : i32
    return %c0_i32, %c0_i32_0 : i32, i32
  }
  func.func @transform_7(%arg0: i32) -> (i32, i32) {
    %c0_i32 = arith.constant 0 : i32
    %c0_i32_0 = arith.constant 0 : i32
    %c0_i32_1 = arith.constant 0 : i32
    return %c0_i32, %c0_i32_0 : i32, i32
  }
  func.func @transform_8(%arg0: i32) -> (i32, i32) {
    %c0_i32 = arith.constant 0 : i32
    %c0_i32_0 = arith.constant 0 : i32
    %c0_i32_1 = arith.constant 0 : i32
    return %c0_i32, %c0_i32_0 : i32, i32
  }
  func.func @transform_9(%arg0: i32) -> (i32, i32) {
    %c0_i32 = arith.constant 0 : i32
    %c0_i32_0 = arith.constant 0 : i32
    %c0_i32_1 = arith.constant 0 : i32
    return %c0_i32, %c0_i32_0 : i32, i32
  }
  func.func @transform_10(%arg0: i32) -> (i32, i32) {
    %c0_i32 = arith.constant 0 : i32
    %c0_i32_0 = arith.constant 0 : i32
    %c0_i32_1 = arith.constant 0 : i32
    return %c0_i32, %c0_i32_0 : i32, i32
  }
  func.func @transform_11(%arg0: i32) -> (i32, i32, i32, i32) {
    %c0_i32 = arith.constant 0 : i32
    %c0_i32_0 = arith.constant 0 : i32
    %c0_i32_1 = arith.constant 0 : i32
    %c0_i32_2 = arith.constant 0 : i32
    return %arg0, %c0_i32, %c0_i32_0, %c0_i32_1 : i32, i32, i32, i32
  }
}

</mosaic_0001>

<bundles_post_ra>
// kernel: block_forward_pallas.4
= control target key start
LH: loop header
LB: loop body
LE: loop exit
PB: predicated region body
PF: predicated region fallthrough
CT: control target
= control target key end

     0   :  { %10 = vsyncpa [#allocation5], 0  ;;  %s2689_s0 = inlined_call_operand.hbm [shape: f32[2,8,8,16], index: 0, kind: input, shape index: {}]   ;;  %s2690_s1 = inlined_call_operand.vmem [shape: bf16[144,16], index: 1, kind: input, shape index: {}]   ;;  %s2691_s2 = inlined_call_operand.vmem [shape: f32[1,16], index: 2, kind: input, shape index: {}]   ;;  %s2692_s3 = inlined_call_operand.vmem [shape: bf16[144,16], index: 3, kind: input, shape index: {}]   ;;  %s2693_s4 = inlined_call_operand.vmem [shape: f32[1,16], index: 4, kind: input, shape index: {}]   ;;  %s2694_s5 = inlined_call_operand.vmem [shape: f32[2,8,8,32], index: 5, kind: output, shape index: {}]  }
   0x1   :  { %12 = vsyncpa [#allocation5 + $0x1], 0  ;;  %s1984_s18 = smov 0   ;;  %s1986_s19 = smov 0  }
   0x2   :  { %s1988_s20 = smov 0   ;;  %s1990_s21 = smov 0  }
   0x3 LB: > { %s2003_s22 = sadd.s32 4294967295, %s1942_s21   ;;  %s2006_s23 = sadd.s32 1, %s1942_s21   ;;  %s1942_s21 = sphi %s1990_s21, %s2701_s21   ;;  %s1938_s20 = sphi %s1988_s20, %s2700_s20   ;;  %s1934_s19 = sphi %s1986_s19, %s2699_s19   ;;  %s1930_s18 = sphi %s1984_s18, %s2698_s18  }
   0x4   : > { %s22_s24 = ssub.s32 %s1942_s21, %s2006_s23  ;;  %s25_s25 = sadd.s32 1, %s1938_s20 }
   0x5   : > { %p23_p0 = scmp.eq.s32.totalorder %s22_s24, 0  ;;  %p32_p1 = scmp.ne.s32.totalorder %s1938_s20, %s1934_s19 }
   0x6   : > { %p33_p2 = scmp.eq.s32.totalorder %s1942_s21, 0  ;;  %p38_p3 = scmp.ne.s32.totalorder %s1934_s19, %s1930_s18 }
   0x7   : > { %s2016_s26 = scalar_select %p23_p0, %s1938_s20, %s25_s25  }
   0x8   : > { %p2018_p4 = por %p33_p2, %p32_p1  ;;  %p39_p5 = scmp.eq.s32.totalorder %s2003_s22, 0 }
   0x9   : > { %p1553_p6 = scmp.lt.s32.totalorder %s1942_s21, 2  ;;  %s184_s29 = sand.u32 1, %s1938_s20  }
   0xa   : > { %p2024_p7 = por %p39_p5, %p38_p3  ;;  %s1438_s30 = sshll.u32 %s184_s29, 6 }
   0xb   : > { %s1527_s6 = sshll.u32 %s1942_s21, 6  ;;  %s188_s10 = scalar_lea.vmem [#allocation4], %s1438_s30 }
   0xc   : > { %s193_s9 = scalar_lea.hbm %s2689_s0, %s1527_s6  ;;  %s196_s11 = sshll.u32 %s188_s10, 4  ;;  %s197_s11 = int_to_ptr.vmem [resolvable:$true] %s196_s11 }
   0xd   : > { %s194_s12 = sshll.u32 %s193_s9, 4  ;;  %p2035_p8 = pnand %p1553_p6, %p2018_p4  ;;  %s195_s12 = int_to_ptr.hbm [resolvable:$true] %s194_s12 }
   0xe   : > { %p1441_p9 = scmp.ge.s32.totalorder %s1942_s21, 1  ;;  %s185_s14 = scalar_lea.sflag [#allocation5], %s184_s29 }
   0xf   : > { %s1878_s15 = sshra.s32 %s195_s12, 4  ;;  %p1882_p11 = pneg %p2035_p8  ;;  %s1879_s15 = int_to_ptr.hbm [resolvable:$true] %s1878_s15 }
  0x10   : > { %s1880_s16 = scalar_lea.hbm %s1879_s15, 64  ;;  %s1885_s24 = scalar_lea.hbm %s2689_s0, 128 }
  0x11   : > { %p1881_p10 = scmp.ne.s32.totalorder %s1879_s15, %s1880_s16  ;;  %p1886_p0 = scmp.lt.s32.totalorder %s1879_s15, %s2689_s0 }
  0x12   : > { %p1887_p1 = scmp.lt.s32.totalorder %s1885_s24, %s1880_s16 }
  0x13   : > { %p1883_p12 = pnand %p1882_p11, %p1881_p10 }
  0x14   : > { %p1888_p2 = por %p1887_p1, %p1886_p0 }
  0x15   : > { %p1884_p13 = pneg %p1883_p12 }
  0x17   : > { %p1889_p3 = pnand %p1888_p2, %p1884_p13 }
  0x19   : > { %1892 = shalt.err (!%p1889_p3)
}
  0x1a   : > { %s1944_s29 = smov 128   ;;  %s1945_s30 = smov 8  }
  0x1b   : > { %1552 = dma.hbm_to_vmem [thread:$0]  (!%p2035_p8), %s195_s12, 1024, %s197_s11, %s185_s14, %s1944_s29, %s1944_s29, %s1945_s30  }
  0x1c   : > { %p204_p4 = scmp.lt.s32.totalorder %s1942_s21, 3 }
  0x1e   : > { %p205_p5 = pnand %p1441_p9, %p204_p4 }
  0x1f   : > { %s210_s6 = sand.u32 (!%p205_p5), 1, %s1934_s19  }
  0x20   : > { %208 = sbr.rel (%p205_p5) target bundleno = 819 (0x333), region = 40  ;;  %s1442_s7 = sshll.u32 (!%p205_p5), %s210_s6, 6 }
  0x21   : > { %s211_s8 = scalar_lea.sflag (!%p205_p5), [#allocation5], %s210_s6  ;;  %s2054_s9 = scalar_lea.vmem (!%p205_p5), [#allocation4], %s1442_s7 }
  0x25   : > { %1925 = dma.done.wait (%p2024_p7), %s211_s8, 1024  }
  0x26   : > { %1927 = vsyncadd (%p2024_p7), %s211_s8, 4294966272  ;;  %vm256_vm0 = vcmask 130048   ;;  %vm258_vm1 = vcmask 123904   ;;  %v1946_v0 = vmov 0.0   ;;  %v2073_v1 = vld [vmem:[%s2054_s9] sm:$0xff]  ;;  %v2076_v2 = vld [vmem:[%s2054_s9 + $0x8] sm:$0xff] }
  0x27   : > { %257 = vst.msk [vmem:[#allocation2] sm:$0xff] %vm256_vm0, %v1946_v0  ;;  %vm323_vm2 = vcmask 1046528   ;;  %s1947_s21 = smov 48   ;;  %vm348_vm3 = vcmask 1045504   ;;  %s1948_s28 = smov 16   ;;  %v2175_v28 = vld [vmem:[%s2054_s9 + $0x10] sm:$0xff] }
  0x28   : > { %259 = vst.msk [vmem:[#allocation2 + $0x8] sm:$0x3] %vm258_vm1, %v1946_v0  ;;  %s1949_s10 = smov 64   ;;  %s1950_s11 = smov 32   ;;  %v2180_v29 = vld [vmem:[%s2054_s9 + $0x18] sm:$0xff]  ;;  %v2185_v30 = vld [vmem:[%s2054_s9 + $0x20] sm:$0xff] }
  0x29   : > { %260 = vst.msk [vmem:[#allocation2 + $0x10] sm:$0xff] %vm256_vm0, %v1946_v0  ;;  %v2190_v31 = vld [vmem:[%s2054_s9 + $0x28] sm:$0xff]  ;;  %v2199_v32 = vld [vmem:[%s2054_s9 + $0x30] sm:$0xff]  ;;  %s1951_s12 = smov 96   ;;  %s1952_s13 = smov 112   ;;  %v2227_v53 = vld [vmem:[%s2054_s9 + $0x38] sm:$0xff] }
  0x2a   : > { %261 = vst.msk [vmem:[#allocation2 + $0x18] sm:$0x3] %vm258_vm1, %v1946_v0  ;;  %s1953_s14 = smov 80   ;;  %vm573_vm4 = vcmask 261120   ;;  %vm582_vm5 = vcmask 392192   ;;  %vm591_vm6 = vcmask 523264  }
  0x2b   : > { %262 = vst.msk [vmem:[#allocation2 + $0x20] sm:$0xff] %vm256_vm0, %v1946_v0  ;;  %vm600_vm7 = vcmask 654336   ;;  %vm609_vm8 = vcmask 785408   ;;  %vm618_vm9 = vcmask 916480   ;;  %p242_p6 = scmp.lt.s32.totalorder %s2003_s22, 1 }
  0x2c   : > { %263 = vst.msk [vmem:[#allocation2 + $0x28] sm:$0x3] %vm258_vm1, %v1946_v0 }
  0x2d   : > { %264 = vst.msk [vmem:[#allocation2 + $0x30] sm:$0xff] %vm256_vm0, %v1946_v0  ;;  %s2703_s22 = smov (!%p242_p6, %s2003_s22), 1 }
  0x2e   : > { %279 = vst.msk [vmem:[#allocation2 + $0x11] sm:$0xff] %vm256_vm0, %v2073_v1  ;;  %v2084_v3 = vld [vmem:[#allocation2] sm:$0xff]  ;;  %s1528_s30 = sshll.u32 %s2703_s22, 6 }
  0x2f   : > { %280 = vst.msk [vmem:[#allocation2 + $0x21] sm:$0xff] %vm256_vm0, %v2076_v2  ;;  %v288_v4 = vld [vmem:[#allocation2 + $0x8] sm:$0x3]  ;;  %v324_v5 = vrot.slane %v2084_v3, 1  ;;  %v349_v17 = vrot.slane %v2084_v3, 2 }
  0x30   : > { %265 = vst.msk [vmem:[#allocation2 + $0x38] sm:$0x3] %vm258_vm1, %v1946_v0  ;;  %v325_v6 = vrot.slane %v288_v4, 1  ;;  %v350_v19 = vrot.slane %v288_v4, 2 }
  0x31   : > { %266 = vst.msk [vmem:[#allocation2 + $0x40] sm:$0xff] %vm256_vm0, %v1946_v0 }
  0x32   : > { %267 = vst.msk [vmem:[#allocation2 + $0x48] sm:$0x3] %vm258_vm1, %v1946_v0  ;;  %v326_v11 = vsel %vm323_vm2, %v324_v5, %v325_v6  ;;  %v351_v24 = vsel %vm348_vm3, %v349_v17, %v350_v19 }
  0x33   : > { %268 = vst.msk [vmem:[#allocation2 + $0x50] sm:$0xff] %vm256_vm0, %v1946_v0 }
  0x34   : > { %269 = vst.msk [vmem:[#allocation2 + $0x58] sm:$0x3] %vm258_vm1, %v1946_v0 }
  0x35   : > { %v2097_v7 = vld [vmem:[#allocation2 + $0x10] sm:$0xff]  ;;  %v290_v8 = vld [vmem:[#allocation2 + $0x18] sm:$0x3]  ;;  %270 = vst.msk [vmem:[#allocation2 + $0x60] sm:$0xff] %vm256_vm0, %v1946_v0 }
  0x36   : > { %v2101_v9 = vld [vmem:[#allocation2 + $0x20] sm:$0xff]  ;;  %v2103_v10 = vld [vmem:[#allocation2 + $0x28] sm:$0x3]  ;;  %v327_v12 = vrot.slane %v2097_v7, 1  ;;  %v328_v13 = vrot.slane %v290_v8, 1  ;;  %v353_v20 = vrot.slane %v290_v8, 2 }
  0x37   : > { %v330_v14 = vrot.slane %v2101_v9, 1  ;;  %v331_v15 = vrot.slane %v2103_v10, 1  ;;  %271 = vst.msk [vmem:[#allocation2 + $0x68] sm:$0x3] %vm258_vm1, %v1946_v0  ;;  %v1596_v16 = vpack.i.bf16 %v2101_v9, %v2097_v7  ;;  %v352_v21 = vrot.slane %v2097_v7, 2 }
  0x38   : > { %v329_v18 = vsel %vm323_vm2, %v327_v12, %v328_v13  ;;  %272 = vst.msk [vmem:[#allocation2 + $0x70] sm:$0xff] %vm256_vm0, %v1946_v0  ;;  %v355_v35 = vrot.slane %v2101_v9, 2  ;;  %v356_v36 = vrot.slane %v2103_v10, 2 }
  0x39   : > { %v1606_v22 = vpack.i.bf16 %v329_v18, %v326_v11  ;;  %273 = vst.msk [vmem:[#allocation2 + $0x78] sm:$0x3] %vm258_vm1, %v1946_v0  ;;  %1597 = vrot.lane.b32.xlu1 %v1596_v16, %s1947_s21  ;;  %v332_v23 = vsel %vm323_vm2, %v330_v14, %v331_v15  ;;  %v2131_v25 = vsel %vm348_vm3, %v352_v21, %v353_v20 }
  0x3a   : > { %274 = vst.msk [vmem:[#allocation2 + $0x80] sm:$0xff] %vm256_vm0, %v1946_v0  ;;  %v1616_v26 = vpack.i.bf16 %v332_v23, %v329_v18  ;;  %v1611_v27 = vpack.i.bf16 %v2131_v25, %v351_v24  ;;  %v2216_v46 = vsel %vm348_vm3, %v355_v35, %v356_v36  ;;  %v1535_v35 = vld [vmem:[%s2690_s1 + $0x30] sm:$0xff] }
  0x3b   : > { %1607 = vrot.lane.b32.xlu0 %v1606_v22, %s1948_s28  ;;  %275 = vst.msk [vmem:[#allocation2 + $0x88] sm:$0x3] %vm258_vm1, %v1946_v0  ;;  %v1621_v48 = vpack.i.bf16 %v2216_v46, %v2131_v25 }
  0x3c   : > { %276 = vst.msk [vmem:[#allocation2 + $0x90] sm:$0xff] %vm256_vm0, %v1946_v0 }
  0x3d   : > { %277 = vst.msk [vmem:[#allocation2 + $0x98] sm:$0x3] %vm258_vm1, %v1946_v0 }
  0x3e   : > { %789 = vst.msk [vmem:[#allocation3] sm:$0xff] %vm256_vm0, %v1946_v0 }
  0x3f   : > { %790 = vst.msk [vmem:[#allocation3 + $0x8] sm:$0x3] %vm258_vm1, %v1946_v0 }
  0x40   : > { %791 = vst.msk [vmem:[#allocation3 + $0x10] sm:$0xff] %vm256_vm0, %v1946_v0 }
  0x41   : > { %792 = vst.msk [vmem:[#allocation3 + $0x18] sm:$0x3] %vm258_vm1, %v1946_v0  ;;  %1617 = vrot.lane.b32.xlu1 %v1616_v26, %s1949_s10 }
  0x42   : > { %793 = vst.msk [vmem:[#allocation3 + $0x20] sm:$0xff] %vm256_vm0, %v1946_v0 }
  0x43   : > { %794 = vst.msk [vmem:[#allocation3 + $0x28] sm:$0x3] %vm258_vm1, %v1946_v0  ;;  %1612 = vrot.lane.b32.xlu0 %v1611_v27, %s1950_s11 }
  0x44   : > { %795 = vst.msk [vmem:[#allocation3 + $0x30] sm:$0xff] %vm256_vm0, %v1946_v0 }
  0x45   : > { %796 = vst.msk [vmem:[#allocation3 + $0x38] sm:$0x3] %vm258_vm1, %v1946_v0 }
  0x46   : > { %797 = vst.msk [vmem:[#allocation3 + $0x40] sm:$0xff] %vm256_vm0, %v1946_v0 }
  0x47   : > { %798 = vst.msk [vmem:[#allocation3 + $0x48] sm:$0x3] %vm258_vm1, %v1946_v0 }
  0x48   : > { %799 = vst.msk [vmem:[#allocation3 + $0x50] sm:$0xff] %vm256_vm0, %v1946_v0 }
  0x49   : > { %800 = vst.msk [vmem:[#allocation3 + $0x58] sm:$0x3] %vm258_vm1, %v1946_v0 }
  0x4a   : > { %801 = vst.msk [vmem:[#allocation3 + $0x60] sm:$0xff] %vm256_vm0, %v1946_v0 }
  0x4b   : > { %802 = vst.msk [vmem:[#allocation3 + $0x68] sm:$0x3] %vm258_vm1, %v1946_v0 }
  0x4c   : > { %803 = vst.msk [vmem:[#allocation3 + $0x70] sm:$0xff] %vm256_vm0, %v1946_v0 }
  0x4d   : > { %804 = vst.msk [vmem:[#allocation3 + $0x78] sm:$0x3] %vm258_vm1, %v1946_v0 }
  0x4e   : > { %805 = vst.msk [vmem:[#allocation3 + $0x80] sm:$0xff] %vm256_vm0, %v1946_v0 }
  0x4f   : > { %806 = vst.msk [vmem:[#allocation3 + $0x88] sm:$0x3] %vm258_vm1, %v1946_v0 }
  0x50   : > { %807 = vst.msk [vmem:[#allocation3 + $0x90] sm:$0xff] %vm256_vm0, %v1946_v0 }
  0x51   : > { %808 = vst.msk [vmem:[#allocation3 + $0x98] sm:$0x3] %vm258_vm1, %v1946_v0 }
  0x52   : > { %281 = vst.msk [vmem:[#allocation2 + $0x31] sm:$0xff] %vm256_vm0, %v2175_v28 }
  0x53   : > { %282 = vst.msk [vmem:[#allocation2 + $0x41] sm:$0xff] %vm256_vm0, %v2180_v29 }
  0x54   : > { %283 = vst.msk [vmem:[#allocation2 + $0x51] sm:$0xff] %vm256_vm0, %v2185_v30 }
  0x55   : > { %284 = vst.msk [vmem:[#allocation2 + $0x61] sm:$0xff] %vm256_vm0, %v2190_v31 }
  0x56   : > { %285 = vst.msk [vmem:[#allocation2 + $0x71] sm:$0xff] %vm256_vm0, %v2199_v32 }
  0x57   : > { %286 = vst.msk [vmem:[#allocation2 + $0x81] sm:$0xff] %vm256_vm0, %v2227_v53 }
  0x59   : > { %v2203_v33 = vld [vmem:[#allocation2 + $0x30] sm:$0xff]  ;;  %v294_v34 = vld [vmem:[#allocation2 + $0x38] sm:$0x3] }
  0x5a   : > { %v333_v37 = vrot.slane %v2203_v33, 1  ;;  %v334_v38 = vrot.slane %v294_v34, 1  ;;  %v2208_v39 = vld [vmem:[#allocation2 + $0x40] sm:$0xff]  ;;  %v296_v40 = vld [vmem:[#allocation2 + $0x48] sm:$0x3]  ;;  %v1601_v41 = vpack.i.bf16 %v2203_v33, %v2101_v9  ;;  %v358_v51 = vrot.slane %v2203_v33, 2 }
  0x5b   : > { %v336_v43 = vrot.slane %v2208_v39, 1  ;;  %v337_v44 = vrot.slane %v296_v40, 1  ;;  %v2223_v49 = vld [vmem:[#allocation2 + $0x50] sm:$0xff]  ;;  %v298_v50 = vld [vmem:[#allocation2 + $0x58] sm:$0x3]  ;;  %v359_v52 = vrot.slane %v294_v34, 2  ;;  %v1631_v54 = vpack.i.bf16 %v2208_v39, %v2203_v33 }
  0x5c   : > { %v335_v42 = vsel %vm323_vm2, %v333_v37, %v334_v38  ;;  %1602 = vrot.lane.b32.xlu2 %v1601_v41, %s1951_s12  ;;  %v339_v56 = vrot.slane %v2223_v49, 1  ;;  %v340_v57 = vrot.slane %v298_v50, 1  ;;  %v1656_v61 = vpack.i.bf16 %v2223_v49, %v2208_v39  ;;  %v2256_v10 = vld [vmem:[#allocation2 + $0x60] sm:$0xff]  ;;  %v300_v12 = vld [vmem:[#allocation2 + $0x68] sm:$0x3]  ;;  %v1536_v34 = vld [vmem:[%s2690_s1 + $0x38] sm:$0xff] }
  0x5d   : > { %v1626_v45 = vpack.i.bf16 %v335_v42, %v332_v23  ;;  %v338_v47 = vsel %vm323_vm2, %v336_v43, %v337_v44  ;;  %v2236_v58 = vsel %vm348_vm3, %v358_v51, %v359_v52  ;;  %v361_v63 = vrot.slane %v2208_v39, 2  ;;  %v2271_v18 = vld [vmem:[#allocation2 + $0x70] sm:$0xff]  ;;  %v302_v19 = vld [vmem:[#allocation2 + $0x78] sm:$0x3]  ;;  %723 = vmatpush.bf16.msra.mxu0 %v1536_v34  ;;  %v1534_v43 = vld [vmem:[%s2690_s1 + $0x28] sm:$0xff] }
  0x5e   : > { %v1646_v55 = vpack.i.bf16 %v338_v47, %v335_v42  ;;  %v341_v59 = vsel %vm323_vm2, %v339_v56, %v340_v57  ;;  %v1641_v60 = vpack.i.bf16 %v2236_v58, %v2216_v46  ;;  %v362_v0 = vrot.slane %v296_v40, 2  ;;  %v303_v41 = vld [vmem:[#allocation2 + $0x80] sm:$0xff]  ;;  %v304_v42 = vld [vmem:[#allocation2 + $0x88] sm:$0x3]  ;;  %v2308_v56 = vld [vmem:[#allocation2 + $0x98] sm:$0x3] }
  0x5f   : > { %1627 = vrot.lane.b32.xlu0 %v1626_v45, %s1952_s13  ;;  %1637 = vrot.lane.b32.xlu1 %v1626_v45, %s1948_s28  ;;  %v1661_v62 = vpack.i.bf16 %v341_v59, %v338_v47  ;;  %v364_v4 = vrot.slane %v2223_v49, 2  ;;  %v365_v5 = vrot.slane %v298_v50, 2  ;;  %v1676_v14 = vpack.i.bf16 %v2256_v10, %v2223_v49 }
  0x60   : > { %v2251_v6 = vsel %vm348_vm3, %v361_v63, %v362_v0  ;;  %v367_v15 = vrot.slane %v2256_v10, 2  ;;  %v368_v16 = vrot.slane %v300_v12, 2  ;;  %v1691_v21 = vpack.i.bf16 %v2271_v18, %v2256_v10 }
  0x61   : > { %v2254_v8 = vsel %vm348_vm3, %v364_v4, %v365_v5  ;;  %v1651_v11 = vpack.i.bf16 %v2251_v6, %v2236_v58  ;;  %v342_v22 = vrot.slane %v2256_v10, 1  ;;  %v343_v23 = vrot.slane %v300_v12, 1  ;;  %724 = vmatpush.bf16.msra.mxu0 %v1535_v35  ;;  %v1533_v4 = vld [vmem:[%s2690_s1 + $0x20] sm:$0xff]  ;;  %v1531_v12 = vld [vmem:[%s2690_s1 + $0x10] sm:$0xff] }
  0x62   : > { %v1671_v13 = vpack.i.bf16 %v2254_v8, %v2251_v6  ;;  %v2269_v17 = vsel %vm348_vm3, %v367_v15, %v368_v16  ;;  %v345_v24 = vrot.slane %v2271_v18, 1  ;;  %v346_v25 = vrot.slane %v302_v19, 1  ;;  %v1529_v16 = vld [vmem:[%s2690_s1] sm:$0xff] }
  0x63   : > { %v1686_v20 = vpack.i.bf16 %v2269_v17, %v2254_v8  ;;  %v370_v26 = vrot.slane %v2271_v18, 2  ;;  %v371_v27 = vrot.slane %v302_v19, 2  ;;  %v344_v36 = vsel %vm323_vm2, %v342_v22, %v343_v23 }
  0x64   : > { %1622 = vrot.lane.b32.xlu2 %v1621_v48, %s1953_s14  ;;  %v347_v37 = vsel %vm323_vm2, %v345_v24, %v346_v25  ;;  %v1681_v40 = vpack.i.bf16 %v344_v36, %v341_v59  ;;  %v375_v47 = vrot.slane %v303_v41, 1  ;;  %v376_v48 = vrot.slane %v304_v42, 1 }
  0x65   : > { %v2292_v38 = vsel %vm348_vm3, %v370_v26, %v371_v27  ;;  %v1701_v44 = vpack.i.bf16 %v347_v37, %v344_v36  ;;  %v378_v50 = vrot.slane %v303_v41, 2  ;;  %v379_v51 = vrot.slane %v304_v42, 2  ;;  %725 = vmatpush.bf16.msra.mxu0 %v1534_v43 }
  0x66   : > { %v1706_v45 = vpack.i.bf16 %v2292_v38, %v2269_v17  ;;  %v377_v52 = vsel %vm323_vm2, %v375_v47, %v376_v48  ;;  %v1711_v63 = vpack.i.bf16 %v303_v41, %v2271_v18  ;;  %v628_v15 = vpack.c.bf16 %v2236_v58, %v2216_v46 }
  0x67   : > { %1632 = vrot.lane.b32.xlu0 %v1631_v54, %s1947_s21  ;;  %1647 = vrot.lane.b32.xlu1 %v1646_v55, %s1949_s10  ;;  %v2304_v54 = vsel %vm348_vm3, %v378_v50, %v379_v51  ;;  %v2306_v55 = vld [vmem:[#allocation2 + $0x90] sm:$0xff]  ;;  %v1716_v57 = vpack.i.bf16 %v377_v52, %v347_v37  ;;  %v630_v24 = vpack.c.bf16 %v2254_v8, %v2251_v6 }
  0x68   : > { %v1721_v59 = vpack.i.bf16 %v2304_v54, %v2292_v38  ;;  %v1726_v5 = vpack.i.bf16 %v2306_v55, %v303_v41 }
  0x69   : > { %726 = vmatpush.bf16.msra.mxu0 %v1533_v4  ;;  %v632_v4 = vpack.c.bf16 %v2292_v38, %v2269_v17 }
  0x6c   : > { %1642 = vrot.lane.b32.xlu2 %v1641_v60, %s1950_s11  ;;  %v383_v60 = vrot.slane %v2306_v55, 1 }
  0x6f   : > { %1657 = vrot.lane.b32.xlu0 %v1656_v61, %s1951_s12  ;;  %1662 = vrot.lane.b32.xlu1 %v1661_v62, %s1952_s13  ;;  %v384_v61 = vrot.slane %v2308_v56, 1 }
  0x74   : > { %1652 = vrot.lane.b32.xlu2 %v1651_v11, %s1953_s14  ;;  %v1532_v11 = vld [vmem:[%s2690_s1 + $0x18] sm:$0xff] }
  0x75   : > { %727 = vmatpush.bf16.msra.mxu0 %v1532_v11 }
  0x77   : > { %1672 = vrot.lane.b32.xlu0 %v1671_v13, %s1950_s11  ;;  %1677 = vrot.lane.b32.xlu1 %v1676_v14, %s1947_s21  ;;  %v1537_v13 = vld [vmem:[%s2690_s1 + $0x40] sm:$0xff]  ;;  %v1530_v14 = vld [vmem:[%s2690_s1 + $0x8] sm:$0xff] }
  0x78   : > { %759 = vmatpush.bf16.msra.mxu1 %v1537_v13 }
  0x79   : > { %728 = vmatpush.bf16.msra.mxu0 %v1531_v12 }
  0x7b   : > { %1481 = vmatmul.msk.bf16.vlgmr.msra.gmra.mxu1 %vm256_vm0, %v628_v15 }
  0x7c   : > { %1667 = vrot.lane.b32.xlu2 %v1661_v62, %s1948_s28  ;;  %v385_v62 = vsel %vm323_vm2, %v383_v60, %v384_v61 }
  0x7d   : > { %v1731_v0 = vpack.i.bf16 %v385_v62, %v377_v52  ;;  %729 = vmatpush.bf16.msra.mxu0 %v1530_v14 }
  0x7f   : > { %1687 = vrot.lane.b32.xlu0 %v1686_v20, %s1953_s14  ;;  %1692 = vrot.lane.b32.xlu1 %v1691_v21, %s1951_s12 }
  0x81   : > { %730 = vmatpush.bf16.msra.mxu0 %v1529_v16 }
  0x84   : > { %1682 = vrot.lane.b32.xlu2 %v1681_v40, %s1949_s10 }
  0x87   : > { %1702 = vrot.lane.b32.xlu0 %v1701_v44, %s1948_s28  ;;  %1707 = vrot.lane.b32.xlu1 %v1706_v45, %s1950_s11 }
  0x8b   : > { %1482 = vmatmul.msk.bf16.gmra.mxu1 %vm256_vm0, %v630_v24 }
  0x8c   : > { %1697 = vrot.lane.b32.xlu2 %v1701_v44, %s1952_s13 }
  0x8f   : > { %1717 = vrot.lane.b32.xlu0 %v1716_v57, %s1949_s10  ;;  %1722 = vrot.lane.b32.xlu1 %v1721_v59, %s1953_s14 }
  0x94   : > { %1712 = vrot.lane.b32.xlu2 %v1711_v63, %s1947_s21 }
  0x97   : > { %1732 = vrot.lane.b32.xlu0 %v1731_v0, %s1952_s13 }
  0x9b   : > { %1483 = vmatmul.msk.bf16.gmra.mxu1 %vm256_vm0, %v632_v4 }
  0x9c   : > { %1727 = vrot.lane.b32.xlu2 %v1726_v5, %s1951_s12 }
  0xab   : > { %v1598_v21 = vpop.permute.xlu1 %1597 }
  0xac   : > { %v1600_v6 = vunpack.i.h.bf16 %v1598_v21  ;;  %v1599_v8 = vunpack.i.l.bf16 %v1598_v21 }
  0xad   : > { %v1608_v19 = vpop.permute.xlu0 %1607 }
  0xae   : > { %v1610_v25 = vunpack.i.h.bf16 %v1608_v19  ;;  %v1609_v26 = vunpack.i.l.bf16 %v1608_v19 }
  0xb0   : > { %v566_v27 = vsel %vm256_vm0, %v2097_v7, %v1610_v25  ;;  %v565_v34 = vsel %vm256_vm0, %v2084_v3, %v1609_v26 }
  0xb3   : > { %v1618_v35 = vpop.permute.xlu1 %1617 }
  0xb4   : > { %v1620_v41 = vunpack.i.h.bf16 %v1618_v35  ;;  %v1619_v42 = vunpack.i.l.bf16 %v1618_v35 }
  0xb5   : > { %v1613_v23 = vpop.permute.xlu0 %1612 }
  0xb6   : > { %v1603_v20 = vpop.permute.xlu2 %1602  ;;  %v1615_v46 = vunpack.i.h.bf16 %v1613_v23  ;;  %v1614_v58 = vunpack.i.l.bf16 %v1613_v23 }
  0xb7   : > { %v1605_v52 = vunpack.i.h.bf16 %v1603_v20  ;;  %v1604_v57 = vunpack.i.l.bf16 %v1603_v20 }
  0xb8   : > { %v574_v37 = vsel %vm573_vm4, %v565_v34, %v1614_v58  ;;  %v575_v40 = vsel %vm573_vm4, %v566_v27, %v1615_v46 }
  0xb9   : > { %v583_v43 = vsel %vm582_vm5, %v574_v37, %v1599_v8  ;;  %v584_v44 = vsel %vm582_vm5, %v575_v40, %v1600_v6 }
  0xba   : > { %v592_v3 = vsel %vm591_vm6, %v583_v43, %v1619_v42  ;;  %v593_v47 = vsel %vm591_vm6, %v584_v44, %v1620_v41 }
  0xbe   : > { %v1623_v22 = vpop.permute.xlu2 %1622 }
  0xbf   : > { %v1625_v7 = vunpack.i.h.bf16 %v1623_v22  ;;  %v1624_v45 = vunpack.i.l.bf16 %v1623_v22 }
  0xc1   : > { %v601_v48 = vsel %vm600_vm7, %v592_v3, %v1624_v45  ;;  %v602_v50 = vsel %vm600_vm7, %v593_v47, %v1625_v7  ;;  %v386_v3 = vrot.slane %v2306_v55, 2  ;;  %v387_v47 = vrot.slane %v2308_v56, 2 }
  0xc2   : > { %v610_v63 = vsel %vm609_vm8, %v601_v48, %v1604_v57  ;;  %v611_v0 = vsel %vm609_vm8, %v602_v50, %v1605_v52 }
  0xc3   : > { %v388_v52 = vsel %vm348_vm3, %v386_v3, %v387_v47 }
  0xc4   : > { %v634_v57 = vpack.c.bf16 %v388_v52, %v2304_v54 }
  0xc6   : > { %v1643_v36 = vpop.permute.xlu2 %1642  ;;  %1484 = vmatmul.msk.bf16.gmra.mxu1 %vm256_vm0, %v634_v57 }
  0xc7   : > { %v1645_v15 = vunpack.i.h.bf16 %v1643_v36  ;;  %v1644_v16 = vunpack.i.l.bf16 %v1643_v36 }
  0xce   : > { %v1653_v51 = vpop.permute.xlu2 %1652 }
  0xcf   : > { %v1655_v34 = vunpack.i.h.bf16 %v1653_v51 }
  0xd1   : > { %v1628_v59 = vpop.permute.xlu0 %1627  ;;  %v1638_v60 = vpop.permute.xlu1 %1637 }
  0xd2   : > { %v1630_v61 = vunpack.i.h.bf16 %v1628_v59  ;;  %v1629_v62 = vunpack.i.l.bf16 %v1628_v59  ;;  %v1640_v12 = vunpack.i.h.bf16 %v1638_v60  ;;  %v1639_v13 = vunpack.i.l.bf16 %v1638_v60 }
  0xd4   : > { %v619_v5 = vsel %vm618_vm9, %v610_v63, %v1629_v62  ;;  %v620_v11 = vsel %vm618_vm9, %v611_v0, %v1630_v61  ;;  %v568_v19 = vsel %vm256_vm0, %v2203_v33, %v1640_v12  ;;  %v567_v20 = vsel %vm256_vm0, %v2101_v9, %v1639_v13 }
  0xd5   : > { %v627_v14 = vpack.c.bf16 %v620_v11, %v619_v5  ;;  %v576_v24 = vsel %vm573_vm4, %v567_v20, %v1644_v16  ;;  %v577_v25 = vsel %vm573_vm4, %v568_v19, %v1645_v15  ;;  %v1654_v33 = vunpack.i.l.bf16 %v1653_v51 }
  0xd6   : > { %v1668_v23 = vpop.permute.xlu2 %1667 }
  0xd7   : > { %731 = vmatmul.bf16.vlgmr.msra.gmra.mxu0 %v627_v14  ;;  %v1670_v59 = vunpack.i.h.bf16 %v1668_v23  ;;  %v1669_v60 = vunpack.i.l.bf16 %v1668_v23 }
  0xd9   : > { %v1633_v21 = vpop.permute.xlu0 %1632  ;;  %v1648_v17 = vpop.permute.xlu1 %1647  ;;  %v570_v56 = vsel %vm256_vm0, %v2223_v49, %v1670_v59  ;;  %v569_v0 = vsel %vm256_vm0, %v2208_v39, %v1669_v60 }
  0xda   : > { %v1635_v38 = vunpack.i.h.bf16 %v1633_v21  ;;  %v1634_v22 = vunpack.i.l.bf16 %v1633_v21  ;;  %v1650_v26 = vunpack.i.h.bf16 %v1648_v17  ;;  %v1649_v46 = vunpack.i.l.bf16 %v1648_v17 }
  0xdc   : > { %v586_v58 = vsel %vm582_vm5, %v577_v25, %v1635_v38  ;;  %v585_v27 = vsel %vm582_vm5, %v576_v24, %v1634_v22 }
  0xdd   : > { %v594_v35 = vsel %vm591_vm6, %v585_v27, %v1649_v46  ;;  %v595_v9 = vsel %vm591_vm6, %v586_v58, %v1650_v26 }
  0xde   : > { %v603_v42 = vsel %vm600_vm7, %v594_v35, %v1654_v33  ;;  %v604_v43 = vsel %vm600_vm7, %v595_v9, %v1655_v34  ;;  %v1683_v45 = vpop.permute.xlu2 %1682 }
  0xdf   : > { %v1685_v13 = vunpack.i.h.bf16 %v1683_v45  ;;  %v1684_v14 = vunpack.i.l.bf16 %v1683_v45 }
  0xe1   : > { %v1658_v36 = vpop.permute.xlu0 %1657  ;;  %v1663_v37 = vpop.permute.xlu1 %1662 }
  0xe2   : > { %v1660_v40 = vunpack.i.h.bf16 %v1658_v36  ;;  %v1659_v6 = vunpack.i.l.bf16 %v1658_v36  ;;  %v1665_v8 = vunpack.i.h.bf16 %v1663_v37  ;;  %v1664_v41 = vunpack.i.l.bf16 %v1663_v37 }
  0xe4   : > { %v612_v44 = vsel %vm609_vm8, %v603_v42, %v1659_v6  ;;  %v613_v7 = vsel %vm609_vm8, %v604_v43, %v1660_v40 }
  0xe5   : > { %v621_v48 = vsel %vm618_vm9, %v612_v44, %v1664_v41  ;;  %v622_v50 = vsel %vm618_vm9, %v613_v7, %v1665_v8 }
  0xe6   : > { %v629_v51 = vpack.c.bf16 %v622_v50, %v621_v48  ;;  %v1698_v12 = vpop.permute.xlu2 %1697 }
  0xe7   : > { %v1700_v21 = vunpack.i.h.bf16 %v1698_v12  ;;  %v1699_v49 = vunpack.i.l.bf16 %v1698_v12 }
  0xe8   : > { %736 = vmatmul.bf16.gmra.mxu0 %v629_v51 }
  0xe9   : > { %v1673_v61 = vpop.permute.xlu0 %1672  ;;  %v1678_v62 = vpop.permute.xlu1 %1677 }
  0xea   : > { %v1675_v63 = vunpack.i.h.bf16 %v1673_v61  ;;  %v1674_v55 = vunpack.i.l.bf16 %v1673_v61  ;;  %v1680_v4 = vunpack.i.h.bf16 %v1678_v62  ;;  %v1679_v5 = vunpack.i.l.bf16 %v1678_v62 }
  0xec   : > { %v579_v11 = vsel %vm573_vm4, %v570_v56, %v1675_v63  ;;  %v578_v54 = vsel %vm573_vm4, %v569_v0, %v1674_v55 }
  0xed   : > { %v587_v15 = vsel %vm582_vm5, %v578_v54, %v1679_v5  ;;  %v588_v16 = vsel %vm582_vm5, %v579_v11, %v1680_v4 }
  0xee   : > { %v596_v23 = vsel %vm591_vm6, %v587_v15, %v1684_v14  ;;  %v597_v24 = vsel %vm591_vm6, %v588_v16, %v1685_v13  ;;  %v1713_v40 = vpop.permute.xlu2 %1712  ;;  %v2422_v15 = vld [vmem:[%s2691_s2] ss:$0 sm:$0xff] }
  0xef   : > { %v1715_v43 = vunpack.i.h.bf16 %v1713_v40  ;;  %v1714_v44 = vunpack.i.l.bf16 %v1713_v40 }
  0xf1   : > { %v1688_v19 = vpop.permute.xlu0 %1687  ;;  %v1693_v20 = vpop.permute.xlu1 %1692 }
  0xf2   : > { %v1690_v17 = vunpack.i.h.bf16 %v1688_v19  ;;  %v1689_v38 = vunpack.i.l.bf16 %v1688_v19  ;;  %v1695_v39 = vunpack.i.h.bf16 %v1693_v20  ;;  %v1694_v22 = vunpack.i.l.bf16 %v1693_v20  ;;  %v1546_v20 = vld [vmem:[%s2692_s3 + $0x40] sm:$0xff] }
  0xf3   : > { %1282 = vmatpush.bf16.msra.mxu3 %v1546_v20 }
  0xf4   : > { %v605_v25 = vsel %vm600_vm7, %v596_v23, %v1689_v38  ;;  %v606_v26 = vsel %vm600_vm7, %v597_v24, %v1690_v17  ;;  %v2429_v38 = vld [vmem:[#allocation3] sm:$0xff] }
  0xf5   : > { %v614_v46 = vsel %vm609_vm8, %v605_v25, %v1694_v22  ;;  %v615_v58 = vsel %vm609_vm8, %v606_v26, %v1695_v39  ;;  %v819_v39 = vld [vmem:[#allocation3 + $0x8] sm:$0x3]  ;;  %v878_v24 = vrot.slane %v2429_v38, 2  ;;  %v854_v26 = vrot.slane %v2429_v38, 1 }
  0xf6   : > { %v623_v27 = vsel %vm618_vm9, %v614_v46, %v1699_v49  ;;  %v624_v34 = vsel %vm618_vm9, %v615_v58, %v1700_v21  ;;  %v879_v25 = vrot.slane %v819_v39, 2  ;;  %v855_v46 = vrot.slane %v819_v39, 1 }
  0xf7   : > { %v631_v33 = vpack.c.bf16 %v624_v34, %v623_v27 }
  0xf8   : > { %v761_v14 = vpop.f32.mrf.mxu1 }
  0xf9   : > { %v1703_v35 = vpop.permute.xlu0 %1702  ;;  %741 = vmatmul.bf16.gmra.mxu0 %v631_v33  ;;  %v1708_v9 = vpop.permute.xlu1 %1707 }
  0xfa   : > { %v1705_v36 = vunpack.i.h.bf16 %v1703_v35  ;;  %v1704_v37 = vunpack.i.l.bf16 %v1703_v35  ;;  %v1710_v6 = vunpack.i.h.bf16 %v1708_v9  ;;  %v1709_v8 = vunpack.i.l.bf16 %v1708_v9 }
  0xfb   : > { %v880_v35 = vsel %vm348_vm3, %v878_v24, %v879_v25  ;;  %v856_v9 = vsel %vm323_vm2, %v854_v26, %v855_v46 }
  0xfc   : > { %v572_v41 = vsel %vm256_vm0, %v2271_v18, %v1705_v36  ;;  %v571_v42 = vsel %vm256_vm0, %v2256_v10, %v1704_v37  ;;  %v1728_v18 = vpop.permute.xlu2 %1727 }
  0xfd   : > { %v580_v7 = vsel %vm573_vm4, %v571_v42, %v1709_v8  ;;  %v581_v45 = vsel %vm573_vm4, %v572_v41, %v1710_v6  ;;  %v1730_v61 = vunpack.i.h.bf16 %v1728_v18  ;;  %v1729_v62 = vunpack.i.l.bf16 %v1728_v18 }
  0xfe   : > { %v589_v51 = vsel %vm582_vm5, %v580_v7, %v1714_v44  ;;  %v590_v52 = vsel %vm582_vm5, %v581_v45, %v1715_v43 }
 0x100   : > { %v763_v17 = vpop.f32.mrf.mxu1 }
 0x101   : > { %v1718_v3 = vpop.permute.xlu0 %1717  ;;  %v1723_v47 = vpop.permute.xlu1 %1722 }
 0x102   : > { %v1720_v48 = vunpack.i.h.bf16 %v1718_v3  ;;  %v1719_v50 = vunpack.i.l.bf16 %v1718_v3  ;;  %v1725_v57 = vunpack.i.h.bf16 %v1723_v47  ;;  %v1724_v59 = vunpack.i.l.bf16 %v1723_v47 }
 0x104   : > { %v598_v60 = vsel %vm591_vm6, %v589_v51, %v1719_v50  ;;  %v599_v10 = vsel %vm591_vm6, %v590_v52, %v1720_v48 }
 0x105   : > { %v607_v63 = vsel %vm600_vm7, %v598_v60, %v1724_v59  ;;  %v608_v55 = vsel %vm600_vm7, %v599_v10, %v1725_v57 }
 0x106   : > { %v616_v5 = vsel %vm609_vm8, %v607_v63, %v1729_v62  ;;  %v617_v11 = vsel %vm609_vm8, %v608_v55, %v1730_v61 }
 0x108   : > { %v766_v8 = vpop.f32.mrf.mxu1 }
 0x109   : > { %v1733_v56 = vpop.permute.xlu0 %1732 }
 0x10a   : > { %v1735_v0 = vunpack.i.h.bf16 %v1733_v56  ;;  %v1734_v4 = vunpack.i.l.bf16 %v1733_v56 }
 0x10c   : > { %v625_v54 = vsel %vm618_vm9, %v616_v5, %v1734_v4  ;;  %v626_v12 = vsel %vm618_vm9, %v617_v11, %v1735_v0 }
 0x10d   : > { %v633_v13 = vpack.c.bf16 %v626_v12, %v625_v54 }
 0x10f   : > { %746 = vmatmul.bf16.gmra.mxu0 %v633_v13 }
 0x110   : > { %v768_v61 = vpop.f32.mrf.mxu1 }
 0x154   : > { %v732_v16 = vpop.f32.mrf.mxu0 }
 0x155   : > { %v733_v19 = vadd.f32 %v2422_v15, %v732_v16 }
 0x157   : > { %v762_v21 = vadd.f32 %v761_v14, %v733_v19  ;;  %v771_v19 = vpop.f32.mrf.mxu1 }
 0x159   : > { %v781_v49 = vmax.f32 %v762_v21, 0.0 }
 0x15b   : > { %810 = vst.msk [vmem:[#allocation3 + $0x11] sm:$0xff] %vm256_vm0, %v781_v49 }
 0x15c   : > { %v734_v22 = vpop.f32.mrf.mxu0 }
 0x15d   : > { %v735_v23 = vadd.f32 %v2422_v15, %v734_v22 }
 0x15f   : > { %v764_v58 = vadd.f32 %v763_v17, %v735_v23 }
 0x161   : > { %v782_v27 = vmax.f32 %v764_v58, 0.0 }
 0x162   : > { %v2434_v34 = vld [vmem:[#allocation3 + $0x10] sm:$0xff]  ;;  %v821_v33 = vld [vmem:[#allocation3 + $0x18] sm:$0x3] }
 0x163   : > { %811 = vst.msk [vmem:[#allocation3 + $0x21] sm:$0xff] %vm256_vm0, %v782_v27  ;;  %v881_v36 = vrot.slane %v2434_v34, 2  ;;  %v882_v37 = vrot.slane %v821_v33, 2  ;;  %v857_v40 = vrot.slane %v2434_v34, 1  ;;  %v858_v6 = vrot.slane %v821_v33, 1 }
 0x165   : > { %v737_v41 = vpop.f32.mrf.mxu0  ;;  %v883_v42 = vsel %vm348_vm3, %v881_v36, %v882_v37  ;;  %v859_v43 = vsel %vm323_vm2, %v857_v40, %v858_v6  ;;  %v773_v6 = vpop.f32.mrf.mxu1 }
 0x166   : > { %v738_v44 = vadd.f32 %v2422_v15, %v737_v41  ;;  %v1741_v7 = vpack.i.bf16 %v883_v42, %v880_v35  ;;  %v1736_v45 = vpack.i.bf16 %v859_v43, %v856_v9 }
 0x168   : > { %v767_v3 = vadd.f32 %v766_v8, %v738_v44  ;;  %1742 = vrot.lane.b32.xlu2 %v1741_v7, %s1950_s11  ;;  %1737 = vrot.lane.b32.xlu1 %v1736_v45, %s1948_s28 }
 0x16a   : > { %v783_v47 = vmax.f32 %v767_v3, 0.0  ;;  %v2446_v48 = vld [vmem:[#allocation3 + $0x20] sm:$0xff]  ;;  %v823_v50 = vld [vmem:[#allocation3 + $0x28] sm:$0x3] }
 0x16b   : > { %v1746_v51 = vpack.i.bf16 %v2446_v48, %v2434_v34  ;;  %v884_v52 = vrot.slane %v2446_v48, 2  ;;  %v885_v57 = vrot.slane %v823_v50, 2  ;;  %v860_v59 = vrot.slane %v2446_v48, 1 }
 0x16c   : > { %812 = vst.msk [vmem:[#allocation3 + $0x31] sm:$0xff] %vm256_vm0, %v783_v47  ;;  %v861_v18 = vrot.slane %v823_v50, 1 }
 0x16d   : > { %v739_v60 = vpop.f32.mrf.mxu0  ;;  %1747 = vrot.lane.b32.xlu0 %v1746_v51, %s1947_s21  ;;  %v886_v10 = vsel %vm348_vm3, %v884_v52, %v885_v57 }
 0x16e   : > { %v740_v62 = vadd.f32 %v2422_v15, %v739_v60  ;;  %v1756_v63 = vpack.i.bf16 %v886_v10, %v883_v42  ;;  %v862_v55 = vsel %vm323_vm2, %v860_v59, %v861_v18 }
 0x16f   : > { %v1751_v56 = vpack.i.bf16 %v862_v55, %v859_v43 }
 0x170   : > { %v769_v0 = vadd.f32 %v768_v61, %v740_v62  ;;  %1757 = vrot.lane.b32.xlu2 %v1756_v63, %s1953_s14 }
 0x171   : > { %1752 = vrot.lane.b32.xlu1 %v1751_v56, %s1949_s10 }
 0x172   : > { %v784_v4 = vmax.f32 %v769_v0, 0.0 }
 0x173   : > { %v2459_v5 = vld [vmem:[#allocation3 + $0x30] sm:$0xff]  ;;  %v825_v11 = vld [vmem:[#allocation3 + $0x38] sm:$0x3] }
 0x174   : > { %813 = vst.msk [vmem:[#allocation3 + $0x41] sm:$0xff] %vm256_vm0, %v784_v4  ;;  %v1761_v54 = vpack.i.bf16 %v2459_v5, %v2446_v48  ;;  %v887_v12 = vrot.slane %v2459_v5, 2  ;;  %v888_v13 = vrot.slane %v825_v11, 2  ;;  %v863_v14 = vrot.slane %v2459_v5, 1 }
 0x175   : > { %v864_v16 = vrot.slane %v825_v11, 1 }
 0x176   : > { %v742_v20 = vpop.f32.mrf.mxu0  ;;  %1762 = vrot.lane.b32.xlu0 %v1761_v54, %s1951_s12  ;;  %v889_v21 = vsel %vm348_vm3, %v887_v12, %v888_v13 }
 0x177   : > { %v743_v49 = vadd.f32 %v2422_v15, %v742_v20  ;;  %v1151_v17 = vpack.c.bf16 %v889_v21, %v886_v10  ;;  %v865_v39 = vsel %vm323_vm2, %v863_v14, %v864_v16  ;;  %v1776_v46 = vpack.i.bf16 %v889_v21, %v886_v10  ;;  %v776_v10 = vpop.f32.mrf.mxu1 }
 0x178   : > { %v1771_v22 = vpack.i.bf16 %v865_v39, %v862_v55 }
 0x179   : > { %v772_v23 = vadd.f32 %v771_v19, %v743_v49  ;;  %1521 = vmatmul.msk.bf16.vlgmr.msra.gmra.mxu3 %vm256_vm0, %v1151_v17 }
 0x17a   : > { %1772 = vrot.lane.b32.xlu2 %v1771_v22, %s1948_s28  ;;  %1767 = vrot.lane.b32.xlu1 %v1771_v22, %s1952_s13 }
 0x17b   : > { %v785_v24 = vmax.f32 %v772_v23, 0.0  ;;  %v2473_v25 = vld [vmem:[#allocation3 + $0x40] sm:$0xff]  ;;  %v827_v26 = vld [vmem:[#allocation3 + $0x48] sm:$0x3] }
 0x17c   : > { %v866_v58 = vrot.slane %v2473_v25, 1  ;;  %v867_v27 = vrot.slane %v827_v26, 1  ;;  %v890_v33 = vrot.slane %v2473_v25, 2  ;;  %v891_v35 = vrot.slane %v827_v26, 2 }
 0x17d   : > { %814 = vst.msk [vmem:[#allocation3 + $0x51] sm:$0xff] %vm256_vm0, %v785_v24  ;;  %v1781_v8 = vpack.i.bf16 %v2473_v25, %v2459_v5 }
 0x17e   : > { %v744_v9 = vpop.f32.mrf.mxu0  ;;  %1777 = vrot.lane.b32.xlu0 %v1776_v46, %s1950_s11  ;;  %v868_v36 = vsel %vm323_vm2, %v866_v58, %v867_v27  ;;  %v892_v42 = vsel %vm348_vm3, %v890_v33, %v891_v35 }
 0x17f   : > { %v745_v37 = vadd.f32 %v2422_v15, %v744_v9  ;;  %v1786_v40 = vpack.i.bf16 %v868_v36, %v865_v39  ;;  %v1791_v44 = vpack.i.bf16 %v892_v42, %v889_v21  ;;  %v778_v17 = vpop.f32.mrf.mxu1 }
 0x181   : > { %v774_v41 = vadd.f32 %v773_v6, %v745_v37 }
 0x182   : > { %1787 = vrot.lane.b32.xlu2 %v1786_v40, %s1949_s10  ;;  %1782 = vrot.lane.b32.xlu1 %v1781_v8, %s1947_s21 }
 0x183   : > { %v786_v43 = vmax.f32 %v774_v41, 0.0 }
 0x184   : > { %v2486_v7 = vld [vmem:[#allocation3 + $0x50] sm:$0xff]  ;;  %v829_v45 = vld [vmem:[#allocation3 + $0x58] sm:$0x3] }
 0x185   : > { %815 = vst.msk [vmem:[#allocation3 + $0x61] sm:$0xff] %vm256_vm0, %v786_v43  ;;  %v893_v3 = vrot.slane %v2486_v7, 2  ;;  %v894_v47 = vrot.slane %v829_v45, 2  ;;  %v869_v50 = vrot.slane %v2486_v7, 1  ;;  %v870_v51 = vrot.slane %v829_v45, 1  ;;  %v836_v45 = vld [vmem:[#allocation3 + $0x90] sm:$0xff] }
 0x186   : > { %1792 = vrot.lane.b32.xlu0 %v1791_v44, %s1953_s14  ;;  %v1796_v57 = vpack.i.bf16 %v2486_v7, %v2473_v25 }
 0x187   : > { %v895_v52 = vsel %vm348_vm3, %v893_v3, %v894_v47  ;;  %v871_v18 = vsel %vm323_vm2, %v869_v50, %v870_v51  ;;  %v837_v3 = vld [vmem:[#allocation3 + $0x98] sm:$0x3] }
 0x188   : > { %v1153_v59 = vpack.c.bf16 %v895_v52, %v892_v42  ;;  %v1801_v60 = vpack.i.bf16 %v871_v18, %v868_v36  ;;  %v1811_v11 = vpack.i.bf16 %v895_v52, %v892_v42 }
 0x18a   : > { %1797 = vrot.lane.b32.xlu1 %v1796_v57, %s1951_s12  ;;  %1522 = vmatmul.msk.bf16.gmra.mxu3 %vm256_vm0, %v1153_v59  ;;  %v916_v57 = vrot.slane %v837_v3, 2 }
 0x18b   : > { %1802 = vrot.lane.b32.xlu2 %v1801_v60, %s1952_s13 }
 0x18c   : > { %v747_v61 = vpop.f32.mrf.mxu0  ;;  %v2499_v62 = vld [vmem:[#allocation3 + $0x60] sm:$0xff]  ;;  %v831_v63 = vld [vmem:[#allocation3 + $0x68] sm:$0x3] }
 0x18d   : > { %v748_v55 = vadd.f32 %v2422_v15, %v747_v61  ;;  %v872_v56 = vrot.slane %v2499_v62, 1  ;;  %v873_v0 = vrot.slane %v831_v63, 1  ;;  %v1816_v54 = vpack.i.bf16 %v2499_v62, %v2486_v7 }
 0x18e   : > { %1807 = vrot.lane.b32.xlu0 %v1801_v60, %s1948_s28  ;;  %v896_v14 = vrot.slane %v2499_v62, 2  ;;  %v897_v16 = vrot.slane %v831_v63, 2  ;;  %v913_v60 = vrot.slane %v837_v3, 1  ;;  %v1545_v63 = vld [vmem:[%s2692_s3 + $0x38] sm:$0xff] }
 0x18f   : > { %v777_v4 = vadd.f32 %v776_v10, %v748_v55  ;;  %v874_v13 = vsel %vm323_vm2, %v872_v56, %v873_v0  ;;  %1246 = vmatpush.bf16.msra.mxu2 %v1545_v63 }
 0x190   : > { %v1821_v20 = vpack.i.bf16 %v874_v13, %v871_v18  ;;  %v898_v49 = vsel %vm348_vm3, %v896_v14, %v897_v16  ;;  %v912_v18 = vrot.slane %v836_v45, 1  ;;  %v1540_v14 = vld [vmem:[%s2692_s3 + $0x10] sm:$0xff]  ;;  %v1539_v16 = vld [vmem:[%s2692_s3 + $0x8] sm:$0xff] }
 0x191   : > { %v787_v12 = vmax.f32 %v777_v4, 0.0  ;;  %v1826_v22 = vpack.i.bf16 %v898_v49, %v895_v52  ;;  %v915_v52 = vrot.slane %v836_v45, 2 }
 0x192   : > { %1812 = vrot.lane.b32.xlu1 %v1811_v11, %s1950_s11  ;;  %v914_v55 = vsel %vm323_vm2, %v912_v18, %v913_v60  ;;  %v1544_v11 = vld [vmem:[%s2692_s3 + $0x30] sm:$0xff] }
 0x193   : > { %816 = vst.msk [vmem:[#allocation3 + $0x71] sm:$0xff] %vm256_vm0, %v787_v12  ;;  %1817 = vrot.lane.b32.xlu2 %v1816_v54, %s1947_s21  ;;  %v917_v61 = vsel %vm348_vm3, %v915_v52, %v916_v57  ;;  %1247 = vmatpush.bf16.msra.mxu2 %v1544_v11  ;;  %v1543_v54 = vld [vmem:[%s2692_s3 + $0x28] sm:$0xff]  ;;  %v1542_v12 = vld [vmem:[%s2692_s3 + $0x20] sm:$0xff] }
 0x194   : > { %v749_v19 = vpop.f32.mrf.mxu0 }
 0x195   : > { %v750_v21 = vadd.f32 %v2422_v15, %v749_v19  ;;  %v1538_v19 = vld [vmem:[%s2692_s3] sm:$0xff] }
 0x196   : > { %1822 = vrot.lane.b32.xlu0 %v1821_v20, %s1949_s10 }
 0x197   : > { %v779_v39 = vadd.f32 %v778_v17, %v750_v21  ;;  %1248 = vmatpush.bf16.msra.mxu2 %v1543_v54 }
 0x199   : > { %v788_v23 = vmax.f32 %v779_v39, 0.0 }
 0x19a   : > { %1827 = vrot.lane.b32.xlu1 %v1826_v22, %s1953_s14  ;;  %v2515_v24 = vld [vmem:[#allocation3 + $0x70] sm:$0xff]  ;;  %v833_v26 = vld [vmem:[#allocation3 + $0x78] sm:$0x3] }
 0x19b   : > { %817 = vst.msk [vmem:[#allocation3 + $0x81] sm:$0xff] %vm256_vm0, %v788_v23  ;;  %v1831_v46 = vpack.i.bf16 %v2515_v24, %v2499_v62  ;;  %v899_v15 = vrot.slane %v2515_v24, 2  ;;  %v900_v58 = vrot.slane %v833_v26, 2  ;;  %v875_v27 = vrot.slane %v2515_v24, 1  ;;  %1249 = vmatpush.bf16.msra.mxu2 %v1542_v12 }
 0x19c   : > { %v876_v33 = vrot.slane %v833_v26, 1 }
 0x19d   : > { %1832 = vrot.lane.b32.xlu2 %v1831_v46, %s1951_s12  ;;  %v901_v35 = vsel %vm348_vm3, %v899_v15, %v900_v58 }
 0x19e   : > { %v1155_v9 = vpack.c.bf16 %v901_v35, %v898_v49  ;;  %v877_v36 = vsel %vm323_vm2, %v875_v27, %v876_v33  ;;  %v1846_v8 = vpack.i.bf16 %v901_v35, %v898_v49 }
 0x19f   : > { %v1836_v37 = vpack.i.bf16 %v877_v36, %v874_v13  ;;  %v1541_v13 = vld [vmem:[%s2692_s3 + $0x18] sm:$0xff] }
 0x1a0   : > { %1523 = vmatmul.msk.bf16.gmra.mxu3 %vm256_vm0, %v1155_v9  ;;  %1250 = vmatpush.bf16.msra.mxu2 %v1541_v13 }
 0x1a1   : > { %1837 = vrot.lane.b32.xlu0 %v1836_v37, %s1952_s13 }
 0x1a2   : > { %1842 = vrot.lane.b32.xlu1 %v1836_v37, %s1948_s28  ;;  %v834_v40 = vld [vmem:[#allocation3 + $0x80] sm:$0xff]  ;;  %v835_v6 = vld [vmem:[#allocation3 + $0x88] sm:$0x3] }
 0x1a3   : > { %v904_v41 = vrot.slane %v834_v40, 1  ;;  %v905_v42 = vrot.slane %v835_v6, 1  ;;  %v907_v43 = vrot.slane %v834_v40, 2  ;;  %v908_v44 = vrot.slane %v835_v6, 2 }
 0x1a4   : > { %v1851_v51 = vpack.i.bf16 %v834_v40, %v2515_v24  ;;  %v1866_v0 = vpack.i.bf16 %v836_v45, %v834_v40  ;;  %1251 = vmatpush.bf16.msra.mxu2 %v1540_v14 }
 0x1a5   : > { %1847 = vrot.lane.b32.xlu2 %v1846_v8, %s1950_s11  ;;  %v906_v47 = vsel %vm323_vm2, %v904_v41, %v905_v42  ;;  %v909_v59 = vsel %vm348_vm3, %v907_v43, %v908_v44 }
 0x1a6   : > { %v1856_v50 = vpack.i.bf16 %v906_v47, %v877_v36  ;;  %v1861_v10 = vpack.i.bf16 %v909_v59, %v901_v35  ;;  %v1157_v56 = vpack.c.bf16 %v917_v61, %v909_v59  ;;  %v1871_v4 = vpack.i.bf16 %v914_v55, %v906_v47 }
 0x1a8   : > { %1252 = vmatpush.bf16.msra.mxu2 %v1539_v16 }
 0x1a9   : > { %1852 = vrot.lane.b32.xlu0 %v1851_v51, %s1947_s21  ;;  %s246_s21 = scalar_lea.vmem %s2694_s5, %s1528_s30 }
 0x1aa   : > { %1857 = vrot.lane.b32.xlu1 %v1856_v50, %s1949_s10 }
 0x1ac   : > { %1253 = vmatpush.bf16.msra.mxu2 %v1538_v19 }
 0x1ad   : > { %1862 = vrot.lane.b32.xlu2 %v1861_v10, %s1953_s14 }
 0x1b0   : > { %1524 = vmatmul.msk.bf16.gmra.mxu3 %vm256_vm0, %v1157_v56 }
 0x1b1   : > { %1867 = vrot.lane.b32.xlu0 %v1866_v0, %s1951_s12 }
 0x1b2   : > { %1872 = vrot.lane.b32.xlu1 %v1871_v4, %s1952_s13 }
 0x1c2   : > { %v1743_v20 = vpop.permute.xlu2 %1742 }
 0x1c3   : > { %v1745_v27 = vunpack.i.h.bf16 %v1743_v20  ;;  %v1744_v33 = vunpack.i.l.bf16 %v1743_v20 }
 0x1ca   : > { %v1758_v49 = vpop.permute.xlu2 %1757 }
 0x1cb   : > { %v1760_v44 = vunpack.i.h.bf16 %v1758_v49  ;;  %v1759_v45 = vunpack.i.l.bf16 %v1758_v49 }
 0x1d4   : > { %v1773_v35 = vpop.permute.xlu2 %1772 }
 0x1d5   : > { %v1775_v55 = vunpack.i.h.bf16 %v1773_v35  ;;  %v1774_v56 = vunpack.i.l.bf16 %v1773_v35 }
 0x1d7   : > { %v1097_v13 = vsel %vm256_vm0, %v2459_v5, %v1775_v55  ;;  %v1096_v14 = vsel %vm256_vm0, %v2446_v48, %v1774_v56 }
 0x1da   : > { %v1738_v21 = vpop.permute.xlu1 %1737 }
 0x1db   : > { %v1740_v39 = vunpack.i.h.bf16 %v1738_v21  ;;  %v1739_v22 = vunpack.i.l.bf16 %v1738_v21 }
 0x1dc   : > { %v1788_v10 = vpop.permute.xlu2 %1787 }
 0x1dd   : > { %v1095_v26 = vsel %vm256_vm0, %v2434_v34, %v1740_v39  ;;  %v1094_v46 = vsel %vm256_vm0, %v2429_v38, %v1739_v22 }
 0x1de   : > { %v1102_v37 = vsel %vm573_vm4, %v1094_v46, %v1744_v33  ;;  %v1103_v40 = vsel %vm573_vm4, %v1095_v26, %v1745_v27  ;;  %v1789_v26 = vunpack.i.l.bf16 %v1788_v10 }
 0x1df   : > { %v1748_v17 = vpop.permute.xlu0 %1747 }
 0x1e0   : > { %v1750_v15 = vunpack.i.h.bf16 %v1748_v17  ;;  %v1749_v58 = vunpack.i.l.bf16 %v1748_v17 }
 0x1e2   : > { %v1110_v8 = vsel %vm582_vm5, %v1102_v37, %v1749_v58  ;;  %v1111_v41 = vsel %vm582_vm5, %v1103_v40, %v1750_v15 }
 0x1e3   : > { %v1753_v23 = vpop.permute.xlu1 %1752 }
 0x1e4   : > { %v1755_v9 = vunpack.i.h.bf16 %v1753_v23  ;;  %v1754_v36 = vunpack.i.l.bf16 %v1753_v23  ;;  %v1790_v23 = vunpack.i.h.bf16 %v1788_v10 }
 0x1e5   : > { %v1803_v21 = vpop.permute.xlu2 %1802 }
 0x1e6   : > { %v1118_v34 = vsel %vm591_vm6, %v1110_v8, %v1754_v36  ;;  %v1119_v38 = vsel %vm591_vm6, %v1111_v41, %v1755_v9  ;;  %v1805_v27 = vunpack.i.h.bf16 %v1803_v21  ;;  %v1804_v33 = vunpack.i.l.bf16 %v1803_v21 }
 0x1e7   : > { %v1126_v51 = vsel %vm600_vm7, %v1118_v34, %v1759_v45  ;;  %v1127_v52 = vsel %vm600_vm7, %v1119_v38, %v1760_v44 }
 0x1e8   : > { %v1763_v6 = vpop.permute.xlu0 %1762 }
 0x1e9   : > { %v1765_v42 = vunpack.i.h.bf16 %v1763_v6  ;;  %v1764_v43 = vunpack.i.l.bf16 %v1763_v6 }
 0x1eb   : > { %v1134_v57 = vsel %vm609_vm8, %v1126_v51, %v1764_v43  ;;  %v1135_v59 = vsel %vm609_vm8, %v1127_v52, %v1765_v42 }
 0x1ec   : > { %v1768_v3 = vpop.permute.xlu1 %1767 }
 0x1ed   : > { %v1770_v47 = vunpack.i.h.bf16 %v1768_v3  ;;  %v1769_v50 = vunpack.i.l.bf16 %v1768_v3  ;;  %v1818_v34 = vpop.permute.xlu2 %1817 }
 0x1ee   : > { %v1820_v10 = vunpack.i.h.bf16 %v1818_v34 }
 0x1ef   : > { %v1142_v18 = vsel %vm618_vm9, %v1134_v57, %v1769_v50  ;;  %v1143_v60 = vsel %vm618_vm9, %v1135_v59, %v1770_v47 }
 0x1f0   : > { %v1778_v61 = vpop.permute.xlu0 %1777  ;;  %v1150_v63 = vpack.c.bf16 %v1143_v60, %v1142_v18 }
 0x1f1   : > { %v1780_v4 = vunpack.i.h.bf16 %v1778_v61  ;;  %v1779_v11 = vunpack.i.l.bf16 %v1778_v61  ;;  %v1819_v61 = vunpack.i.l.bf16 %v1818_v34 }
 0x1f2   : > { %1254 = vmatmul.bf16.vlgmr.msra.gmra.mxu2 %v1150_v63 }
 0x1f3   : > { %v1104_v19 = vsel %vm573_vm4, %v1096_v14, %v1779_v11  ;;  %v1105_v20 = vsel %vm573_vm4, %v1097_v13, %v1780_v4 }
 0x1f4   : > { %v1783_v0 = vpop.permute.xlu1 %1782 }
 0x1f5   : > { %v1785_v54 = vunpack.i.h.bf16 %v1783_v0  ;;  %v1784_v12 = vunpack.i.l.bf16 %v1783_v0 }
 0x1f7   : > { %v1113_v49 = vsel %vm582_vm5, %v1105_v20, %v1785_v54  ;;  %v1112_v17 = vsel %vm582_vm5, %v1104_v19, %v1784_v12  ;;  %v1833_v47 = vpop.permute.xlu2 %1832 }
 0x1f8   : > { %v1793_v16 = vpop.permute.xlu0 %1792  ;;  %v1120_v5 = vsel %vm591_vm6, %v1112_v17, %v1789_v26  ;;  %v1121_v15 = vsel %vm591_vm6, %v1113_v49, %v1790_v23  ;;  %v1835_v54 = vunpack.i.h.bf16 %v1833_v47  ;;  %v1834_v12 = vunpack.i.l.bf16 %v1833_v47 }
 0x1f9   : > { %v1795_v39 = vunpack.i.h.bf16 %v1793_v16  ;;  %v1794_v22 = vunpack.i.l.bf16 %v1793_v16 }
 0x1fb   : > { %v1128_v35 = vsel %vm600_vm7, %v1120_v5, %v1794_v22  ;;  %v1129_v9 = vsel %vm600_vm7, %v1121_v15, %v1795_v39 }
 0x1fc   : > { %v1798_v46 = vpop.permute.xlu1 %1797 }
 0x1fd   : > { %v1800_v48 = vunpack.i.h.bf16 %v1798_v46  ;;  %v1799_v58 = vunpack.i.l.bf16 %v1798_v46 }
 0x1ff   : > { %v1136_v36 = vsel %vm609_vm8, %v1128_v35, %v1799_v58  ;;  %v1137_v37 = vsel %vm609_vm8, %v1129_v9, %v1800_v48  ;;  %v1848_v49 = vpop.permute.xlu2 %1847 }
 0x200   : > { %v1808_v40 = vpop.permute.xlu0 %1807  ;;  %v1144_v6 = vsel %vm618_vm9, %v1136_v36, %v1804_v33  ;;  %v1145_v8 = vsel %vm618_vm9, %v1137_v37, %v1805_v27  ;;  %v1850_v48 = vunpack.i.h.bf16 %v1848_v49  ;;  %v1849_v58 = vunpack.i.l.bf16 %v1848_v49 }
 0x201   : > { %v1152_v41 = vpack.c.bf16 %v1145_v8, %v1144_v6  ;;  %v1810_v42 = vunpack.i.h.bf16 %v1808_v40  ;;  %v1809_v43 = vunpack.i.l.bf16 %v1808_v40 }
 0x203   : > { %1259 = vmatmul.bf16.gmra.mxu2 %v1152_v41  ;;  %v1099_v50 = vsel %vm256_vm0, %v2486_v7, %v1810_v42  ;;  %v1098_v51 = vsel %vm256_vm0, %v2473_v25, %v1809_v43 }
 0x204   : > { %v1813_v38 = vpop.permute.xlu1 %1812 }
 0x205   : > { %v1815_v44 = vunpack.i.h.bf16 %v1813_v38  ;;  %v1814_v45 = vunpack.i.l.bf16 %v1813_v38 }
 0x207   : > { %v1107_v57 = vsel %vm573_vm4, %v1099_v50, %v1815_v44  ;;  %v1106_v59 = vsel %vm573_vm4, %v1098_v51, %v1814_v45 }
 0x208   : > { %v1823_v3 = vpop.permute.xlu0 %1822  ;;  %v1114_v56 = vsel %vm582_vm5, %v1106_v59, %v1819_v61  ;;  %v1115_v0 = vsel %vm582_vm5, %v1107_v57, %v1820_v10  ;;  %v1284_v10 = vpop.f32.mrf.mxu3  ;;  %v1877_v61 = vld [vmem:[%s2693_s4] ss:$0 sm:$0xff] }
 0x209   : > { %v1825_v18 = vunpack.i.h.bf16 %v1823_v3  ;;  %v1824_v60 = vunpack.i.l.bf16 %v1823_v3 }
 0x20b   : > { %v1122_v7 = vsel %vm591_vm6, %v1114_v56, %v1824_v60  ;;  %v1123_v4 = vsel %vm591_vm6, %v1115_v0, %v1825_v18 }
 0x20c   : > { %v1828_v52 = vpop.permute.xlu1 %1827 }
 0x20d   : > { %v1830_v63 = vunpack.i.h.bf16 %v1828_v52  ;;  %v1829_v55 = vunpack.i.l.bf16 %v1828_v52 }
 0x20f   : > { %v1130_v25 = vsel %vm600_vm7, %v1122_v7, %v1829_v55  ;;  %v1131_v11 = vsel %vm600_vm7, %v1123_v4, %v1830_v63 }
 0x210   : > { %v1138_v20 = vsel %vm609_vm8, %v1130_v25, %v1834_v12  ;;  %v1139_v21 = vsel %vm609_vm8, %v1131_v11, %v1835_v54  ;;  %v1286_v7 = vpop.f32.mrf.mxu3 }
 0x213   : > { %v1838_v13 = vpop.permute.xlu0 %1837 }
 0x214   : > { %v1840_v14 = vunpack.i.h.bf16 %v1838_v13  ;;  %v1839_v16 = vunpack.i.l.bf16 %v1838_v13  ;;  %v1843_v19 = vpop.permute.xlu1 %1842 }
 0x215   : > { %v1845_v22 = vunpack.i.h.bf16 %v1843_v19  ;;  %v1844_v23 = vunpack.i.l.bf16 %v1843_v19 }
 0x216   : > { %v1146_v17 = vsel %vm618_vm9, %v1138_v20, %v1839_v16  ;;  %v1147_v39 = vsel %vm618_vm9, %v1139_v21, %v1840_v14 }
 0x217   : > { %v1154_v26 = vpack.c.bf16 %v1147_v39, %v1146_v17  ;;  %v1101_v46 = vsel %vm256_vm0, %v2515_v24, %v1845_v22  ;;  %v1100_v5 = vsel %vm256_vm0, %v2499_v62, %v1844_v23  ;;  %v1863_v24 = vpop.permute.xlu2 %1862 }
 0x218   : > { %v1108_v9 = vsel %vm573_vm4, %v1100_v5, %v1849_v58  ;;  %v1109_v36 = vsel %vm573_vm4, %v1101_v46, %v1850_v48  ;;  %v1865_v34 = vunpack.i.h.bf16 %v1863_v24  ;;  %v1864_v38 = vunpack.i.l.bf16 %v1863_v24  ;;  %v1289_v14 = vpop.f32.mrf.mxu3 }
 0x219   : > { %1264 = vmatmul.bf16.gmra.mxu2 %v1154_v26 }
 0x21b   : > { %v1853_v15 = vpop.permute.xlu0 %1852 }
 0x21c   : > { %v1855_v27 = vunpack.i.h.bf16 %v1853_v15  ;;  %v1854_v33 = vunpack.i.l.bf16 %v1853_v15  ;;  %v1858_v35 = vpop.permute.xlu1 %1857 }
 0x21d   : > { %v1860_v37 = vunpack.i.h.bf16 %v1858_v35  ;;  %v1859_v40 = vunpack.i.l.bf16 %v1858_v35 }
 0x21e   : > { %v1116_v6 = vsel %vm582_vm5, %v1108_v9, %v1854_v33  ;;  %v1117_v8 = vsel %vm582_vm5, %v1109_v36, %v1855_v27 }
 0x21f   : > { %v1124_v41 = vsel %vm591_vm6, %v1116_v6, %v1859_v40  ;;  %v1125_v62 = vsel %vm591_vm6, %v1117_v8, %v1860_v37 }
 0x220   : > { %v1132_v50 = vsel %vm600_vm7, %v1124_v41, %v1864_v38  ;;  %v1133_v51 = vsel %vm600_vm7, %v1125_v62, %v1865_v34  ;;  %v1291_v22 = vpop.f32.mrf.mxu3 }
 0x223   : > { %v1868_v42 = vpop.permute.xlu0 %1867 }
 0x224   : > { %v1870_v43 = vunpack.i.h.bf16 %v1868_v42  ;;  %v1869_v44 = vunpack.i.l.bf16 %v1868_v42  ;;  %v1873_v45 = vpop.permute.xlu1 %1872 }
 0x225   : > { %v1875_v3 = vunpack.i.h.bf16 %v1873_v45  ;;  %v1874_v47 = vunpack.i.l.bf16 %v1873_v45 }
 0x226   : > { %v1140_v52 = vsel %vm609_vm8, %v1132_v50, %v1869_v44  ;;  %v1141_v57 = vsel %vm609_vm8, %v1133_v51, %v1870_v43 }
 0x227   : > { %v1148_v59 = vsel %vm618_vm9, %v1140_v52, %v1874_v47  ;;  %v1149_v18 = vsel %vm618_vm9, %v1141_v57, %v1875_v3 }
 0x228   : > { %v1156_v60 = vpack.c.bf16 %v1149_v18, %v1148_v59  ;;  %v1294_v5 = vpop.f32.mrf.mxu3 }
 0x22a   : > { %1269 = vmatmul.bf16.gmra.mxu2 %v1156_v60 }
 0x230   : > { %v1296_v33 = vpop.f32.mrf.mxu3 }
 0x238   : > { %v1299_v8 = vpop.f32.mrf.mxu3 }
 0x240   : > { %v1301_v44 = vpop.f32.mrf.mxu3 }
 0x275   : > { %v1255_v63 = vpop.f32.mrf.mxu2 }
 0x276   : > { %v1256_v55 = vadd.f32 %v1877_v61, %v1255_v63 }
 0x278   : > { %v1285_v56 = vadd.f32 %v1284_v10, %v1256_v55 }
 0x27a   : > { %v1304_v0 = vadd.f32 %v1285_v56, %v2073_v1 }
 0x27c   : > { %v1312_v4 = vmax.f32 %v1304_v0, 0.0 }
 0x27d   : > { %v1257_v25 = vpop.f32.mrf.mxu2 }
 0x27e   : > { %v1258_v11 = vadd.f32 %v1877_v61, %v1257_v25  ;;  %1328 = vrot.lane.b32.xlu2 %v1312_v4, %s1948_s28 }
 0x280   : > { %v1287_v54 = vadd.f32 %v1286_v7, %v1258_v11 }
 0x282   : > { %v1305_v12 = vadd.f32 %v1287_v54, %v2076_v2 }
 0x284   : > { %v1313_v13 = vmax.f32 %v1305_v12, 0.0 }
 0x286   : > { %v1260_v16 = vpop.f32.mrf.mxu2  ;;  %1330 = vrot.lane.b32.xlu0 %v1313_v13, %s1948_s28 }
 0x287   : > { %v1261_v19 = vadd.f32 %v1877_v61, %v1260_v16 }
 0x289   : > { %v1290_v20 = vadd.f32 %v1289_v14, %v1261_v19 }
 0x28b   : > { %v1306_v21 = vadd.f32 %v1290_v20, %v2175_v28 }
 0x28d   : > { %v1314_v49 = vmax.f32 %v1306_v21, 0.0 }
 0x28e   : > { %v1262_v17 = vpop.f32.mrf.mxu2 }
 0x28f   : > { %v1263_v39 = vadd.f32 %v1877_v61, %v1262_v17  ;;  %1332 = vrot.lane.b32.xlu1 %v1314_v49, %s1948_s28 }
 0x291   : > { %v1292_v23 = vadd.f32 %v1291_v22, %v1263_v39 }
 0x293   : > { %v1307_v26 = vadd.f32 %v1292_v23, %v2180_v29 }
 0x295   : > { %v1315_v46 = vmax.f32 %v1307_v26, 0.0 }
 0x297   : > { %1334 = vrot.lane.b32.xlu2 %v1315_v46, %s1948_s28 }
 0x29c   : > { %v1265_v15 = vpop.f32.mrf.mxu2 }
 0x29d   : > { %v1266_v48 = vadd.f32 %v1877_v61, %v1265_v15 }
 0x29f   : > { %v1295_v58 = vadd.f32 %v1294_v5, %v1266_v48 }
 0x2a1   : > { %v1308_v27 = vadd.f32 %v1295_v58, %v2185_v30 }
 0x2a3   : > { %v1316_v35 = vmax.f32 %v1308_v27, 0.0 }
 0x2a4   : > { %v1267_v9 = vpop.f32.mrf.mxu2 }
 0x2a5   : > { %v1268_v36 = vadd.f32 %v1877_v61, %v1267_v9  ;;  %1336 = vrot.lane.b32.xlu0 %v1316_v35, %s1948_s28 }
 0x2a7   : > { %v1297_v37 = vadd.f32 %v1296_v33, %v1268_v36 }
 0x2a9   : > { %v1309_v40 = vadd.f32 %v1297_v37, %v2190_v31 }
 0x2ab   : > { %v1317_v6 = vmax.f32 %v1309_v40, 0.0 }
 0x2ad   : > { %v1270_v24 = vpop.f32.mrf.mxu2  ;;  %1338 = vrot.lane.b32.xlu1 %v1317_v6, %s1948_s28 }
 0x2ae   : > { %v1271_v41 = vadd.f32 %v1877_v61, %v1270_v24 }
 0x2b0   : > { %v1300_v62 = vadd.f32 %v1299_v8, %v1271_v41 }
 0x2b2   : > { %v1310_v34 = vadd.f32 %v1300_v62, %v2199_v32 }
 0x2b4   : > { %v1318_v38 = vmax.f32 %v1310_v34, 0.0 }
 0x2b5   : > { %v1272_v42 = vpop.f32.mrf.mxu2 }
 0x2b6   : > { %v1273_v43 = vadd.f32 %v1877_v61, %v1272_v42  ;;  %1340 = vrot.lane.b32.xlu2 %v1318_v38, %s1948_s28 }
 0x2b8   : > { %v1302_v45 = vadd.f32 %v1301_v44, %v1273_v43 }
 0x2ba   : > { %v1311_v3 = vadd.f32 %v1302_v45, %v2227_v53 }
 0x2bc   : > { %v1319_v47 = vmax.f32 %v1311_v3, 0.0 }
 0x2be   : > { %1342 = vrot.lane.b32.xlu0 %v1319_v47, %s1948_s28 }
 0x2d8   : > { %v1329_v50 = vpop.permute.xlu2 %1328 }
 0x2d9   : > { %v1352_v51 = vsel %vm256_vm0, %v2073_v1, %v1329_v50 }
 0x2da   : > { %1360 = vst.msk [vmem:[%s246_s21] sm:$0xff] %vm573_vm4, %v1352_v51 }
 0x2f1   : > { %v1335_v52 = vpop.permute.xlu2 %1334 }
 0x2f2   : > { %v1355_v57 = vsel %vm256_vm0, %v2180_v29, %v1335_v52 }
 0x2f3   : > { %1363 = vst.msk [vmem:[%s246_s21 + $0x18] sm:$0xff] %vm573_vm4, %v1355_v57 }
 0x2f8   : > { %v1331_v59 = vpop.permute.xlu0 %1330 }
 0x2f9   : > { %v1353_v18 = vsel %vm256_vm0, %v2076_v2, %v1331_v59 }
 0x2fa   : > { %1361 = vst.msk [vmem:[%s246_s21 + $0x8] sm:$0xff] %vm573_vm4, %v1353_v18 }
 0x301   : > { %v1333_v60 = vpop.permute.xlu1 %1332 }
 0x302   : > { %v1354_v10 = vsel %vm256_vm0, %v2175_v28, %v1333_v60 }
 0x303   : > { %1362 = vst.msk [vmem:[%s246_s21 + $0x10] sm:$0xff] %vm573_vm4, %v1354_v10 }
 0x310   : > { %v1341_v1 = vpop.permute.xlu2 %1340 }
 0x311   : > { %v1358_v61 = vsel %vm256_vm0, %v2199_v32, %v1341_v1 }
 0x312   : > { %1366 = vst.msk [vmem:[%s246_s21 + $0x30] sm:$0xff] %vm573_vm4, %v1358_v61 }
 0x317   : > { %v1337_v29 = vpop.permute.xlu0 %1336 }
 0x318   : > { %v1356_v63 = vsel %vm256_vm0, %v2185_v30, %v1337_v29 }
 0x319   : > { %1364 = vst.msk [vmem:[%s246_s21 + $0x20] sm:$0xff] %vm573_vm4, %v1356_v63 }
 0x31f   : > { %v1339_v2 = vpop.permute.xlu1 %1338 }
 0x320   : > { %v1357_v55 = vsel %vm256_vm0, %v2190_v31, %v1339_v2 }
 0x321   : > { %1365 = vst.msk [vmem:[%s246_s21 + $0x28] sm:$0xff] %vm573_vm4, %v1357_v55 }
 0x330   : > { %v1343_v28 = vpop.permute.xlu0 %1342 }
 0x331   : > { %v1359_v56 = vsel %vm256_vm0, %v2227_v53, %v1343_v28 }
 0x332   : > { %1367 = vst.msk [vmem:[%s246_s21 + $0x38] sm:$0xff] %vm573_vm4, %v1359_v56 }
 0x333 PF: > { %p15_p7 = scmp.ge.s32.totalorder %s2006_s23, 4   ;;  %s2698_s18 = smov %s1934_s19 }
 0x334   : > { %s2699_s19 = smov %s1938_s20  ;;  %s2700_s20 = smov %s2016_s26 }
 0x335   : > { %s2701_s21 = smov %s2006_s23  ;;  %17 = sbr.rel (!%p15_p7) target bundleno = 3 (0x3), region = 82 }
 0x33a   :  { %1389 = vsyncpa [#allocation5], 1 }
 0x33b   :  { %1391 = vsyncpa [#allocation5 + $0x1], 1 }

// kernel: block_forward_pallas.5
= control target key start
LH: loop header
LB: loop body
LE: loop exit
PB: predicated region body
PF: predicated region fallthrough
CT: control target
= control target key end

     0   :  { %s2066_s18 = smov 0   ;;  %s2815_s0 = inlined_call_operand.vmem [shape: f32[2,8,8,32], index: 0, kind: input, shape index: {}]   ;;  %s2816_s1 = inlined_call_operand.vmem [shape: bf16[288,32], index: 1, kind: input, shape index: {}]   ;;  %s2817_s2 = inlined_call_operand.vmem [shape: f32[1,32], index: 2, kind: input, shape index: {}]   ;;  %s2818_s3 = inlined_call_operand.vmem [shape: bf16[288,32], index: 3, kind: input, shape index: {}]   ;;  %s2819_s4 = inlined_call_operand.vmem [shape: f32[1,32], index: 4, kind: input, shape index: {}]   ;;  %s2820_s5 = inlined_call_operand.vmem [shape: f32[2,8,8,64], index: 5, kind: output, shape index: {}]  }
   0x1 LB: > { %s1559_s19 = sadd.s32 4294967295, %s2030_s18   ;;  %p1563_p0 = scmp.ge.s32.totalorder %s2030_s18, 1  ;;  %s2030_s18 = sphi %s2066_s18, %s15_s18  }
   0x2   : > { %p187_p1 = scmp.lt.s32.totalorder %s2030_s18, 3 }
   0x4   : > { %p188_p2 = pnand %p1563_p0, %p187_p1 }
   0x5   : > { %p215_p3 = scmp.lt.s32.totalorder (!%p188_p2), %s1559_s19, 1  ;;  %s2033_s24 = smov (!%p188_p2), 32  }
   0x6   : > { %191 = sbr.rel (%p188_p2) target bundleno = 808 (0x328), region = 40  ;;  %s2034_s25 = smov (!%p188_p2), 64  }
   0x7   : > { %s2035_s26 = smov (!%p188_p2), 96  }
   0xb   : > { %vm234_vm0 = vcmask 261120   ;;  %vm236_vm1 = vcmask 254976   ;;  %v2032_v0 = vmov 0.0   ;;  %s2822_s19 = smov (!%p215_p3, %s1559_s19), 1  ;;  %vm301_vm2 = vcmask 1046528  }
   0xc   : > { %244 = vst.msk [vmem:[#allocation2 + $0x40] sm:$0xff] %vm234_vm0, %v2032_v0  ;;  %s1722_s20 = sshll.u32 %s2822_s19, 6  ;;  %vm326_vm3 = vcmask 1045504   ;;  %vm535_vm4 = vcmask 523264   ;;  %vm544_vm5 = vcmask 785408  }
   0xd   : > { %245 = vst.msk [vmem:[#allocation2 + $0x48] sm:$0x3] %vm236_vm1, %v2032_v0  ;;  %s2090_s23 = scalar_lea.vmem %s2815_s0, %s1722_s20 }
   0xe   : > { %246 = vst.msk [vmem:[#allocation2 + $0x50] sm:$0xff] %vm234_vm0, %v2032_v0  ;;  %v2095_v1 = vld [vmem:[%s2090_s23 + $0x18] sm:$0xff]  ;;  %v2098_v2 = vld [vmem:[%s2090_s23 + $0x20] sm:$0xff]  ;;  %v2200_v21 = vld [vmem:[%s2090_s23 + $0x28] sm:$0xff] }
   0xf   : > { %247 = vst.msk [vmem:[#allocation2 + $0x58] sm:$0x3] %vm236_vm1, %v2032_v0  ;;  %v2205_v22 = vld [vmem:[%s2090_s23 + $0x30] sm:$0xff]  ;;  %v2210_v23 = vld [vmem:[%s2090_s23] sm:$0xff]  ;;  %v2215_v24 = vld [vmem:[%s2090_s23 + $0x8] sm:$0xff] }
  0x10   : > { %235 = vst.msk [vmem:[#allocation2] sm:$0xff] %vm234_vm0, %v2032_v0  ;;  %v2220_v25 = vld [vmem:[%s2090_s23 + $0x10] sm:$0xff]  ;;  %v2225_v26 = vld [vmem:[%s2090_s23 + $0x38] sm:$0xff]  ;;  %s224_s23 = scalar_lea.vmem %s2820_s5, %s1722_s20 }
  0x11   : > { %237 = vst.msk [vmem:[#allocation2 + $0x8] sm:$0x3] %vm236_vm1, %v2032_v0 }
  0x12   : > { %260 = vst.msk [vmem:[#allocation2 + $0x41] sm:$0xff] %vm234_vm0, %v2095_v1 }
  0x13   : > { %261 = vst.msk [vmem:[#allocation2 + $0x51] sm:$0xff] %vm234_vm0, %v2098_v2 }
  0x14   : > { %238 = vst.msk [vmem:[#allocation2 + $0x10] sm:$0xff] %vm234_vm0, %v2032_v0 }
  0x15   : > { %239 = vst.msk [vmem:[#allocation2 + $0x18] sm:$0x3] %vm236_vm1, %v2032_v0 }
  0x16   : > { %240 = vst.msk [vmem:[#allocation2 + $0x20] sm:$0xff] %vm234_vm0, %v2032_v0 }
  0x17   : > { %241 = vst.msk [vmem:[#allocation2 + $0x28] sm:$0x3] %vm236_vm1, %v2032_v0  ;;  %v2227_v27 = vld [vmem:[#allocation2] sm:$0xff] }
  0x18   : > { %242 = vst.msk [vmem:[#allocation2 + $0x30] sm:$0xff] %vm234_vm0, %v2032_v0  ;;  %v266_v28 = vld [vmem:[#allocation2 + $0x8] sm:$0x3]  ;;  %v302_v29 = vrot.slane %v2227_v27, 1  ;;  %v327_v61 = vrot.slane %v2227_v27, 2 }
  0x19   : > { %v2116_v3 = vld [vmem:[#allocation2 + $0x40] sm:$0xff]  ;;  %v274_v4 = vld [vmem:[#allocation2 + $0x48] sm:$0x3]  ;;  %243 = vst.msk [vmem:[#allocation2 + $0x38] sm:$0x3] %vm236_vm1, %v2032_v0  ;;  %v303_v30 = vrot.slane %v266_v28, 1 }
  0x1a   : > { %v2120_v5 = vld [vmem:[#allocation2 + $0x50] sm:$0xff]  ;;  %v276_v6 = vld [vmem:[#allocation2 + $0x58] sm:$0x3]  ;;  %v314_v7 = vrot.slane %v2116_v3, 1  ;;  %v315_v8 = vrot.slane %v274_v4, 1  ;;  %248 = vst.msk [vmem:[#allocation2 + $0x60] sm:$0xff] %vm234_vm0, %v2032_v0 }
  0x1b   : > { %v317_v9 = vrot.slane %v2120_v5, 1  ;;  %v318_v10 = vrot.slane %v276_v6, 1  ;;  %v340_v12 = vrot.slane %v274_v4, 2  ;;  %249 = vst.msk [vmem:[#allocation2 + $0x68] sm:$0x3] %vm236_vm1, %v2032_v0  ;;  %v343_v14 = vrot.slane %v276_v6, 2 }
  0x1c   : > { %v2127_v11 = vsel %vm301_vm2, %v314_v7, %v315_v8  ;;  %250 = vst.msk [vmem:[#allocation2 + $0x70] sm:$0xff] %vm234_vm0, %v2032_v0  ;;  %v339_v15 = vrot.slane %v2116_v3, 2  ;;  %v342_v16 = vrot.slane %v2120_v5, 2  ;;  %v304_v43 = vsel %vm301_vm2, %v302_v29, %v303_v30 }
  0x1d   : > { %v2132_v13 = vsel %vm301_vm2, %v317_v9, %v318_v10  ;;  %251 = vst.msk [vmem:[#allocation2 + $0x78] sm:$0x3] %vm236_vm1, %v2032_v0  ;;  %v328_v62 = vrot.slane %v266_v28, 2 }
  0x1e   : > { %v2140_v17 = vpack.i.bf16 %v2132_v13, %v2127_v11  ;;  %252 = vst.msk [vmem:[#allocation2 + $0x80] sm:$0xff] %vm234_vm0, %v2032_v0  ;;  %v2153_v18 = vsel %vm326_vm3, %v339_v15, %v340_v12  ;;  %v2156_v19 = vsel %vm326_vm3, %v342_v16, %v343_v14 }
  0x1f   : > { %253 = vst.msk [vmem:[#allocation2 + $0x88] sm:$0x3] %vm236_vm1, %v2032_v0  ;;  %v1787_v20 = vpack.i.bf16 %v2156_v19, %v2153_v18  ;;  %v329_v8 = vsel %vm326_vm3, %v327_v61, %v328_v62 }
  0x20   : > { %1783 = vrot.lane.b32.xlu0 %v2140_v17, %s2033_s24  ;;  %254 = vst.msk [vmem:[#allocation2 + $0x90] sm:$0xff] %vm234_vm0, %v2032_v0 }
  0x21   : > { %255 = vst.msk [vmem:[#allocation2 + $0x98] sm:$0x3] %vm236_vm1, %v2032_v0 }
  0x22   : > { %844 = vst.msk [vmem:[#allocation3] sm:$0xff] %vm234_vm0, %v2032_v0 }
  0x23   : > { %845 = vst.msk [vmem:[#allocation3 + $0x8] sm:$0x3] %vm236_vm1, %v2032_v0 }
  0x24   : > { %846 = vst.msk [vmem:[#allocation3 + $0x10] sm:$0xff] %vm234_vm0, %v2032_v0 }
  0x25   : > { %847 = vst.msk [vmem:[#allocation3 + $0x18] sm:$0x3] %vm236_vm1, %v2032_v0 }
  0x26   : > { %848 = vst.msk [vmem:[#allocation3 + $0x20] sm:$0xff] %vm234_vm0, %v2032_v0 }
  0x27   : > { %849 = vst.msk [vmem:[#allocation3 + $0x28] sm:$0x3] %vm236_vm1, %v2032_v0 }
  0x28   : > { %1788 = vrot.lane.b32.xlu0 %v1787_v20, %s2034_s25  ;;  %850 = vst.msk [vmem:[#allocation3 + $0x30] sm:$0xff] %vm234_vm0, %v2032_v0 }
  0x29   : > { %851 = vst.msk [vmem:[#allocation3 + $0x38] sm:$0x3] %vm236_vm1, %v2032_v0 }
  0x2a   : > { %852 = vst.msk [vmem:[#allocation3 + $0x40] sm:$0xff] %vm234_vm0, %v2032_v0 }
  0x2b   : > { %853 = vst.msk [vmem:[#allocation3 + $0x48] sm:$0x3] %vm236_vm1, %v2032_v0 }
  0x2c   : > { %854 = vst.msk [vmem:[#allocation3 + $0x50] sm:$0xff] %vm234_vm0, %v2032_v0 }
  0x2d   : > { %855 = vst.msk [vmem:[#allocation3 + $0x58] sm:$0x3] %vm236_vm1, %v2032_v0 }
  0x2e   : > { %856 = vst.msk [vmem:[#allocation3 + $0x60] sm:$0xff] %vm234_vm0, %v2032_v0 }
  0x2f   : > { %857 = vst.msk [vmem:[#allocation3 + $0x68] sm:$0x3] %vm236_vm1, %v2032_v0 }
  0x30   : > { %858 = vst.msk [vmem:[#allocation3 + $0x70] sm:$0xff] %vm234_vm0, %v2032_v0 }
  0x31   : > { %859 = vst.msk [vmem:[#allocation3 + $0x78] sm:$0x3] %vm236_vm1, %v2032_v0 }
  0x32   : > { %860 = vst.msk [vmem:[#allocation3 + $0x80] sm:$0xff] %vm234_vm0, %v2032_v0 }
  0x33   : > { %861 = vst.msk [vmem:[#allocation3 + $0x88] sm:$0x3] %vm236_vm1, %v2032_v0 }
  0x34   : > { %862 = vst.msk [vmem:[#allocation3 + $0x90] sm:$0xff] %vm234_vm0, %v2032_v0 }
  0x35   : > { %863 = vst.msk [vmem:[#allocation3 + $0x98] sm:$0x3] %vm236_vm1, %v2032_v0 }
  0x36   : > { %262 = vst.msk [vmem:[#allocation2 + $0x61] sm:$0xff] %vm234_vm0, %v2200_v21 }
  0x37   : > { %263 = vst.msk [vmem:[#allocation2 + $0x71] sm:$0xff] %vm234_vm0, %v2205_v22 }
  0x38   : > { %257 = vst.msk [vmem:[#allocation2 + $0x11] sm:$0xff] %vm234_vm0, %v2210_v23 }
  0x39   : > { %258 = vst.msk [vmem:[#allocation2 + $0x21] sm:$0xff] %vm234_vm0, %v2215_v24 }
  0x3a   : > { %259 = vst.msk [vmem:[#allocation2 + $0x31] sm:$0xff] %vm234_vm0, %v2220_v25 }
  0x3b   : > { %264 = vst.msk [vmem:[#allocation2 + $0x81] sm:$0xff] %vm234_vm0, %v2225_v26 }
  0x3d   : > { %v2236_v31 = vld [vmem:[#allocation2 + $0x60] sm:$0xff]  ;;  %v278_v32 = vld [vmem:[#allocation2 + $0x68] sm:$0x3] }
  0x3e   : > { %v1792_v33 = vpack.i.bf16 %v2236_v31, %v2120_v5  ;;  %v2240_v34 = vld [vmem:[#allocation2 + $0x70] sm:$0xff]  ;;  %v280_v35 = vld [vmem:[#allocation2 + $0x78] sm:$0x3]  ;;  %v320_v36 = vrot.slane %v2236_v31, 1  ;;  %v321_v37 = vrot.slane %v278_v32, 1  ;;  %v345_v42 = vrot.slane %v2236_v31, 2 }
  0x3f   : > { %v323_v38 = vrot.slane %v2240_v34, 1  ;;  %v324_v39 = vrot.slane %v280_v35, 1  ;;  %v2244_v40 = vld [vmem:[#allocation2 + $0x10] sm:$0xff]  ;;  %v268_v41 = vld [vmem:[#allocation2 + $0x18] sm:$0x3]  ;;  %v346_v48 = vrot.slane %v278_v32, 2  ;;  %v1877_v62 = vpack.i.bf16 %v2240_v34, %v2236_v31 }
  0x40   : > { %1793 = vrot.lane.b32.xlu1 %v1792_v33, %s2035_s26  ;;  %v305_v44 = vrot.slane %v2244_v40, 1  ;;  %v306_v45 = vrot.slane %v268_v41, 1  ;;  %v2250_v46 = vld [vmem:[#allocation2 + $0x20] sm:$0xff]  ;;  %v270_v47 = vld [vmem:[#allocation2 + $0x28] sm:$0x3]  ;;  %v2253_v49 = vsel %vm301_vm2, %v320_v36, %v321_v37  ;;  %v330_v55 = vrot.slane %v2244_v40, 2 }
  0x41   : > { %v2256_v50 = vsel %vm301_vm2, %v323_v38, %v324_v39  ;;  %v333_v52 = vrot.slane %v2250_v46, 2  ;;  %v334_v53 = vrot.slane %v270_v47, 2  ;;  %v348_v56 = vrot.slane %v2240_v34, 2  ;;  %v272_v6 = vld [vmem:[#allocation2 + $0x38] sm:$0x3]  ;;  %v2287_v10 = vld [vmem:[#allocation2 + $0x30] sm:$0xff] }
  0x42   : > { %v2259_v51 = vsel %vm301_vm2, %v305_v44, %v306_v45  ;;  %v2267_v57 = vpack.i.bf16 %v2256_v50, %v2253_v49  ;;  %v331_v58 = vrot.slane %v268_v41, 2  ;;  %v2270_v59 = vsel %vm326_vm3, %v345_v42, %v346_v48  ;;  %v2292_v20 = vld [vmem:[#allocation2 + $0x80] sm:$0xff]  ;;  %v1731_v42 = vld [vmem:[%s2816_s1 + $0x38] sm:$0xff]  ;;  %v282_v45 = vld [vmem:[#allocation2 + $0x88] sm:$0x3] }
  0x43   : > { %v1817_v54 = vpack.i.bf16 %v2259_v51, %v304_v43  ;;  %v349_v60 = vrot.slane %v280_v35, 2  ;;  %v2275_v63 = vsel %vm326_vm3, %v333_v52, %v334_v53  ;;  %v308_v12 = vrot.slane %v2250_v46, 1  ;;  %1760 = vmatpush.bf16.msra.mxu1 %v1731_v42  ;;  %v1730_v43 = vld [vmem:[%s2816_s1 + $0x30] sm:$0xff]  ;;  %749 = vmatpush.bf16.msra.mxu0 %v1731_v42  ;;  %v1735_v42 = vld [vmem:[%s2816_s1 + $0x58] sm:$0xff] }
  0x44   : > { %v332_v7 = vsel %vm326_vm3, %v330_v55, %v331_v58  ;;  %v309_v14 = vrot.slane %v270_v47, 1  ;;  %v311_v15 = vrot.slane %v2287_v10, 1  ;;  %v312_v16 = vrot.slane %v272_v6, 1  ;;  %v1729_v47 = vld [vmem:[%s2816_s1 + $0x28] sm:$0xff] }
  0x45   : > { %1818 = vrot.lane.b32.xlu0 %v1817_v54, %s2033_s24  ;;  %v2278_v0 = vsel %vm326_vm3, %v348_v56, %v349_v60  ;;  %v1827_v9 = vpack.i.bf16 %v2275_v63, %v332_v7  ;;  %v1822_v28 = vpack.i.bf16 %v332_v7, %v329_v8  ;;  %v1807_v29 = vpack.i.bf16 %v2292_v20, %v2240_v34  ;;  %v1728_v54 = vld [vmem:[%s2816_s1 + $0x20] sm:$0xff]  ;;  %v1727_v60 = vld [vmem:[%s2816_s1 + $0x18] sm:$0xff]  ;;  %v1726_v8 = vld [vmem:[%s2816_s1 + $0x10] sm:$0xff] }
  0x46   : > { %v1802_v4 = vpack.i.bf16 %v2278_v0, %v2270_v59  ;;  %v2298_v30 = vsel %vm301_vm2, %v308_v12, %v309_v14  ;;  %v2301_v32 = vsel %vm301_vm2, %v311_v15, %v312_v16  ;;  %v1832_v35 = vpack.i.bf16 %v2287_v10, %v2250_v46 }
  0x47   : > { %v1842_v33 = vpack.i.bf16 %v2301_v32, %v2298_v30  ;;  %v336_v36 = vrot.slane %v2287_v10, 2  ;;  %v337_v37 = vrot.slane %v272_v6, 2  ;;  %v1812_v38 = vpack.i.bf16 %v2250_v46, %v2244_v40  ;;  %1761 = vmatpush.bf16.msra.mxu1 %v1730_v43  ;;  %750 = vmatpush.bf16.msra.mxu0 %v1730_v43  ;;  %v2363_v6 = vld [vmem:[#allocation2 + $0x98] sm:$0x3]  ;;  %v1740_v43 = vld [vmem:[%s2816_s1 + $0x80] sm:$0xff] }
  0x48   : > { %1798 = vrot.lane.b32.xlu1 %v2267_v57, %s2033_s24  ;;  %1803 = vrot.lane.b32.xlu2 %v1802_v4, %s2034_s25  ;;  %v1872_v48 = vpack.i.bf16 %v2270_v59, %v2156_v19  ;;  %v364_v52 = vrot.slane %v2292_v20, 2  ;;  %v365_v53 = vrot.slane %v282_v45, 2  ;;  %v1862_v55 = vpack.i.bf16 %v2120_v5, %v2116_v3  ;;  %v2361_v4 = vld [vmem:[#allocation2 + $0x90] sm:$0xff] }
  0x49   : > { %v2315_v39 = vsel %vm326_vm3, %v336_v36, %v337_v37  ;;  %v1852_v56 = vpack.i.bf16 %v2116_v3, %v2287_v10  ;;  %v1892_v7 = vpack.i.bf16 %v2361_v4, %v2292_v20  ;;  %v353_v12 = vrot.slane %v2292_v20, 1  ;;  %v1736_v37 = vld [vmem:[%s2816_s1 + $0x60] sm:$0xff] }
  0x4a   : > { %v1857_v41 = vpack.i.bf16 %v2153_v18, %v2315_v39  ;;  %v1847_v44 = vpack.i.bf16 %v2315_v39, %v2275_v63  ;;  %v2346_v58 = vsel %vm326_vm3, %v364_v52, %v365_v53  ;;  %v354_v14 = vrot.slane %v282_v45, 1 }
  0x4b   : > { %1762 = vmatpush.bf16.msra.mxu1 %v1729_v47  ;;  %751 = vmatpush.bf16.msra.mxu0 %v1729_v47  ;;  %v1887_v61 = vpack.i.bf16 %v2346_v58, %v2278_v0  ;;  %v370_v15 = vrot.slane %v2363_v6, 1  ;;  %v579_v45 = vpack.c.bf16 %v2315_v39, %v2275_v63  ;;  %v1734_v47 = vld [vmem:[%s2816_s1 + $0x50] sm:$0xff] }
  0x4c   : > { %v2380_v16 = vsel %vm301_vm2, %v353_v12, %v354_v14 }
  0x4d   : > { %1828 = vrot.lane.b32.xlu0 %v1827_v9, %s2033_s24  ;;  %v369_v9 = vrot.slane %v2361_v4, 1 }
  0x4f   : > { %1763 = vmatpush.bf16.msra.mxu1 %v1728_v54  ;;  %752 = vmatpush.bf16.msra.mxu0 %v1728_v54 }
  0x50   : > { %1823 = vrot.lane.b32.xlu1 %v1822_v28, %s2034_s25  ;;  %1808 = vrot.lane.b32.xlu2 %v1807_v29, %s2035_s26  ;;  %v371_v28 = vsel %vm301_vm2, %v369_v9, %v370_v15  ;;  %v1724_v29 = vld [vmem:[%s2816_s1] sm:$0xff]  ;;  %v582_v15 = vpack.c.bf16 %v2156_v19, %v2153_v18 }
  0x51   : > { %v1897_v20 = vpack.i.bf16 %v371_v28, %v2380_v16  ;;  %v1732_v9 = vld [vmem:[%s2816_s1 + $0x40] sm:$0xff] }
  0x53   : > { %1764 = vmatpush.bf16.msra.mxu1 %v1727_v60  ;;  %753 = vmatpush.bf16.msra.mxu0 %v1727_v60 }
  0x55   : > { %1843 = vrot.lane.b32.xlu0 %v1842_v33, %s2033_s24 }
  0x57   : > { %1765 = vmatpush.bf16.msra.mxu1 %v1726_v8  ;;  %754 = vmatpush.bf16.msra.mxu0 %v1726_v8 }
  0x58   : > { %1833 = vrot.lane.b32.xlu1 %v1832_v35, %s2034_s25  ;;  %1813 = vrot.lane.b32.xlu2 %v1812_v38, %s2035_s26  ;;  %v1737_v35 = vld [vmem:[%s2816_s1 + $0x68] sm:$0xff] }
  0x59   : > { %v1741_v38 = vld [vmem:[%s2816_s1 + $0x88] sm:$0xff] }
  0x5a   : > { %813 = vmatpush.bf16.msra.mxu2 %v1741_v38  ;;  %1768 = vmatpush.bf16.msra.mxu3 %v1741_v38 }
  0x5d   : > { %1858 = vrot.lane.b32.xlu0 %v1857_v41, %s2033_s24 }
  0x5e   : > { %814 = vmatpush.bf16.msra.mxu2 %v1740_v43  ;;  %1769 = vmatpush.bf16.msra.mxu3 %v1740_v43 }
  0x60   : > { %1848 = vrot.lane.b32.xlu1 %v1847_v44, %s2034_s25  ;;  %1838 = vrot.lane.b32.xlu2 %v1842_v33, %s2035_s26  ;;  %v1738_v33 = vld [vmem:[%s2816_s1 + $0x70] sm:$0xff] }
  0x61   : > { %1640 = vmatmul.msk.bf16.vlgmr.msra.gmra.mxu2 %vm234_vm0, %v579_v45 }
  0x65   : > { %1873 = vrot.lane.b32.xlu0 %v1872_v48, %s2033_s24 }
  0x68   : > { %1863 = vrot.lane.b32.xlu1 %v1862_v55, %s2034_s25  ;;  %1853 = vrot.lane.b32.xlu2 %v1852_v56, %s2035_s26  ;;  %v1733_v55 = vld [vmem:[%s2816_s1 + $0x48] sm:$0xff] }
  0x6d   : > { %1888 = vrot.lane.b32.xlu0 %v1887_v61, %s2033_s24 }
  0x70   : > { %1878 = vrot.lane.b32.xlu1 %v1877_v62, %s2034_s25  ;;  %1868 = vrot.lane.b32.xlu2 %v2140_v17, %s2035_s26  ;;  %v1725_v17 = vld [vmem:[%s2816_s1 + $0x8] sm:$0xff] }
  0x71   : > { %1766 = vmatpush.bf16.msra.mxu1 %v1725_v17  ;;  %755 = vmatpush.bf16.msra.mxu0 %v1725_v17 }
  0x72   : > { %1641 = vmatmul.msk.bf16.gmra.mxu2 %vm234_vm0, %v582_v15 }
  0x75   : > { %1767 = vmatpush.bf16.msra.mxu1 %v1724_v29  ;;  %756 = vmatpush.bf16.msra.mxu0 %v1724_v29 }
  0x78   : > { %1893 = vrot.lane.b32.xlu1 %v1892_v7, %s2034_s25  ;;  %1883 = vrot.lane.b32.xlu2 %v2267_v57, %s2035_s26  ;;  %v1739_v57 = vld [vmem:[%s2816_s1 + $0x78] sm:$0xff] }
  0x79   : > { %778 = vmatpush.bf16.msrb.mxu1 %v1739_v57 }
  0x7d   : > { %779 = vmatpush.bf16.msrb.mxu1 %v1738_v33 }
  0x80   : > { %1898 = vrot.lane.b32.xlu2 %v1897_v20, %s2035_s26 }
  0x81   : > { %780 = vmatpush.bf16.msrb.mxu1 %v1737_v35 }
  0x85   : > { %781 = vmatpush.bf16.msrb.mxu1 %v1736_v37 }
  0x89   : > { %782 = vmatpush.bf16.msrb.mxu1 %v1735_v42 }
  0x8d   : > { %783 = vmatpush.bf16.msrb.mxu1 %v1734_v47 }
  0x91   : > { %784 = vmatpush.bf16.msrb.mxu1 %v1733_v55 }
  0x92   : > { %v1784_v36 = vpop.permute.xlu0 %1783 }
  0x93   : > { %v1786_v48 = vunpack.i.h.bf16 %v1784_v36  ;;  %v1785_v52 = vunpack.i.l.bf16 %v1784_v36 }
  0x95   : > { %v532_v63 = vsel %vm234_vm0, %v2120_v5, %v1786_v48  ;;  %v531_v39 = vsel %vm234_vm0, %v2116_v3, %v1785_v52  ;;  %785 = vmatpush.bf16.msrb.mxu1 %v1732_v9 }
  0x9a   : > { %v1789_v44 = vpop.permute.xlu0 %1788 }
  0x9b   : > { %v1791_v53 = vunpack.i.h.bf16 %v1789_v44  ;;  %v1790_v54 = vunpack.i.l.bf16 %v1789_v44 }
  0x9d   : > { %v540_v61 = vsel %vm535_vm4, %v531_v39, %v1790_v54  ;;  %v541_v62 = vsel %vm535_vm4, %v532_v63, %v1791_v53 }
  0xa2   : > { %v1804_v41 = vpop.permute.xlu2 %1803 }
  0xa3   : > { %v1806_v57 = vunpack.i.h.bf16 %v1804_v41  ;;  %v1805_v33 = vunpack.i.l.bf16 %v1804_v41 }
  0xaa   : > { %v1809_v56 = vpop.permute.xlu2 %1808 }
  0xab   : > { %v1811_v42 = vunpack.i.h.bf16 %v1809_v56  ;;  %v1810_v43 = vunpack.i.l.bf16 %v1809_v56 }
  0xb2   : > { %v1794_v60 = vpop.permute.xlu1 %1793  ;;  %v1814_v29 = vpop.permute.xlu2 %1813 }
  0xb3   : > { %v1796_v7 = vunpack.i.h.bf16 %v1794_v60  ;;  %v1795_v8 = vunpack.i.l.bf16 %v1794_v60  ;;  %v1816_v47 = vunpack.i.h.bf16 %v1814_v29 }
  0xb5   : > { %v549_v12 = vsel %vm544_vm5, %v540_v61, %v1795_v8  ;;  %v550_v5 = vsel %vm544_vm5, %v541_v62, %v1796_v7  ;;  %v585_v7 = vpack.c.bf16 %v2278_v0, %v2270_v59 }
  0xb6   : > { %v583_v14 = vpack.c.bf16 %v550_v5, %v549_v12 }
  0xb7   : > { %v1819_v3 = vpop.permute.xlu0 %1818  ;;  %1642 = vmatmul.msk.bf16.vlgmr.msra.gmra.mxu3 %vm234_vm0, %v585_v7 }
  0xb8   : > { %767 = vmatmul.bf16.vlgmr.msra.gmra.mxu1 %v583_v14  ;;  %v1821_v37 = vunpack.i.h.bf16 %v1819_v3  ;;  %v1820_v38 = vunpack.i.l.bf16 %v1819_v3 }
  0xba   : > { %v1799_v17 = vpop.permute.xlu1 %1798  ;;  %v528_v41 = vsel %vm234_vm0, %v2244_v40, %v1821_v37  ;;  %v1839_v39 = vpop.permute.xlu2 %1838 }
  0xbb   : > { %v1801_v28 = vunpack.i.h.bf16 %v1799_v17  ;;  %v1800_v20 = vunpack.i.l.bf16 %v1799_v17  ;;  %v1841_v15 = vunpack.i.h.bf16 %v1839_v39  ;;  %v1840_v17 = vunpack.i.l.bf16 %v1839_v39 }
  0xbd   : > { %v534_v35 = vsel %vm234_vm0, %v2240_v34, %v1801_v28  ;;  %v533_v36 = vsel %vm234_vm0, %v2236_v31, %v1800_v20  ;;  %v527_v34 = vsel %vm234_vm0, %v2227_v27, %v1820_v38  ;;  %v1815_v31 = vunpack.i.l.bf16 %v1814_v29 }
  0xbe   : > { %v542_v18 = vsel %vm535_vm4, %v533_v36, %v1805_v33  ;;  %v543_v19 = vsel %vm535_vm4, %v534_v35, %v1806_v57 }
  0xbf   : > { %v1829_v44 = vpop.permute.xlu0 %1828  ;;  %v551_v53 = vsel %vm544_vm5, %v542_v18, %v1810_v43  ;;  %v552_v54 = vsel %vm544_vm5, %v543_v19, %v1811_v42 }
  0xc0   : > { %v586_v56 = vpack.c.bf16 %v552_v54, %v551_v53  ;;  %v1831_v27 = vunpack.i.h.bf16 %v1829_v44  ;;  %v1830_v61 = vunpack.i.l.bf16 %v1829_v44 }
  0xc2   : > { %v1824_v45 = vpop.permute.xlu1 %1823  ;;  %v554_v9 = vsel %vm234_vm0, %v2298_v30, %v1831_v27  ;;  %v553_v12 = vsel %vm234_vm0, %v2259_v51, %v1830_v61  ;;  %v1854_v29 = vpop.permute.xlu2 %1853 }
  0xc3   : > { %v1826_v48 = vunpack.i.h.bf16 %v1824_v45  ;;  %v1825_v52 = vunpack.i.l.bf16 %v1824_v45  ;;  %v1856_v36 = vunpack.i.h.bf16 %v1854_v29  ;;  %v1855_v37 = vunpack.i.l.bf16 %v1854_v29 }
  0xc5   : > { %v536_v55 = vsel %vm535_vm4, %v527_v34, %v1825_v52  ;;  %v537_v63 = vsel %vm535_vm4, %v528_v41, %v1826_v48  ;;  %v372_v41 = vrot.slane %v2361_v4, 2 }
  0xc6   : > { %v545_v40 = vsel %vm544_vm5, %v536_v55, %v1815_v31  ;;  %v546_v60 = vsel %vm544_vm5, %v537_v63, %v1816_v47  ;;  %v373_v31 = vrot.slane %v2363_v6, 2 }
  0xc7   : > { %v577_v62 = vpack.c.bf16 %v546_v60, %v545_v40  ;;  %v1844_v3 = vpop.permute.xlu0 %1843 }
  0xc8   : > { %772 = vmatmul.bf16.gmra.mxu1 %v586_v56  ;;  %v1846_v59 = vunpack.i.h.bf16 %v1844_v3  ;;  %v1845_v0 = vunpack.i.l.bf16 %v1844_v3  ;;  %v374_v54 = vsel %vm326_vm3, %v372_v41, %v373_v31 }
  0xc9   : > { %757 = vmatmul.bf16.vlgmr.msra.gmra.mxu0 %v577_v62  ;;  %v588_v39 = vpack.c.bf16 %v374_v54, %v2346_v58 }
  0xca   : > { %v1834_v8 = vpop.permute.xlu1 %1833  ;;  %v530_v30 = vsel %vm234_vm0, %v2287_v10, %v1846_v59  ;;  %v529_v51 = vsel %vm234_vm0, %v2250_v46, %v1845_v0  ;;  %v1869_v53 = vpop.permute.xlu2 %1868 }
  0xcb   : > { %v1836_v5 = vunpack.i.h.bf16 %v1834_v8  ;;  %v1835_v14 = vunpack.i.l.bf16 %v1834_v8  ;;  %v1871_v56 = vunpack.i.h.bf16 %v1869_v53  ;;  %v1870_v40 = vunpack.i.l.bf16 %v1869_v53  ;;  %1643 = vmatmul.msk.bf16.gmra.mxu3 %vm234_vm0, %v588_v39  ;;  %v1758_v53 = vld [vmem:[%s2818_s3 + $0x80] sm:$0xff] }
  0xcd   : > { %v561_v28 = vsel %vm535_vm4, %v553_v12, %v1835_v14  ;;  %v562_v20 = vsel %vm535_vm4, %v554_v9, %v1836_v5 }
  0xce   : > { %v569_v57 = vsel %vm544_vm5, %v561_v28, %v1840_v17  ;;  %v570_v33 = vsel %vm544_vm5, %v562_v20, %v1841_v15 }
  0xcf   : > { %v1859_v43 = vpop.permute.xlu0 %1858  ;;  %v578_v18 = vpack.c.bf16 %v570_v33, %v569_v57 }
  0xd0   : > { %v1861_v45 = vunpack.i.h.bf16 %v1859_v43  ;;  %v1860_v46 = vunpack.i.l.bf16 %v1859_v43 }
  0xd2   : > { %v1849_v35 = vpop.permute.xlu1 %1848  ;;  %v556_v48 = vsel %vm234_vm0, %v2127_v11, %v1861_v45  ;;  %v555_v4 = vsel %vm234_vm0, %v2301_v32, %v1860_v46  ;;  %v1884_v12 = vpop.permute.xlu2 %1883  ;;  %v2510_v46 = vld [vmem:[%s2817_s2] ss:$0 sm:$0xff] }
  0xd3   : > { %v1851_v38 = vunpack.i.h.bf16 %v1849_v35  ;;  %v1850_v42 = vunpack.i.l.bf16 %v1849_v35  ;;  %v1886_v3 = vunpack.i.h.bf16 %v1884_v12  ;;  %v1885_v15 = vunpack.i.l.bf16 %v1884_v12 }
  0xd5   : > { %v538_v19 = vsel %vm535_vm4, %v529_v51, %v1850_v42  ;;  %v539_v44 = vsel %vm535_vm4, %v530_v30, %v1851_v38 }
  0xd6   : > { %v547_v34 = vsel %vm544_vm5, %v538_v19, %v1855_v37  ;;  %v548_v10 = vsel %vm544_vm5, %v539_v44, %v1856_v36 }
  0xd7   : > { %v580_v47 = vpack.c.bf16 %v548_v10, %v547_v34  ;;  %v1874_v62 = vpop.permute.xlu0 %1873 }
  0xd8   : > { %786 = vmatmul.bf16.vlgmr.msrb.gmra.mxu1 %v578_v18  ;;  %v1876_v7 = vunpack.i.h.bf16 %v1874_v62  ;;  %v1875_v32 = vunpack.i.l.bf16 %v1874_v62 }
  0xd9   : > { %762 = vmatmul.bf16.gmra.mxu0 %v580_v47  ;;  %v1759_v47 = vld [vmem:[%s2818_s3 + $0x88] sm:$0xff] }
  0xda   : > { %v1864_v52 = vpop.permute.xlu1 %1863  ;;  %v558_v5 = vsel %vm234_vm0, %v2253_v49, %v1876_v7  ;;  %v557_v14 = vsel %vm234_vm0, %v2132_v13, %v1875_v32  ;;  %v1899_v35 = vpop.permute.xlu2 %1898  ;;  %1417 = vmatpush.bf16.msrb.mxu0 %v1759_v47 }
  0xdb   : > { %v1866_v55 = vunpack.i.h.bf16 %v1864_v52  ;;  %v1865_v63 = vunpack.i.l.bf16 %v1864_v52  ;;  %v1901_v37 = vunpack.i.h.bf16 %v1899_v35  ;;  %v1900_v38 = vunpack.i.l.bf16 %v1899_v35 }
  0xdd   : > { %v563_v6 = vsel %vm535_vm4, %v555_v4, %v1865_v63  ;;  %v564_v60 = vsel %vm535_vm4, %v556_v48, %v1866_v55 }
  0xde   : > { %v571_v11 = vsel %vm544_vm5, %v563_v6, %v1870_v40  ;;  %v572_v27 = vsel %vm544_vm5, %v564_v60, %v1871_v56  ;;  %1418 = vmatpush.bf16.msrb.mxu0 %v1758_v53  ;;  %v2518_v56 = vld [vmem:[#allocation3] sm:$0xff]  ;;  %v874_v40 = vld [vmem:[#allocation3 + $0x8] sm:$0x3] }
  0xdf   : > { %v581_v61 = vpack.c.bf16 %v572_v27, %v571_v11  ;;  %v1889_v29 = vpop.permute.xlu0 %1888  ;;  %v933_v27 = vrot.slane %v2518_v56, 2  ;;  %v909_v62 = vrot.slane %v2518_v56, 1  ;;  %v910_v7 = vrot.slane %v874_v40, 1 }
  0xe0   : > { %v1891_v57 = vunpack.i.h.bf16 %v1889_v29  ;;  %v1890_v33 = vunpack.i.l.bf16 %v1889_v29 }
  0xe2   : > { %v1879_v8 = vpop.permute.xlu1 %1878  ;;  %v560_v13 = vsel %vm234_vm0, %v2380_v16, %v1891_v57  ;;  %v559_v36 = vsel %vm234_vm0, %v2256_v50, %v1890_v33 }
  0xe3   : > { %v1881_v9 = vunpack.i.h.bf16 %v1879_v8  ;;  %v1880_v58 = vunpack.i.l.bf16 %v1879_v8 }
  0xe4   : > { %v816_v45 = vpop.f32.mrf.mxu2 }
  0xe5   : > { %v565_v17 = vsel %vm535_vm4, %v557_v14, %v1880_v58  ;;  %v566_v28 = vsel %vm535_vm4, %v558_v5, %v1881_v9  ;;  %v911_v14 = vsel %vm301_vm2, %v909_v62, %v910_v7 }
  0xe6   : > { %v573_v20 = vsel %vm544_vm5, %v565_v17, %v1885_v15  ;;  %v574_v59 = vsel %vm544_vm5, %v566_v28, %v1886_v3 }
  0xe7   : > { %v584_v0 = vpack.c.bf16 %v574_v59, %v573_v20 }
  0xe8   : > { %791 = vmatmul.bf16.gmra.mxu1 %v581_v61  ;;  %v934_v61 = vrot.slane %v874_v40, 2 }
  0xea   : > { %v1894_v30 = vpop.permute.xlu1 %1893  ;;  %v935_v5 = vsel %vm326_vm3, %v933_v27, %v934_v61 }
  0xeb   : > { %v1896_v49 = vunpack.i.h.bf16 %v1894_v30  ;;  %v1895_v51 = vunpack.i.l.bf16 %v1894_v30 }
  0xec   : > { %v818_v63 = vpop.f32.mrf.mxu2 }
  0xed   : > { %v567_v42 = vsel %vm535_vm4, %v559_v36, %v1895_v51  ;;  %v568_v43 = vsel %vm535_vm4, %v560_v13, %v1896_v49 }
  0xee   : > { %v575_v18 = vsel %vm544_vm5, %v567_v42, %v1900_v38  ;;  %v576_v19 = vsel %vm544_vm5, %v568_v43, %v1901_v37 }
  0xef   : > { %v587_v44 = vpack.c.bf16 %v576_v19, %v575_v18 }
  0xf5   : > { %v821_v20 = vpop.f32.mrf.mxu2 }
  0xf8   : > { %796 = vmatmul.bf16.gmra.mxu1 %v584_v0 }
 0x108   : > { %801 = vmatmul.bf16.gmra.mxu1 %v587_v44 }
 0x135   : > { %v2496_v41 = vpop.f32.mrf.mxu1 }
 0x13d   : > { %v2498_v34 = vpop.f32.mrf.mxu1 }
 0x145   : > { %v2500_v16 = vpop.f32.mrf.mxu1 }
 0x146   : > { %v758_v10 = vpop.f32.mrf.mxu0 }
 0x147   : > { %v759_v31 = vadd.f32 %v2510_v46, %v758_v10  ;;  %v823_v10 = vpop.f32.mrf.mxu2 }
 0x14d   : > { %v2502_v50 = vpop.f32.mrf.mxu1 }
 0x14e   : > { %v760_v48 = vpop.f32.mrf.mxu0 }
 0x14f   : > { %v761_v39 = vadd.f32 %v2510_v46, %v760_v48 }
 0x155   : > { %v787_v52 = vpop.f32.mrf.mxu1 }
 0x156   : > { %v788_v54 = vadd.f32 %v787_v52, %v759_v31  ;;  %v763_v11 = vpop.f32.mrf.mxu0  ;;  %v826_v31 = vpop.f32.mrf.mxu3  ;;  %v769_v52 = vadd.f32 %v2510_v46, %v2496_v41 }
 0x157   : > { %v764_v9 = vadd.f32 %v2510_v46, %v763_v11 }
 0x158   : > { %v817_v4 = vadd.f32 %v816_v45, %v788_v54 }
 0x15a   : > { %v836_v55 = vmax.f32 %v817_v4, 0.0 }
 0x15c   : > { %865 = vst.msk [vmem:[#allocation3 + $0x11] sm:$0xff] %vm234_vm0, %v836_v55 }
 0x15d   : > { %v789_v6 = vpop.f32.mrf.mxu1 }
 0x15e   : > { %v790_v60 = vadd.f32 %v789_v6, %v761_v39  ;;  %v765_v51 = vpop.f32.mrf.mxu0 }
 0x15f   : > { %v766_v37 = vadd.f32 %v2510_v46, %v765_v51 }
 0x160   : > { %v819_v32 = vadd.f32 %v818_v63, %v790_v60 }
 0x162   : > { %v837_v8 = vmax.f32 %v819_v32, 0.0 }
 0x163   : > { %v2523_v58 = vld [vmem:[#allocation3 + $0x10] sm:$0xff]  ;;  %v876_v12 = vld [vmem:[#allocation3 + $0x18] sm:$0x3] }
 0x164   : > { %866 = vst.msk [vmem:[#allocation3 + $0x21] sm:$0xff] %vm234_vm0, %v837_v8  ;;  %v936_v3 = vrot.slane %v2523_v58, 2  ;;  %v937_v15 = vrot.slane %v876_v12, 2  ;;  %v912_v17 = vrot.slane %v2523_v58, 1  ;;  %v913_v28 = vrot.slane %v876_v12, 1  ;;  %v828_v12 = vpop.f32.mrf.mxu3 }
 0x165   : > { %v792_v59 = vpop.f32.mrf.mxu1 }
 0x166   : > { %v793_v0 = vadd.f32 %v792_v59, %v764_v9  ;;  %v938_v29 = vsel %vm326_vm3, %v936_v3, %v937_v15  ;;  %v2532_v57 = vsel %vm301_vm2, %v912_v17, %v913_v28  ;;  %v771_v3 = vadd.f32 %v2510_v46, %v2498_v34 }
 0x167   : > { %v1907_v33 = vpack.i.bf16 %v938_v29, %v935_v5  ;;  %v1902_v30 = vpack.i.bf16 %v2532_v57, %v911_v14  ;;  %v774_v34 = vadd.f32 %v2510_v46, %v2500_v16 }
 0x168   : > { %v822_v49 = vadd.f32 %v821_v20, %v793_v0 }
 0x169   : > { %1908 = vrot.lane.b32.xlu1 %v1907_v33, %s2034_s25  ;;  %1903 = vrot.lane.b32.xlu0 %v1902_v30, %s2033_s24 }
 0x16a   : > { %v838_v35 = vmax.f32 %v822_v49, 0.0 }
 0x16b   : > { %v2537_v13 = vld [vmem:[#allocation3 + $0x20] sm:$0xff]  ;;  %v878_v36 = vld [vmem:[#allocation3 + $0x28] sm:$0x3] }
 0x16c   : > { %867 = vst.msk [vmem:[#allocation3 + $0x31] sm:$0xff] %vm234_vm0, %v838_v35  ;;  %v1912_v38 = vpack.i.bf16 %v2537_v13, %v2523_v58  ;;  %v939_v42 = vrot.slane %v2537_v13, 2  ;;  %v940_v43 = vrot.slane %v878_v36, 2  ;;  %v915_v4 = vrot.slane %v2537_v13, 1 }
 0x16d   : > { %v794_v18 = vpop.f32.mrf.mxu1  ;;  %v916_v55 = vrot.slane %v878_v36, 1 }
 0x16e   : > { %v795_v19 = vadd.f32 %v794_v18, %v766_v37  ;;  %1913 = vrot.lane.b32.xlu2 %v1912_v38, %s2035_s26  ;;  %v941_v44 = vsel %vm326_vm3, %v939_v42, %v940_v43 }
 0x16f   : > { %v1917_v45 = vpack.i.bf16 %v941_v44, %v938_v29  ;;  %v2560_v62 = vsel %vm301_vm2, %v915_v4, %v916_v55  ;;  %v1749_v55 = vld [vmem:[%s2818_s3 + $0x38] sm:$0xff] }
 0x170   : > { %v824_v47 = vadd.f32 %v823_v10, %v795_v19  ;;  %v831_v19 = vpop.f32.mrf.mxu3  ;;  %1353 = vmatpush.bf16.msrb.mxu3 %v1749_v55 }
 0x171   : > { %1918 = vrot.lane.b32.xlu0 %v1917_v45, %s2033_s24 }
 0x172   : > { %v839_v48 = vmax.f32 %v824_v47, 0.0 }
 0x173   : > { %v2549_v53 = vld [vmem:[#allocation3 + $0x30] sm:$0xff]  ;;  %v880_v54 = vld [vmem:[#allocation3 + $0x38] sm:$0x3] }
 0x174   : > { %868 = vst.msk [vmem:[#allocation3 + $0x41] sm:$0xff] %vm234_vm0, %v839_v48  ;;  %v1922_v63 = vpack.i.bf16 %v2549_v53, %v2537_v13  ;;  %v942_v39 = vrot.slane %v2549_v53, 2  ;;  %v943_v40 = vrot.slane %v880_v54, 2  ;;  %v918_v6 = vrot.slane %v2549_v53, 1 }
 0x175   : > { %v797_v60 = vpop.f32.mrf.mxu1  ;;  %v919_v11 = vrot.slane %v880_v54, 1 }
 0x176   : > { %v798_v27 = vadd.f32 %v797_v60, %v769_v52  ;;  %1923 = vrot.lane.b32.xlu1 %v1922_v63, %s2034_s25  ;;  %v944_v41 = vsel %vm326_vm3, %v942_v39, %v943_v40  ;;  %v776_v40 = vadd.f32 %v2510_v46, %v2502_v50 }
 0x177   : > { %v1183_v61 = vpack.c.bf16 %v944_v41, %v941_v44  ;;  %v2563_v7 = vsel %vm301_vm2, %v918_v6, %v919_v11  ;;  %v1937_v15 = vpack.i.bf16 %v944_v41, %v941_v44 }
 0x178   : > { %v827_v32 = vadd.f32 %v826_v31, %v798_v27  ;;  %v1927_v8 = vpack.i.bf16 %v2563_v7, %v2560_v62  ;;  %v1748_v27 = vld [vmem:[%s2818_s3 + $0x30] sm:$0xff] }
 0x179   : > { %1716 = vmatmul.msk.bf16.vlgmr.msrb.gmra.mxu0 %vm234_vm0, %v1183_v61  ;;  %1354 = vmatpush.bf16.msrb.mxu3 %v1748_v27 }
 0x17a   : > { %v840_v9 = vmax.f32 %v827_v32, 0.0  ;;  %1928 = vrot.lane.b32.xlu2 %v1927_v8, %s2035_s26  ;;  %1933 = vrot.lane.b32.xlu0 %v1927_v8, %s2033_s24  ;;  %v833_v8 = vpop.f32.mrf.mxu3 }
 0x17b   : > { %v2570_v5 = vld [vmem:[#allocation3 + $0x40] sm:$0xff]  ;;  %v882_v14 = vld [vmem:[#allocation3 + $0x48] sm:$0x3] }
 0x17c   : > { %869 = vst.msk [vmem:[#allocation3 + $0x51] sm:$0xff] %vm234_vm0, %v840_v9  ;;  %v945_v17 = vrot.slane %v2570_v5, 2  ;;  %v946_v28 = vrot.slane %v882_v14, 2  ;;  %v1942_v30 = vpack.i.bf16 %v2570_v5, %v2549_v53  ;;  %v921_v36 = vrot.slane %v2570_v5, 1 }
 0x17d   : > { %v799_v20 = vpop.f32.mrf.mxu1  ;;  %v922_v37 = vrot.slane %v882_v14, 1 }
 0x17e   : > { %v800_v59 = vadd.f32 %v799_v20, %v771_v3  ;;  %1938 = vrot.lane.b32.xlu1 %v1937_v15, %s2034_s25  ;;  %v947_v0 = vsel %vm326_vm3, %v945_v17, %v946_v28 }
 0x17f   : > { %v1947_v29 = vpack.i.bf16 %v947_v0, %v944_v41  ;;  %v2595_v31 = vsel %vm301_vm2, %v921_v36, %v922_v37 }
 0x180   : > { %v829_v33 = vadd.f32 %v828_v12, %v800_v59 }
 0x182   : > { %v841_v49 = vmax.f32 %v829_v33, 0.0  ;;  %1943 = vrot.lane.b32.xlu2 %v1942_v30, %s2035_s26  ;;  %1948 = vrot.lane.b32.xlu0 %v1947_v29, %s2033_s24 }
 0x183   : > { %v2584_v51 = vld [vmem:[#allocation3 + $0x50] sm:$0xff]  ;;  %v884_v35 = vld [vmem:[#allocation3 + $0x58] sm:$0x3] }
 0x184   : > { %870 = vst.msk [vmem:[#allocation3 + $0x61] sm:$0xff] %vm234_vm0, %v841_v49  ;;  %v1952_v38 = vpack.i.bf16 %v2584_v51, %v2570_v5  ;;  %v948_v42 = vrot.slane %v2584_v51, 2  ;;  %v949_v43 = vrot.slane %v884_v35, 2  ;;  %v924_v18 = vrot.slane %v2584_v51, 1 }
 0x185   : > { %v802_v44 = vpop.f32.mrf.mxu1  ;;  %v925_v10 = vrot.slane %v884_v35, 1 }
 0x186   : > { %v803_v16 = vadd.f32 %v802_v44, %v774_v34  ;;  %1953 = vrot.lane.b32.xlu1 %v1952_v38, %s2034_s25  ;;  %v950_v45 = vsel %vm326_vm3, %v948_v42, %v949_v43 }
 0x187   : > { %v1186_v47 = vpack.c.bf16 %v950_v45, %v947_v0  ;;  %v2598_v48 = vsel %vm301_vm2, %v924_v18, %v925_v10  ;;  %v1967_v6 = vpack.i.bf16 %v950_v45, %v947_v0  ;;  %v891_v18 = vld [vmem:[#allocation3 + $0x90] sm:$0xff] }
 0x188   : > { %v832_v52 = vadd.f32 %v831_v19, %v803_v16  ;;  %v1957_v54 = vpack.i.bf16 %v2598_v48, %v2595_v31  ;;  %v892_v19 = vld [vmem:[#allocation3 + $0x98] sm:$0x3] }
 0x189   : > { %1717 = vmatmul.msk.bf16.gmra.mxu0 %vm234_vm0, %v1186_v47  ;;  %v979_v47 = vrot.slane %v892_v19, 2  ;;  %v976_v55 = vrot.slane %v892_v19, 1 }
 0x18a   : > { %v842_v4 = vmax.f32 %v832_v52, 0.0  ;;  %1958 = vrot.lane.b32.xlu2 %v1957_v54, %s2035_s26  ;;  %1963 = vrot.lane.b32.xlu0 %v1957_v54, %s2033_s24  ;;  %v975_v52 = vrot.slane %v891_v18, 1 }
 0x18b   : > { %v2608_v63 = vld [vmem:[#allocation3 + $0x60] sm:$0xff]  ;;  %v886_v39 = vld [vmem:[#allocation3 + $0x68] sm:$0x3] }
 0x18c   : > { %871 = vst.msk [vmem:[#allocation3 + $0x71] sm:$0xff] %vm234_vm0, %v842_v4  ;;  %v951_v60 = vrot.slane %v2608_v63, 2  ;;  %v952_v11 = vrot.slane %v886_v39, 2  ;;  %v1972_v46 = vpack.i.bf16 %v2608_v63, %v2584_v51  ;;  %v927_v15 = vrot.slane %v2608_v63, 1 }
 0x18d   : > { %v804_v41 = vpop.f32.mrf.mxu1  ;;  %v928_v17 = vrot.slane %v886_v39, 1 }
 0x18e   : > { %v805_v61 = vadd.f32 %v804_v41, %v776_v40  ;;  %1968 = vrot.lane.b32.xlu1 %v1967_v6, %s2034_s25  ;;  %v953_v32 = vsel %vm326_vm3, %v951_v60, %v952_v11  ;;  %v977_v60 = vsel %vm301_vm2, %v975_v52, %v976_v55  ;;  %v1747_v41 = vld [vmem:[%s2818_s3 + $0x28] sm:$0xff] }
 0x18f   : > { %v1977_v9 = vpack.i.bf16 %v953_v32, %v950_v45  ;;  %v2634_v49 = vsel %vm301_vm2, %v927_v15, %v928_v17  ;;  %v978_v45 = vrot.slane %v891_v18, 2  ;;  %1355 = vmatpush.bf16.msrb.mxu3 %v1747_v41  ;;  %v1753_v15 = vld [vmem:[%s2818_s3 + $0x58] sm:$0xff]  ;;  %v1742_v17 = vld [vmem:[%s2818_s3] sm:$0xff] }
 0x190   : > { %v834_v50 = vadd.f32 %v833_v8, %v805_v61  ;;  %v1757_v61 = vld [vmem:[%s2818_s3 + $0x78] sm:$0xff]  ;;  %v1756_v8 = vld [vmem:[%s2818_s3 + $0x70] sm:$0xff] }
 0x191   : > { %v980_v40 = vsel %vm326_vm3, %v978_v45, %v979_v47  ;;  %1382 = vmatpush.bf16.msrb.mxu2 %v1757_v61 }
 0x192   : > { %v843_v12 = vmax.f32 %v834_v50, 0.0  ;;  %1973 = vrot.lane.b32.xlu2 %v1972_v46, %s2035_s26  ;;  %1978 = vrot.lane.b32.xlu0 %v1977_v9, %s2033_s24  ;;  %v1745_v9 = vld [vmem:[%s2818_s3 + $0x18] sm:$0xff]  ;;  %v1755_v50 = vld [vmem:[%s2818_s3 + $0x68] sm:$0xff] }
 0x193   : > { %v2623_v14 = vld [vmem:[#allocation3 + $0x70] sm:$0xff]  ;;  %v888_v3 = vld [vmem:[#allocation3 + $0x78] sm:$0x3] }
 0x194   : > { %872 = vst.msk [vmem:[#allocation3 + $0x81] sm:$0xff] %vm234_vm0, %v843_v12  ;;  %v1982_v28 = vpack.i.bf16 %v2623_v14, %v2608_v63  ;;  %v954_v20 = vrot.slane %v2623_v14, 2  ;;  %v955_v59 = vrot.slane %v888_v3, 2  ;;  %v930_v0 = vrot.slane %v2623_v14, 1  ;;  %v1744_v46 = vld [vmem:[%s2818_s3 + $0x10] sm:$0xff]  ;;  %v1754_v12 = vld [vmem:[%s2818_s3 + $0x60] sm:$0xff] }
 0x195   : > { %v931_v29 = vrot.slane %v888_v3, 1  ;;  %1383 = vmatpush.bf16.msrb.mxu2 %v1756_v8  ;;  %v1743_v3 = vld [vmem:[%s2818_s3 + $0x8] sm:$0xff] }
 0x196   : > { %1983 = vrot.lane.b32.xlu1 %v1982_v28, %s2034_s25  ;;  %v956_v33 = vsel %vm326_vm3, %v954_v20, %v955_v59  ;;  %v1752_v28 = vld [vmem:[%s2818_s3 + $0x50] sm:$0xff]  ;;  %v1751_v20 = vld [vmem:[%s2818_s3 + $0x48] sm:$0xff]  ;;  %v1750_v59 = vld [vmem:[%s2818_s3 + $0x40] sm:$0xff] }
 0x197   : > { %v1189_v30 = vpack.c.bf16 %v956_v33, %v953_v32  ;;  %v2637_v34 = vsel %vm301_vm2, %v930_v0, %v931_v29  ;;  %v1997_v38 = vpack.i.bf16 %v956_v33, %v953_v32  ;;  %v1746_v32 = vld [vmem:[%s2818_s3 + $0x20] sm:$0xff] }
 0x198   : > { %v1987_v35 = vpack.i.bf16 %v2637_v34, %v2634_v49  ;;  %1356 = vmatpush.bf16.msrb.mxu3 %v1746_v32 }
 0x199   : > { %1718 = vmatmul.msk.bf16.gmra.mxu0 %vm234_vm0, %v1189_v30  ;;  %1384 = vmatpush.bf16.msrb.mxu2 %v1755_v50 }
 0x19a   : > { %1988 = vrot.lane.b32.xlu2 %v1987_v35, %s2035_s26  ;;  %1993 = vrot.lane.b32.xlu0 %v1987_v35, %s2033_s24 }
 0x19b   : > { %v889_v36 = vld [vmem:[#allocation3 + $0x80] sm:$0xff]  ;;  %v890_v37 = vld [vmem:[#allocation3 + $0x88] sm:$0x3] }
 0x19c   : > { %v970_v42 = vrot.slane %v889_v36, 2  ;;  %v971_v43 = vrot.slane %v890_v37, 2  ;;  %v2002_v16 = vpack.i.bf16 %v889_v36, %v2623_v14  ;;  %v959_v54 = vrot.slane %v889_v36, 1  ;;  %1357 = vmatpush.bf16.msrb.mxu3 %v1745_v9 }
 0x19d   : > { %v960_v4 = vrot.slane %v890_v37, 1  ;;  %v2012_v39 = vpack.i.bf16 %v891_v18, %v889_v36  ;;  %1385 = vmatpush.bf16.msrb.mxu2 %v1754_v12 }
 0x19e   : > { %1998 = vrot.lane.b32.xlu1 %v1997_v38, %s2034_s25  ;;  %v972_v44 = vsel %vm326_vm3, %v970_v42, %v971_v43 }
 0x19f   : > { %v2007_v10 = vpack.i.bf16 %v972_v44, %v956_v33  ;;  %v2651_v6 = vsel %vm301_vm2, %v959_v54, %v960_v4  ;;  %v1192_v11 = vpack.c.bf16 %v980_v40, %v972_v44 }
 0x1a0   : > { %v2017_v27 = vpack.i.bf16 %v977_v60, %v2651_v6  ;;  %1358 = vmatpush.bf16.msrb.mxu3 %v1744_v46 }
 0x1a1   : > { %1386 = vmatpush.bf16.msrb.mxu2 %v1753_v15 }
 0x1a2   : > { %2003 = vrot.lane.b32.xlu2 %v2002_v16, %s2035_s26  ;;  %2008 = vrot.lane.b32.xlu0 %v2007_v10, %s2033_s24 }
 0x1a4   : > { %1359 = vmatpush.bf16.msrb.mxu3 %v1743_v3 }
 0x1a5   : > { %1387 = vmatpush.bf16.msrb.mxu2 %v1752_v28 }
 0x1a6   : > { %2013 = vrot.lane.b32.xlu1 %v2012_v39, %s2034_s25 }
 0x1a8   : > { %1360 = vmatpush.bf16.msrb.mxu3 %v1742_v17 }
 0x1a9   : > { %1719 = vmatmul.msk.bf16.gmra.mxu0 %vm234_vm0, %v1192_v11  ;;  %1388 = vmatpush.bf16.msrb.mxu2 %v1751_v20 }
 0x1aa   : > { %2018 = vrot.lane.b32.xlu2 %v2017_v27, %s2035_s26 }
 0x1ad   : > { %1389 = vmatpush.bf16.msrb.mxu2 %v1750_v59 }
 0x1c8   : > { %v1914_v0 = vpop.permute.xlu2 %1913 }
 0x1c9   : > { %v1916_v42 = vunpack.i.h.bf16 %v1914_v0  ;;  %v1915_v43 = vunpack.i.l.bf16 %v1914_v0 }
 0x1d4   : > { %v1929_v29 = vpop.permute.xlu2 %1928 }
 0x1d5   : > { %v1931_v60 = vunpack.i.h.bf16 %v1929_v29  ;;  %v1930_v11 = vunpack.i.l.bf16 %v1929_v29 }
 0x1db   : > { %v1909_v33 = vpop.permute.xlu1 %1908  ;;  %v1904_v30 = vpop.permute.xlu0 %1903 }
 0x1dc   : > { %v1911_v35 = vunpack.i.h.bf16 %v1909_v33  ;;  %v1910_v36 = vunpack.i.l.bf16 %v1909_v33  ;;  %v1906_v37 = vunpack.i.h.bf16 %v1904_v30  ;;  %v1905_v38 = vunpack.i.l.bf16 %v1904_v30  ;;  %v1944_v54 = vpop.permute.xlu2 %1943 }
 0x1dd   : > { %v1946_v28 = vunpack.i.h.bf16 %v1944_v54  ;;  %v1945_v20 = vunpack.i.l.bf16 %v1944_v54 }
 0x1de   : > { %v1134_v18 = vsel %vm234_vm0, %v2523_v58, %v1906_v37  ;;  %v1133_v19 = vsel %vm234_vm0, %v2518_v56, %v1905_v38 }
 0x1df   : > { %v1141_v44 = vsel %vm535_vm4, %v1133_v19, %v1910_v36  ;;  %v1142_v10 = vsel %vm535_vm4, %v1134_v18, %v1911_v35 }
 0x1e0   : > { %v1149_v16 = vsel %vm544_vm5, %v1141_v44, %v1915_v43  ;;  %v1150_v45 = vsel %vm544_vm5, %v1142_v10, %v1916_v42 }
 0x1e1   : > { %v1181_v47 = vpack.c.bf16 %v1150_v45, %v1149_v16 }
 0x1e3   : > { %v1919_v52 = vpop.permute.xlu0 %1918  ;;  %1361 = vmatmul.bf16.vlgmr.msrb.gmra.mxu3 %v1181_v47 }
 0x1e4   : > { %v1921_v4 = vunpack.i.h.bf16 %v1919_v52  ;;  %v1920_v55 = vunpack.i.l.bf16 %v1919_v52  ;;  %v1959_v3 = vpop.permute.xlu2 %1958 }
 0x1e5   : > { %v1961_v19 = vunpack.i.h.bf16 %v1959_v3  ;;  %v1960_v44 = vunpack.i.l.bf16 %v1959_v3 }
 0x1e6   : > { %v1158_v56 = vsel %vm234_vm0, %v2560_v62, %v1921_v4  ;;  %v1157_v27 = vsel %vm234_vm0, %v2532_v57, %v1920_v55 }
 0x1e8   : > { %v1924_v39 = vpop.permute.xlu1 %1923 }
 0x1e9   : > { %v1926_v40 = vunpack.i.h.bf16 %v1924_v39  ;;  %v1925_v58 = vunpack.i.l.bf16 %v1924_v39 }
 0x1eb   : > { %v1165_v41 = vsel %vm535_vm4, %v1157_v27, %v1925_v58  ;;  %v1166_v61 = vsel %vm535_vm4, %v1158_v56, %v1926_v40 }
 0x1ec   : > { %v1934_v32 = vpop.permute.xlu0 %1933  ;;  %v1173_v8 = vsel %vm544_vm5, %v1165_v41, %v1930_v11  ;;  %v1174_v9 = vsel %vm544_vm5, %v1166_v61, %v1931_v60  ;;  %v1974_v43 = vpop.permute.xlu2 %1973 }
 0x1ed   : > { %v1936_v50 = vunpack.i.h.bf16 %v1934_v32  ;;  %v1935_v46 = vunpack.i.l.bf16 %v1934_v32  ;;  %v1182_v12 = vpack.c.bf16 %v1174_v9, %v1173_v8  ;;  %v1975_v11 = vunpack.i.l.bf16 %v1974_v43 }
 0x1ef   : > { %1390 = vmatmul.bf16.vlgmr.msrb.gmra.mxu2 %v1182_v12  ;;  %v1136_v57 = vsel %vm234_vm0, %v2549_v53, %v1936_v50  ;;  %v1135_v59 = vsel %vm234_vm0, %v2537_v13, %v1935_v46 }
 0x1f0   : > { %v1939_v15 = vpop.permute.xlu1 %1938 }
 0x1f1   : > { %v1941_v17 = vunpack.i.h.bf16 %v1939_v15  ;;  %v1940_v62 = vunpack.i.l.bf16 %v1939_v15 }
 0x1f3   : > { %v1143_v0 = vsel %vm535_vm4, %v1135_v59, %v1940_v62  ;;  %v1144_v29 = vsel %vm535_vm4, %v1136_v57, %v1941_v17 }
 0x1f4   : > { %v1949_v33 = vpop.permute.xlu0 %1948  ;;  %v1151_v30 = vsel %vm544_vm5, %v1143_v0, %v1945_v20  ;;  %v1152_v35 = vsel %vm544_vm5, %v1144_v29, %v1946_v28  ;;  %v1989_v27 = vpop.permute.xlu2 %1988 }
 0x1f5   : > { %v1951_v36 = vunpack.i.h.bf16 %v1949_v33  ;;  %v1950_v37 = vunpack.i.l.bf16 %v1949_v33  ;;  %v1184_v38 = vpack.c.bf16 %v1152_v35, %v1151_v30  ;;  %v1991_v17 = vunpack.i.h.bf16 %v1989_v27 }
 0x1f6   : > { %v1990_v62 = vunpack.i.l.bf16 %v1989_v27 }
 0x1f7   : > { %1366 = vmatmul.bf16.gmra.mxu3 %v1184_v38  ;;  %v1160_v13 = vsel %vm234_vm0, %v2595_v31, %v1951_v36  ;;  %v1159_v10 = vsel %vm234_vm0, %v2563_v7, %v1950_v37  ;;  %v1976_v31 = vunpack.i.h.bf16 %v1974_v43 }
 0x1f8   : > { %v1954_v42 = vpop.permute.xlu1 %1953 }
 0x1f9   : > { %v1956_v18 = vunpack.i.h.bf16 %v1954_v42  ;;  %v1955_v53 = vunpack.i.l.bf16 %v1954_v42 }
 0x1fb   : > { %v1167_v16 = vsel %vm535_vm4, %v1159_v10, %v1955_v53  ;;  %v1168_v45 = vsel %vm535_vm4, %v1160_v13, %v1956_v18 }
 0x1fc   : > { %v1964_v47 = vpop.permute.xlu0 %1963  ;;  %v1175_v52 = vsel %vm544_vm5, %v1167_v16, %v1960_v44  ;;  %v1176_v54 = vsel %vm544_vm5, %v1168_v45, %v1961_v19  ;;  %v2004_v33 = vpop.permute.xlu2 %2003 }
 0x1fd   : > { %v1966_v4 = vunpack.i.h.bf16 %v1964_v47  ;;  %v1965_v55 = vunpack.i.l.bf16 %v1964_v47  ;;  %v1185_v39 = vpack.c.bf16 %v1176_v54, %v1175_v52  ;;  %v2006_v42 = vunpack.i.h.bf16 %v2004_v33 }
 0x1fe   : > { %v2005_v43 = vunpack.i.l.bf16 %v2004_v33 }
 0x1ff   : > { %1395 = vmatmul.bf16.gmra.mxu2 %v1185_v39  ;;  %v1138_v7 = vsel %vm234_vm0, %v2584_v51, %v1966_v4  ;;  %v1137_v56 = vsel %vm234_vm0, %v2570_v5, %v1965_v55 }
 0x200   : > { %v1969_v40 = vpop.permute.xlu1 %1968 }
 0x201   : > { %v1971_v58 = vunpack.i.h.bf16 %v1969_v40  ;;  %v1970_v60 = vunpack.i.l.bf16 %v1969_v40 }
 0x203   : > { %v1145_v41 = vsel %vm535_vm4, %v1137_v56, %v1970_v60  ;;  %v1146_v61 = vsel %vm535_vm4, %v1138_v7, %v1971_v58  ;;  %v1420_v56 = vpop.f32.mrf.mxu0 }
 0x204   : > { %v1979_v32 = vpop.permute.xlu0 %1978  ;;  %v1153_v8 = vsel %vm544_vm5, %v1145_v41, %v1975_v11  ;;  %v1154_v9 = vsel %vm544_vm5, %v1146_v61, %v1976_v31  ;;  %v2019_v52 = vpop.permute.xlu2 %2018  ;;  %v2023_v41 = vld [vmem:[%s2819_s4] ss:$0 sm:$0xff] }
 0x205   : > { %v1981_v50 = vunpack.i.h.bf16 %v1979_v32  ;;  %v1980_v46 = vunpack.i.l.bf16 %v1979_v32  ;;  %v1187_v12 = vpack.c.bf16 %v1154_v9, %v1153_v8  ;;  %v2021_v55 = vunpack.i.h.bf16 %v2019_v52 }
 0x206   : > { %v2020_v39 = vunpack.i.l.bf16 %v2019_v52 }
 0x207   : > { %1371 = vmatmul.bf16.gmra.mxu3 %v1187_v12  ;;  %v1162_v5 = vsel %vm234_vm0, %v2634_v49, %v1981_v50  ;;  %v1161_v28 = vsel %vm234_vm0, %v2598_v48, %v1980_v46 }
 0x208   : > { %v1984_v3 = vpop.permute.xlu1 %1983 }
 0x209   : > { %v1986_v15 = vunpack.i.h.bf16 %v1984_v3  ;;  %v1985_v51 = vunpack.i.l.bf16 %v1984_v3 }
 0x20b   : > { %v1169_v20 = vsel %vm535_vm4, %v1161_v28, %v1985_v51  ;;  %v1170_v57 = vsel %vm535_vm4, %v1162_v5, %v1986_v15 }
 0x20c   : > { %v1994_v59 = vpop.permute.xlu0 %1993  ;;  %v1177_v0 = vsel %vm544_vm5, %v1169_v20, %v1990_v62  ;;  %v1178_v29 = vsel %vm544_vm5, %v1170_v57, %v1991_v17 }
 0x20d   : > { %v1188_v30 = vpack.c.bf16 %v1178_v29, %v1177_v0  ;;  %v1996_v35 = vunpack.i.h.bf16 %v1994_v59  ;;  %v1995_v36 = vunpack.i.l.bf16 %v1994_v59 }
 0x20f   : > { %1400 = vmatmul.bf16.gmra.mxu2 %v1188_v30  ;;  %v1140_v48 = vsel %vm234_vm0, %v2623_v14, %v1996_v35  ;;  %v1139_v18 = vsel %vm234_vm0, %v2608_v63, %v1995_v36 }
 0x210   : > { %v1999_v37 = vpop.permute.xlu1 %1998 }
 0x211   : > { %v2001_v38 = vunpack.i.h.bf16 %v1999_v37  ;;  %v2000_v49 = vunpack.i.l.bf16 %v1999_v37 }
 0x213   : > { %v1147_v53 = vsel %vm535_vm4, %v1139_v18, %v2000_v49  ;;  %v1148_v19 = vsel %vm535_vm4, %v1140_v48, %v2001_v38 }
 0x214   : > { %v2009_v44 = vpop.permute.xlu0 %2008  ;;  %v1155_v13 = vsel %vm544_vm5, %v1147_v53, %v2005_v43  ;;  %v1156_v10 = vsel %vm544_vm5, %v1148_v19, %v2006_v42 }
 0x215   : > { %v1190_v16 = vpack.c.bf16 %v1156_v10, %v1155_v13  ;;  %v2011_v45 = vunpack.i.h.bf16 %v2009_v44  ;;  %v2010_v47 = vunpack.i.l.bf16 %v2009_v44 }
 0x217   : > { %1376 = vmatmul.bf16.gmra.mxu3 %v1190_v16  ;;  %v1164_v63 = vsel %vm234_vm0, %v2651_v6, %v2011_v45  ;;  %v1163_v40 = vsel %vm234_vm0, %v2637_v34, %v2010_v47  ;;  %v1422_v6 = vpop.f32.mrf.mxu0 }
 0x218   : > { %v2014_v54 = vpop.permute.xlu1 %2013 }
 0x219   : > { %v2016_v4 = vunpack.i.h.bf16 %v2014_v54  ;;  %v2015_v14 = vunpack.i.l.bf16 %v2014_v54 }
 0x21b   : > { %v1171_v58 = vsel %vm535_vm4, %v1163_v40, %v2015_v14  ;;  %v1172_v60 = vsel %vm535_vm4, %v1164_v63, %v2016_v4 }
 0x21c   : > { %v1179_v31 = vsel %vm544_vm5, %v1171_v58, %v2020_v39  ;;  %v1180_v11 = vsel %vm544_vm5, %v1172_v60, %v2021_v55 }
 0x21d   : > { %v1191_v7 = vpack.c.bf16 %v1180_v11, %v1179_v31 }
 0x21f   : > { %1405 = vmatmul.bf16.gmra.mxu2 %v1191_v7  ;;  %v1425_v46 = vpop.f32.mrf.mxu0 }
 0x227   : > { %v1427_v29 = vpop.f32.mrf.mxu0 }
 0x22f   : > { %v1430_v43 = vpop.f32.mrf.mxu0 }
 0x237   : > { %v1432_v45 = vpop.f32.mrf.mxu0 }
 0x23f   : > { %v1435_v58 = vpop.f32.mrf.mxu0 }
 0x266   : > { %v1362_v27 = vpop.f32.mrf.mxu3 }
 0x267   : > { %v1363_v61 = vadd.f32 %v2023_v41, %v1362_v27 }
 0x26e   : > { %v1364_v32 = vpop.f32.mrf.mxu3 }
 0x26f   : > { %v1365_v12 = vadd.f32 %v2023_v41, %v1364_v32 }
 0x272   : > { %v1391_v34 = vpop.f32.mrf.mxu2 }
 0x273   : > { %v1392_v8 = vadd.f32 %v1391_v34, %v1363_v61  ;;  %v1437_v34 = vpop.f32.mrf.mxu0 }
 0x275   : > { %v1421_v9 = vadd.f32 %v1420_v56, %v1392_v8 }
 0x277   : > { %v1440_v50 = vadd.f32 %v1421_v9, %v2210_v23 }
 0x279   : > { %v1448_v3 = vmax.f32 %v1440_v50, 0.0 }
 0x27a   : > { %v1367_v15 = vpop.f32.mrf.mxu3  ;;  %v1393_v51 = vpop.f32.mrf.mxu2 }
 0x27b   : > { %v1394_v17 = vadd.f32 %v1393_v51, %v1365_v12  ;;  %1464 = vrot.lane.b32.xlu0 %v1448_v3, %s2033_s24  ;;  %v1368_v28 = vadd.f32 %v2023_v41, %v1367_v15 }
 0x27d   : > { %v1423_v62 = vadd.f32 %v1422_v6, %v1394_v17 }
 0x27f   : > { %v1441_v5 = vadd.f32 %v1423_v62, %v2215_v24 }
 0x281   : > { %v1449_v20 = vmax.f32 %v1441_v5, 0.0 }
 0x282   : > { %v1369_v57 = vpop.f32.mrf.mxu3  ;;  %v1396_v59 = vpop.f32.mrf.mxu2 }
 0x283   : > { %v1397_v0 = vadd.f32 %v1396_v59, %v1368_v28  ;;  %1466 = vrot.lane.b32.xlu1 %v1449_v20, %s2033_s24  ;;  %v1370_v35 = vadd.f32 %v2023_v41, %v1369_v57 }
 0x285   : > { %v1426_v33 = vadd.f32 %v1425_v46, %v1397_v0 }
 0x287   : > { %v1442_v30 = vadd.f32 %v1426_v33, %v2220_v25 }
 0x289   : > { %v1450_v36 = vmax.f32 %v1442_v30, 0.0 }
 0x28a   : > { %v1372_v37 = vpop.f32.mrf.mxu3  ;;  %v1398_v38 = vpop.f32.mrf.mxu2 }
 0x28b   : > { %v1399_v49 = vadd.f32 %v1398_v38, %v1370_v35  ;;  %1468 = vrot.lane.b32.xlu2 %v1450_v36, %s2033_s24  ;;  %v1373_v18 = vadd.f32 %v2023_v41, %v1372_v37 }
 0x28d   : > { %v1428_v42 = vadd.f32 %v1427_v29, %v1399_v49 }
 0x28f   : > { %v1443_v48 = vadd.f32 %v1428_v42, %v2095_v1 }
 0x291   : > { %v1451_v53 = vmax.f32 %v1443_v48, 0.0 }
 0x292   : > { %v1374_v19 = vpop.f32.mrf.mxu3  ;;  %v1401_v44 = vpop.f32.mrf.mxu2 }
 0x293   : > { %v1402_v13 = vadd.f32 %v1401_v44, %v1373_v18  ;;  %1470 = vrot.lane.b32.xlu0 %v1451_v53, %s2033_s24  ;;  %v1375_v47 = vadd.f32 %v2023_v41, %v1374_v19 }
 0x295   : > { %v1431_v10 = vadd.f32 %v1430_v43, %v1402_v13 }
 0x297   : > { %v1444_v16 = vadd.f32 %v1431_v10, %v2098_v2 }
 0x299   : > { %v1452_v52 = vmax.f32 %v1444_v16, 0.0 }
 0x29a   : > { %v1403_v54 = vpop.f32.mrf.mxu2  ;;  %v1377_v14 = vpop.f32.mrf.mxu3 }
 0x29b   : > { %v1404_v4 = vadd.f32 %v1403_v54, %v1375_v47  ;;  %1472 = vrot.lane.b32.xlu1 %v1452_v52, %s2033_s24  ;;  %v1378_v63 = vadd.f32 %v2023_v41, %v1377_v14 }
 0x29d   : > { %v1433_v55 = vadd.f32 %v1432_v45, %v1404_v4 }
 0x29f   : > { %v1445_v39 = vadd.f32 %v1433_v55, %v2200_v21 }
 0x2a1   : > { %v1453_v40 = vmax.f32 %v1445_v39, 0.0 }
 0x2a2   : > { %v1406_v60 = vpop.f32.mrf.mxu2  ;;  %v1379_v7 = vpop.f32.mrf.mxu3 }
 0x2a3   : > { %v1407_v31 = vadd.f32 %v1406_v60, %v1378_v63  ;;  %1474 = vrot.lane.b32.xlu2 %v1453_v40, %s2033_s24  ;;  %v1380_v27 = vadd.f32 %v2023_v41, %v1379_v7 }
 0x2a5   : > { %v1436_v11 = vadd.f32 %v1435_v58, %v1407_v31 }
 0x2a7   : > { %v1446_v56 = vadd.f32 %v1436_v11, %v2205_v22 }
 0x2a9   : > { %v1454_v6 = vmax.f32 %v1446_v56, 0.0 }
 0x2aa   : > { %v1408_v61 = vpop.f32.mrf.mxu2 }
 0x2ab   : > { %v1409_v32 = vadd.f32 %v1408_v61, %v1380_v27  ;;  %1476 = vrot.lane.b32.xlu0 %v1454_v6, %s2033_s24 }
 0x2ad   : > { %v1438_v8 = vadd.f32 %v1437_v34, %v1409_v32 }
 0x2af   : > { %v1447_v9 = vadd.f32 %v1438_v8, %v2225_v26 }
 0x2b1   : > { %v1455_v50 = vmax.f32 %v1447_v9, 0.0 }
 0x2b3   : > { %1478 = vrot.lane.b32.xlu1 %v1455_v50, %s2033_s24 }
 0x2e5   : > { %v1469_v46 = vpop.permute.xlu2 %1468 }
 0x2e6   : > { %v1490_v41 = vsel %vm234_vm0, %v2220_v25, %v1469_v46 }
 0x2e7   : > { %1498 = vst.msk [vmem:[%s224_s23 + $0x10] sm:$0xff] %vm535_vm4, %v1490_v41 }
 0x2ed   : > { %v1465_v12 = vpop.permute.xlu0 %1464 }
 0x2ee   : > { %v1488_v3 = vsel %vm234_vm0, %v2210_v23, %v1465_v12 }
 0x2ef   : > { %1496 = vst.msk [vmem:[%s224_s23] sm:$0xff] %vm535_vm4, %v1488_v3 }
 0x2f5   : > { %v1467_v15 = vpop.permute.xlu1 %1466 }
 0x2f6   : > { %v1489_v51 = vsel %vm234_vm0, %v2215_v24, %v1467_v15 }
 0x2f7   : > { %1497 = vst.msk [vmem:[%s224_s23 + $0x8] sm:$0xff] %vm535_vm4, %v1489_v51 }
 0x2fd   : > { %v1475_v17 = vpop.permute.xlu2 %1474 }
 0x2fe   : > { %v1493_v62 = vsel %vm234_vm0, %v2200_v21, %v1475_v17 }
 0x2ff   : > { %1501 = vst.msk [vmem:[%s224_s23 + $0x28] sm:$0xff] %vm535_vm4, %v1493_v62 }
 0x305   : > { %v1471_v25 = vpop.permute.xlu0 %1470 }
 0x306   : > { %v1491_v5 = vsel %vm234_vm0, %v2095_v1, %v1471_v25 }
 0x307   : > { %1499 = vst.msk [vmem:[%s224_s23 + $0x18] sm:$0xff] %vm535_vm4, %v1491_v5 }
 0x30d   : > { %v1473_v23 = vpop.permute.xlu1 %1472 }
 0x30e   : > { %v1492_v28 = vsel %vm234_vm0, %v2098_v2, %v1473_v23 }
 0x30f   : > { %1500 = vst.msk [vmem:[%s224_s23 + $0x20] sm:$0xff] %vm535_vm4, %v1492_v28 }
 0x31d   : > { %v1477_v24 = vpop.permute.xlu0 %1476 }
 0x31e   : > { %v1494_v20 = vsel %vm234_vm0, %v2205_v22, %v1477_v24 }
 0x31f   : > { %1502 = vst.msk [vmem:[%s224_s23 + $0x30] sm:$0xff] %vm535_vm4, %v1494_v20 }
 0x325   : > { %v1479_v21 = vpop.permute.xlu1 %1478 }
 0x326   : > { %v1495_v57 = vsel %vm234_vm0, %v2225_v26, %v1479_v21 }
 0x327   : > { %1503 = vst.msk [vmem:[%s224_s23 + $0x38] sm:$0xff] %vm535_vm4, %v1495_v57 }
 0x328 PF: > { %s15_s18 = sadd.s32 1, %s2030_s18  }
 0x329   : > { %p12_p4 = scmp.ge.s32.totalorder %s15_s18, 4  }
 0x32b   :  { %14 = sbr.rel (!%p12_p4) target bundleno = 1 (0x1), region = 72 }

// kernel: block_forward_pallas.7
= control target key start
LH: loop header
LB: loop body
LE: loop exit
PB: predicated region body
PF: predicated region fallthrough
CT: control target
= control target key end

     0   :  { %s1272_s0 = inlined_call_operand.vmem [shape: f32[2,8,8,128], index: 0, kind: input, shape index: {}]   ;;  %s1273_s1 = inlined_call_operand.vmem [shape: bf16[128,16], index: 1, kind: input, shape index: {}]   ;;  %s1274_s2 = inlined_call_operand.vmem [shape: f32[1,16], index: 2, kind: input, shape index: {}]   ;;  %s1275_s3 = inlined_call_operand.vmem [shape: f32[16,1], index: 3, kind: input, shape index: {}]   ;;  %s1276_s4 = inlined_call_operand.<no memory space> [shape: f32[1,1], index: 4, kind: input, shape index: {}]   ;;  %s1277_s5 = inlined_call_operand.vmem [shape: f32[16,1], index: 5, kind: input, shape index: {}]   ;;  %s1278_s7 = inlined_call_operand.vmem [shape: f32[16,1], index: 7, kind: input, shape index: {}]   ;;  %s1279_s9 = inlined_call_operand.vmem [shape: f32[3,16], index: 9, kind: input, shape index: {}]   ;;  %s1280_s10 = inlined_call_operand.vmem [shape: f32[1,16], index: 10, kind: input, shape index: {}]   ;;  %s1281_s11 = inlined_call_operand.hbm [shape: f32[2,8,8,16], index: 11, kind: output, shape index: {}]   ;;  %s1282_s6 = inlined_call_operand.<no memory space> [shape: f32[1,1], index: 6, kind: input, shape index: {}]   ;;  %s1283_s8 = inlined_call_operand.<no memory space> [shape: f32[1,1], index: 8, kind: input, shape index: {}]  }
   0x1   :  { %v16_v0 = vstv %s1276_s4  ;;  %v18_v1 = vstv %s1282_s6  ;;  %v20_v2 = vstv %s1283_s8 }
   0x2   :  { %17 = vst [vmem:[#allocation2] sm:$0x1] %v16_v0 }
   0x3   :  { %19 = vst [vmem:[#allocation3] sm:$0x1] %v18_v1 }
   0x4   :  { %21 = vst [vmem:[#allocation4] sm:$0x1] %v20_v2 }
   0x5   :  { %22 = vsyncpa [#allocation6], 0 }
   0x6   :  { %24 = vsyncpa [#allocation6 + $0x1], 0  ;;  %s1051_s23 = smov 0   ;;  %s1053_s24 = smov 0  }
   0x7   :  { %s1055_s25 = smov 0   ;;  %s1057_s4 = smov 0  }
   0x8 LB: > { %s1072_s6 = sadd.s32 4294967295, %s978_s4   ;;  %s806_s8 = sadd.s32 4294967294, %s978_s4   ;;  %s978_s4 = sphi %s1057_s4, %s1289_s4   ;;  %s974_s25 = sphi %s1055_s25, %s1288_s25   ;;  %s970_s24 = sphi %s1053_s24, %s1287_s24   ;;  %s966_s23 = sphi %s1051_s23, %s1286_s23  }
   0x9   : > { %s1076_s26 = sadd.s32 1, %s978_s4   ;;  %s273_s27 = sadd.s32 1, %s974_s25 }
   0xa   : > { %s270_s28 = ssub.s32 %s978_s4, %s1076_s26  ;;  %p283_p0 = scmp.ne.s32.totalorder %s974_s25, %s970_s24 }
   0xb   : > { %p271_p1 = scmp.eq.s32.totalorder %s270_s28, 0  ;;  %p284_p2 = scmp.eq.s32.totalorder %s1072_s6, 1 }
   0xc   : > { %p289_p3 = scmp.ne.s32.totalorder %s970_s24, %s966_s23  ;;  %p290_p4 = scmp.eq.s32.totalorder %s806_s8, 1 }
   0xd   : > { %s1087_s29 = scalar_select %p271_p1, %s974_s25, %s273_s27  }
   0xe   : > { %p1089_p5 = por %p284_p2, %p283_p0  ;;  %p1093_p6 = por %p290_p4, %p289_p3 }
   0xf   : > { %p809_p7 = scmp.ge.s32.totalorder %s978_s4, 1  ;;  %p346_p8 = scmp.lt.s32.totalorder %s978_s4, 3 }
  0x11   : > { %p347_p9 = pnand %p809_p7, %p346_p8 }
  0x12   : > { %p386_p10 = scmp.lt.s32.totalorder (!%p347_p9), %s1072_s6, 1  ;;  %s383_s17 = sand.u32 (!%p347_p9), 1, %s970_s24  }
  0x13   : > { %350 = sbr.rel (%p347_p9) target bundleno = 575 (0x23f), region = 64  ;;  %s869_s19 = sshll.u32 (!%p347_p9), %s1072_s6, 6 }
  0x14   : > { %s740_s22 = scalar_lea.hbm (!%p347_p9), %s1281_s11, %s869_s19  ;;  %s729_s28 = scalar_lea.sflag (!%p347_p9), [#allocation6], %s383_s17 }
  0x15   : > { %s743_s27 = sshll.u32 (!%p347_p9), %s740_s22, 4  ;;  %s744_s27 = int_to_ptr.hbm [resolvable:$true] %s743_s27 }
  0x18   : > { %v868_v3 = vld [vmem:[%s1273_s1 + $0x38] sm:$0xff]  ;;  %v867_v4 = vld [vmem:[%s1273_s1 + $0x30] sm:$0xff]  ;;  %v866_v5 = vld [vmem:[%s1273_s1 + $0x28] sm:$0xff]  ;;  %s387_s8 = scalar_select %p386_p10, %s1072_s6, 1  ;;  %vm508_vm0 = vcmask 130048   ;;  %vm612_vm1 = vcmask 1040384  }
  0x19   : > { %471 = vmatpush.bf16.msra.mxu0 %v868_v3  ;;  %v865_v6 = vld [vmem:[%s1273_s1 + $0x20] sm:$0xff]  ;;  %v864_v7 = vld [vmem:[%s1273_s1 + $0x18] sm:$0xff]  ;;  %v863_v8 = vld [vmem:[%s1273_s1 + $0x10] sm:$0xff]  ;;  %vm608_vm2 = vcmask 7168  }
  0x1a   : > { %s860_s13 = sshll.u32 %s387_s8, 6  ;;  %v862_v9 = vld [vmem:[%s1273_s1 + $0x8] sm:$0xff]  ;;  %v861_v10 = vld [vmem:[%s1273_s1] sm:$0xff] }
  0x1b   : > { %s390_s18 = scalar_lea.vmem %s1272_s0, %s860_s13  ;;  %v911_v28 = vld [vmem:[%s1274_s2] ss:$0 sm:$0xff]  ;;  %v532_v29 = vld [vmem:[%s1275_s3 + $0x8] sm:$0xff]  ;;  %s930_s13 = sshra.s32 %s744_s27, 4  ;;  %s931_s13 = int_to_ptr.hbm [resolvable:$true] %s930_s13 }
  0x1c   : > { %v391_v11 = vld [vmem:[%s390_s18] sm:$0xff]  ;;  %v392_v12 = vld [vmem:[%s390_s18 + $0x8] sm:$0xff]  ;;  %v393_v14 = vld [vmem:[%s390_s18 + $0x10] sm:$0xff]  ;;  %551 = vmatpush.msra.mxu1 %v532_v29  ;;  %s932_s14 = scalar_lea.hbm %s931_s13, 64  ;;  %p937_p0 = scmp.lt.s32.totalorder %s931_s13, %s1281_s11 }
  0x1d   : > { %472 = vmatpush.bf16.msra.mxu0 %v867_v4  ;;  %v399_v13 = vpack.c.bf16 %v392_v12, %v391_v11  ;;  %v394_v15 = vld [vmem:[%s390_s18 + $0x18] sm:$0xff]  ;;  %v395_v17 = vld [vmem:[%s390_s18 + $0x20] sm:$0xff]  ;;  %v396_v18 = vld [vmem:[%s390_s18 + $0x28] sm:$0xff]  ;;  %p933_p11 = scmp.ne.s32.totalorder %s931_s13, %s932_s14 }
  0x1e   : > { %v400_v16 = vpack.c.bf16 %v394_v15, %v393_v14  ;;  %v401_v19 = vpack.c.bf16 %v396_v18, %v395_v17  ;;  %v397_v20 = vld [vmem:[%s390_s18 + $0x30] sm:$0xff]  ;;  %v398_v21 = vld [vmem:[%s390_s18 + $0x38] sm:$0xff]  ;;  %v559_v30 = vld [vmem:[%s1277_s5 + $0x8] sm:$0xff]  ;;  %s810_s18 = sshll.u32 %s383_s17, 6 }
  0x1f   : > { %v402_v22 = vpack.c.bf16 %v398_v21, %v397_v20  ;;  %v583_v31 = vld [vmem:[%s1278_s7 + $0x8] sm:$0xff]  ;;  %575 = vmatpush.msra.mxu2 %v559_v30  ;;  %v531_v32 = vld [vmem:[%s1275_s3] sm:$0xff]  ;;  %s385_s6 = scalar_lea.vmem [#allocation5], %s810_s18  ;;  %p934_p12 = pnand %p933_p11, %p1089_p5 }
  0x20   : > { %v558_v33 = vld [vmem:[%s1277_s5] sm:$0xff]  ;;  %599 = vmatpush.msra.mxu3 %v583_v31  ;;  %552 = vmatpush.msra.mxu1 %v531_v32  ;;  %s741_s8 = sshll.u32 %s385_s6, 4  ;;  %s936_s18 = scalar_lea.hbm %s1281_s11, 128  ;;  %s742_s8 = int_to_ptr.vmem [resolvable:$true] %s741_s8 }
  0x21   : > { %473 = vmatpush.bf16.msra.mxu0 %v866_v5  ;;  %v582_v34 = vld [vmem:[%s1278_s7] sm:$0xff]  ;;  %576 = vmatpush.msra.mxu2 %v558_v33  ;;  %p935_p13 = pneg %p934_p12  ;;  %p938_p1 = scmp.lt.s32.totalorder %s936_s18, %s932_s14 }
  0x22   : > { %600 = vmatpush.msra.mxu3 %v582_v34  ;;  %v606_v12 = vld [vmem:[%s1279_s9] sm:$0x1]  ;;  %v607_v14 = vld [vmem:[%s1279_s9 + $0x1] sm:$0x1]  ;;  %v584_v20 = vld [vmem:[#allocation4] sm:$0x1] }
  0x23   : > { %850 = vmatpush.msk.msrb.mxu2 %vm612_vm1, %v606_v12  ;;  %848 = vmatpush.msk.msrb.mxu1 %vm612_vm1, %v607_v14  ;;  %v533_v15 = vld [vmem:[#allocation2] sm:$0x1]  ;;  %p939_p2 = por %p938_p1, %p937_p0 }
  0x24   : > { %v690_v31 = vld [vmem:[%s1280_s10] sm:$0x1] }
  0x25   : > { %474 = vmatpush.bf16.msra.mxu0 %v865_v6  ;;  %p940_p3 = pnand %p939_p2, %p935_p13 }
  0x29   : > { %475 = vmatpush.bf16.msra.mxu0 %v864_v7 }
  0x2d   : > { %476 = vmatpush.bf16.msra.mxu0 %v863_v8 }
  0x31   : > { %477 = vmatpush.bf16.msra.mxu0 %v862_v9 }
  0x35   : > { %478 = vmatpush.bf16.msra.mxu0 %v861_v10 }
  0x38   : > { %479 = vmatmul.bf16.vlgmr.msra.gmra.mxu0 %v399_v13  ;;  %v662_v13 = vld [vmem:[%s1279_s9 + $0x2] sm:$0x1] }
  0x39   : > { %852 = vmatpush.msk.msrb.mxu3 %vm612_vm1, %v662_v13 }
  0x48   : > { %484 = vmatmul.bf16.gmra.mxu0 %v400_v16 }
  0x58   : > { %489 = vmatmul.bf16.gmra.mxu0 %v401_v19  ;;  %v560_v19 = vld [vmem:[#allocation3] sm:$0x1] }
  0x68   : > { %494 = vmatmul.bf16.gmra.mxu0 %v402_v22 }
  0xb5   : > { %v480_v23 = vpop.f32.mrf.mxu0 }
  0xb6   : > { %v1151_v37 = vadd.f32 %v911_v28, %v480_v23 }
  0xb8   : > { %v500_v41 = vmax.f32 %v1151_v37, 0.0 }
  0xba   : > { %v509_v48 = vsel %vm508_vm0, %v500_v41, 0.0 }
  0xbd   : > { %v482_v24 = vpop.f32.mrf.mxu0 }
  0xbe   : > { %v1149_v35 = vadd.f32 %v911_v28, %v482_v24 }
  0xc0   : > { %v501_v39 = vmax.f32 %v1149_v35, 0.0 }
  0xc2   : > { %v510_v44 = vsel %vm508_vm0, %v501_v39, 0.0 }
  0xc3   : > { %v511_v52 = vadd.f32 %v510_v44, %v509_v48 }
  0xc5   : > { %v485_v25 = vpop.f32.mrf.mxu0 }
  0xc6   : > { %v1153_v38 = vadd.f32 %v911_v28, %v485_v25 }
  0xc8   : > { %v502_v42 = vmax.f32 %v1153_v38, 0.0 }
  0xca   : > { %v512_v49 = vsel %vm508_vm0, %v502_v42, 0.0 }
  0xcb   : > { %v513_v55 = vadd.f32 %v512_v49, %v511_v52 }
  0xcd   : > { %v487_v26 = vpop.f32.mrf.mxu0 }
  0xce   : > { %v1156_v40 = vadd.f32 %v911_v28, %v487_v26 }
  0xd0   : > { %v503_v45 = vmax.f32 %v1156_v40, 0.0 }
  0xd2   : > { %v514_v53 = vsel %vm508_vm0, %v503_v45, 0.0 }
  0xd3   : > { %v515_v58 = vadd.f32 %v514_v53, %v513_v55 }
  0xd5   : > { %v490_v27 = vpop.f32.mrf.mxu0 }
  0xd6   : > { %v1160_v43 = vadd.f32 %v911_v28, %v490_v27 }
  0xd8   : > { %v504_v50 = vmax.f32 %v1160_v43, 0.0 }
  0xda   : > { %v516_v56 = vsel %vm508_vm0, %v504_v50, 0.0 }
  0xdb   : > { %v517_v60 = vadd.f32 %v516_v56, %v515_v58 }
  0xdd   : > { %v492_v36 = vpop.f32.mrf.mxu0 }
  0xde   : > { %v1166_v46 = vadd.f32 %v911_v28, %v492_v36 }
  0xe0   : > { %v505_v54 = vmax.f32 %v1166_v46, 0.0 }
  0xe2   : > { %v518_v59 = vsel %vm508_vm0, %v505_v54, 0.0 }
  0xe3   : > { %v519_v0 = vadd.f32 %v518_v59, %v517_v60 }
  0xe5   : > { %v495_v47 = vpop.f32.mrf.mxu0 }
  0xe6   : > { %v1175_v51 = vadd.f32 %v911_v28, %v495_v47 }
  0xe8   : > { %v506_v57 = vmax.f32 %v1175_v51, 0.0 }
  0xea   : > { %v520_v62 = vsel %vm508_vm0, %v506_v57, 0.0 }
  0xeb   : > { %v521_v2 = vadd.f32 %v520_v62, %v519_v0 }
  0xed   : > { %v497_v61 = vpop.f32.mrf.mxu0 }
  0xee   : > { %v1191_v63 = vadd.f32 %v911_v28, %v497_v61 }
  0xf0   : > { %v507_v1 = vmax.f32 %v1191_v63, 0.0 }
  0xf2   : > { %v522_v3 = vsel %vm508_vm0, %v507_v1, 0.0 }
  0xf3   : > { %v523_v4 = vadd.f32 %v522_v3, %v521_v2 }
  0xf5   : > { %v524_v5 = vrot.slane %v523_v4, 4 }
  0xf7   : > { %v525_v6 = vadd.f32 %v524_v5, %v523_v4 }
  0xf9   : > { %v526_v7 = vrot.slane %v525_v6, 2 }
  0xfb   : > { %v527_v8 = vadd.f32 %v526_v7, %v525_v6 }
  0xfd   : > { %v528_v9 = vrot.slane %v527_v8, 1 }
  0xff   : > { %v529_v10 = vadd.f32 %v528_v9, %v527_v8 }
 0x101   : > { %v530_v11 = vmul.f32 0.015625, %v529_v10 }
 0x103   : > { %845 = vmatmul.msk.f32.vlgmr.msra.gmra.mxu1 %vm508_vm0, %v530_v11  ;;  %846 = vmatmul.msk.f32.vlgmr.msra.gmra.mxu2 %vm508_vm0, %v530_v11 }
 0x104   : > { %847 = vmatmul.msk.f32.vlgmr.msra.gmra.mxu3 %vm508_vm0, %v530_v11 }
 0x180   : > { %v554_v16 = vpop.f32.mrf.mxu1 }
 0x181   : > { %v555_v17 = vadd.f32 %v554_v16, %v533_v15 }
 0x183   : > { %v557_v18 = vmax.f32 %v555_v17, 0.0 }
 0x185   : > { %851 = vmatmul.msk.f32.vlgmr.msrb.gmra.mxu2 %vm608_vm2, %v557_v18 }
 0x186   : > { %v578_v21 = vpop.f32.mrf.mxu2 }
 0x187   : > { %v579_v22 = vadd.f32 %v578_v21, %v560_v19  ;;  %v602_v23 = vpop.f32.mrf.mxu3 }
 0x188   : > { %v603_v24 = vadd.f32 %v602_v23, %v584_v20 }
 0x189   : > { %v581_v25 = vmax.f32 %v579_v22, 0.0 }
 0x18a   : > { %v605_v26 = vmax.f32 %v603_v24, 0.0 }
 0x18b   : > { %849 = vmatmul.msk.f32.vlgmr.msrb.gmra.mxu1 %vm608_vm2, %v581_v25 }
 0x18c   : > { %853 = vmatmul.msk.f32.vlgmr.msrb.gmra.mxu3 %vm608_vm2, %v605_v26 }
 0x208   : > { %v633_v27 = vpop.f32.mrf.mxu1  ;;  %v659_v28 = vpop.f32.mrf.mxu2 }
 0x209   : > { %v660_v29 = vadd.f32 %v659_v28, %v633_v27 }
 0x20f   : > { %v686_v30 = vpop.f32.mrf.mxu3 }
 0x210   : > { %v689_v32 = vadd.f32 %v686_v30, %v660_v29 }
 0x212   : > { %v691_v33 = vadd.f32 %v690_v31, %v689_v32 }
 0x214   : > { %v854_v34 = vmul.f32 -1.442695, %v691_v33 }
 0x216   : > { %912 = vpow2.f32 %v854_v34 }
 0x21c   : > { %v913_v36 = vpop.eup %912 }
 0x21d   : > { %v695_v44 = vadd.f32 1.0, %v913_v36 }
 0x21f   : > { %914 = vrcp.f32 %v695_v44  ;;  %v707_v52 = vand.u32 2147483648, %v695_v44  ;;  %v705_v55 = vand.u32 2147483647, %v695_v44  ;;  %vm701_vm4 = vweird.f32 %v695_v44 }
 0x221   : > { %v708_v58 = vor.u32 1.1754944e-38, %v707_v52  ;;  %vm706_vm6 = vcmp.eq.f32.partialorder %v705_v55, 8.507059e+37 }
 0x225   : > { %v915_v47 = vpop.eup %914 }
 0x226   : > { %v697_v48 = vmul.f32 %v915_v47, %v695_v44  ;;  %vm702_vm3 = vweird.f32 %v915_v47 }
 0x227   : > { %vm703_vm5 = vmor %vm701_vm4, %vm702_vm3 }
 0x228   : > { %v698_v49 = vsub.f32 1.0, %v697_v48 }
 0x22a   : > { %v699_v53 = vmul.f32 %v915_v47, %v698_v49 }
 0x22c   : > { %v700_v56 = vadd.f32 %v915_v47, %v699_v53 }
 0x22e   : > { %v704_v59 = vsel %vm703_vm5, %v915_v47, %v700_v56 }
 0x22f   : > { %v709_v60 = vsel %vm706_vm6, %v708_v58, %v704_v59 }
 0x230   : > { %v711_v61 = vperm.slane %v709_v60, 0 }
 0x232   : > { %v712_v62 = vmul.f32 %v711_v61, %v500_v41  ;;  %v713_v0 = vmul.f32 %v711_v61, %v501_v39  ;;  %v714_v2 = vmul.f32 %v711_v61, %v502_v42  ;;  %v715_v3 = vmul.f32 %v711_v61, %v503_v45 }
 0x233   : > { %v716_v4 = vmul.f32 %v711_v61, %v504_v50  ;;  %v717_v35 = vmul.f32 %v711_v61, %v505_v54  ;;  %v718_v37 = vmul.f32 %v711_v61, %v506_v57  ;;  %v719_v38 = vmul.f32 %v711_v61, %v507_v1 }
 0x234   : > { %720 = vst.msk [vmem:[%s385_s6] sm:$0xff] %vm508_vm0, %v712_v62 }
 0x235   : > { %721 = vst.msk [vmem:[%s385_s6 + $0x8] sm:$0xff] %vm508_vm0, %v713_v0 }
 0x236   : > { %722 = vst.msk [vmem:[%s385_s6 + $0x10] sm:$0xff] %vm508_vm0, %v714_v2 }
 0x237   : > { %723 = vst.msk [vmem:[%s385_s6 + $0x18] sm:$0xff] %vm508_vm0, %v715_v3 }
 0x238   : > { %724 = vst.msk [vmem:[%s385_s6 + $0x20] sm:$0xff] %vm508_vm0, %v716_v4 }
 0x239   : > { %725 = vst.msk [vmem:[%s385_s6 + $0x28] sm:$0xff] %vm508_vm0, %v717_v35 }
 0x23a   : > { %726 = vst.msk [vmem:[%s385_s6 + $0x30] sm:$0xff] %vm508_vm0, %v718_v37 }
 0x23b   : > { %727 = vst.msk [vmem:[%s385_s6 + $0x38] sm:$0xff] %vm508_vm0, %v719_v38 }
 0x23c   : > { %943 = shalt.err (!%p940_p3)
}
 0x23d   : > { %s980_s17 = smov 128   ;;  %s981_s21 = smov 8  }
 0x23e   : > { %870 = dma.vmem_to_hbm [thread:$0]  (%p1089_p5), %s742_s8, 1024, %s744_s27, %s729_s28, %s980_s17, %s980_s17, %s981_s21  }
 0x23f PF: > { %p876_p4 = scmp.ge.s32.totalorder %s978_s4, 2  ;;  %s758_s22 = sand.u32 1, %s966_s23  }
 0x240   : > { %s759_s6 = scalar_lea.sflag [#allocation6], %s758_s22 }
 0x241   : > { %p873_p7 = pnand %p876_p4, %p1093_p6 }
 0x243   : > { %p874_p8 = pneg %p873_p7 }
 0x245   : > { %961 = dma.done.wait (%p874_p8), %s759_s6, 1024  }
 0x246   : > { %963 = vsyncadd (%p874_p8), %s759_s6, 4294966272  ;;  %p27_p9 = scmp.ge.s32.totalorder %s1076_s26, 4   ;;  %s1286_s23 = smov %s970_s24 }
 0x247   : > { %s1287_s24 = smov %s974_s25  ;;  %s1288_s25 = smov %s1087_s29 }
 0x248   : > { %s1289_s4 = smov %s1076_s26  ;;  %29 = sbr.rel (!%p27_p9) target bundleno = 8 (0x8), region = 99 }
 0x24d   :  { %765 = vsyncpa [#allocation6], 1 }
 0x24e   :  { %767 = vsyncpa [#allocation6 + $0x1], 1 }

// kernel: block_forward_pallas.6
= control target key start
LH: loop header
LB: loop body
LE: loop exit
PB: predicated region body
PF: predicated region fallthrough
CT: control target
= control target key end

     0   :  { %s2378_s18 = smov 0   ;;  %s3276_s0 = inlined_call_operand.vmem [shape: f32[2,8,8,64], index: 0, kind: input, shape index: {}]   ;;  %s3277_s1 = inlined_call_operand.vmem [shape: bf16[576,64], index: 1, kind: input, shape index: {}]   ;;  %s3278_s2 = inlined_call_operand.vmem [shape: f32[1,64], index: 2, kind: input, shape index: {}]   ;;  %s3279_s3 = inlined_call_operand.vmem [shape: bf16[576,64], index: 3, kind: input, shape index: {}]   ;;  %s3280_s4 = inlined_call_operand.vmem [shape: f32[1,64], index: 4, kind: input, shape index: {}]   ;;  %s3281_s5 = inlined_call_operand.vmem [shape: f32[2,8,8,128], index: 5, kind: output, shape index: {}]  }
   0x1 LB: > { %s1799_s19 = sadd.s32 4294967295, %s2344_s18   ;;  %p1803_p0 = scmp.ge.s32.totalorder %s2344_s18, 1  ;;  %s2344_s18 = sphi %s2378_s18, %s15_s18  }
   0x2   : > { %p187_p1 = scmp.lt.s32.totalorder %s2344_s18, 3 }
   0x4   : > { %p188_p2 = pnand %p1803_p0, %p187_p1 }
   0x5   : > { %p215_p3 = scmp.lt.s32.totalorder (!%p188_p2), %s1799_s19, 1  ;;  %s2347_s24 = smov (!%p188_p2), 64  }
   0x6   : > { %191 = sbr.rel (%p188_p2) target bundleno = 857 (0x359), region = 40 }
   0xb   : > { %vm234_vm0 = vcmask 523264   ;;  %vm236_vm1 = vcmask 517120   ;;  %v2346_v0 = vmov 0.0   ;;  %s3283_s19 = smov (!%p215_p3, %s1799_s19), 1  ;;  %vm301_vm2 = vcmask 1046528   ;;  %v2115_v24 = vld [vmem:[%s3277_s1 + $0x38] sm:$0xff] }
   0xc   : > { %244 = vst.msk [vmem:[#allocation2 + $0x40] sm:$0xff] %vm234_vm0, %v2346_v0  ;;  %s2106_s20 = sshll.u32 %s3283_s19, 6  ;;  %v2123_v25 = vld [vmem:[%s3277_s1 + $0x78] sm:$0xff]  ;;  %vm326_vm3 = vcmask 1045504   ;;  %2180 = vmatpush.bf16.msra.mxu2 %v2115_v24  ;;  %v2114_v28 = vld [vmem:[%s3277_s1 + $0x30] sm:$0xff]  ;;  %810 = vmatpush.bf16.msra.mxu0 %v2115_v24  ;;  %v2113_v53 = vld [vmem:[%s3277_s1 + $0x28] sm:$0xff] }
   0xd   : > { %245 = vst.msk [vmem:[#allocation2 + $0x48] sm:$0x3] %vm236_vm1, %v2346_v0  ;;  %s2402_s23 = scalar_lea.vmem %s3276_s0, %s2106_s20  ;;  %2188 = vmatpush.bf16.msra.mxu3 %v2123_v25  ;;  %839 = vmatpush.bf16.msra.mxu1 %v2123_v25  ;;  %v2122_v48 = vld [vmem:[%s3277_s1 + $0x70] sm:$0xff]  ;;  %v2121_v59 = vld [vmem:[%s3277_s1 + $0x68] sm:$0xff]  ;;  %s224_s28 = scalar_lea.vmem %s3281_s5, %s2106_s20 }
   0xe   : > { %246 = vst.msk [vmem:[#allocation2 + $0x50] sm:$0xff] %vm234_vm0, %v2346_v0  ;;  %v2407_v1 = vld [vmem:[%s2402_s23 + $0x18] sm:$0xff]  ;;  %v2410_v2 = vld [vmem:[%s2402_s23 + $0x20] sm:$0xff]  ;;  %v2509_v15 = vld [vmem:[%s2402_s23 + $0x28] sm:$0xff] }
   0xf   : > { %247 = vst.msk [vmem:[#allocation2 + $0x58] sm:$0x3] %vm236_vm1, %v2346_v0  ;;  %v2504_v14 = vld [vmem:[%s2402_s23] sm:$0xff]  ;;  %v2514_v16 = vld [vmem:[%s2402_s23 + $0x30] sm:$0xff]  ;;  %v2519_v17 = vld [vmem:[%s2402_s23 + $0x8] sm:$0xff] }
  0x10   : > { %235 = vst.msk [vmem:[#allocation2] sm:$0xff] %vm234_vm0, %v2346_v0  ;;  %v2528_v20 = vld [vmem:[%s2402_s23 + $0x10] sm:$0xff]  ;;  %v2533_v21 = vld [vmem:[%s2402_s23 + $0x38] sm:$0xff]  ;;  %2181 = vmatpush.bf16.msra.mxu2 %v2114_v28  ;;  %811 = vmatpush.bf16.msra.mxu0 %v2114_v28 }
  0x11   : > { %237 = vst.msk [vmem:[#allocation2 + $0x8] sm:$0x3] %vm236_vm1, %v2346_v0  ;;  %2189 = vmatpush.bf16.msra.mxu3 %v2122_v48  ;;  %840 = vmatpush.bf16.msra.mxu1 %v2122_v48 }
  0x12   : > { %260 = vst.msk [vmem:[#allocation2 + $0x41] sm:$0xff] %vm234_vm0, %v2407_v1 }
  0x13   : > { %261 = vst.msk [vmem:[#allocation2 + $0x51] sm:$0xff] %vm234_vm0, %v2410_v2 }
  0x14   : > { %238 = vst.msk [vmem:[#allocation2 + $0x10] sm:$0xff] %vm234_vm0, %v2346_v0  ;;  %2182 = vmatpush.bf16.msra.mxu2 %v2113_v53  ;;  %812 = vmatpush.bf16.msra.mxu0 %v2113_v53 }
  0x15   : > { %239 = vst.msk [vmem:[#allocation2 + $0x18] sm:$0x3] %vm236_vm1, %v2346_v0  ;;  %2190 = vmatpush.bf16.msra.mxu3 %v2121_v59  ;;  %841 = vmatpush.bf16.msra.mxu1 %v2121_v59 }
  0x16   : > { %240 = vst.msk [vmem:[#allocation2 + $0x20] sm:$0xff] %vm234_vm0, %v2346_v0 }
  0x17   : > { %241 = vst.msk [vmem:[#allocation2 + $0x28] sm:$0x3] %vm236_vm1, %v2346_v0  ;;  %v2521_v18 = vld [vmem:[#allocation2] sm:$0xff] }
  0x18   : > { %242 = vst.msk [vmem:[#allocation2 + $0x30] sm:$0xff] %vm234_vm0, %v2346_v0  ;;  %v2523_v19 = vld [vmem:[#allocation2 + $0x8] sm:$0x3]  ;;  %v302_v22 = vrot.slane %v2521_v18, 1 }
  0x19   : > { %v2428_v3 = vld [vmem:[#allocation2 + $0x40] sm:$0xff]  ;;  %v2430_v4 = vld [vmem:[#allocation2 + $0x48] sm:$0x3]  ;;  %243 = vst.msk [vmem:[#allocation2 + $0x38] sm:$0x3] %vm236_vm1, %v2346_v0  ;;  %v303_v23 = vrot.slane %v2523_v19, 1 }
  0x1a   : > { %v2434_v5 = vld [vmem:[#allocation2 + $0x50] sm:$0xff]  ;;  %v2436_v6 = vld [vmem:[#allocation2 + $0x58] sm:$0x3]  ;;  %v314_v7 = vrot.slane %v2428_v3, 1  ;;  %v315_v8 = vrot.slane %v2430_v4, 1  ;;  %248 = vst.msk [vmem:[#allocation2 + $0x60] sm:$0xff] %vm234_vm0, %v2346_v0 }
  0x1b   : > { %v317_v9 = vrot.slane %v2434_v5, 1  ;;  %v318_v10 = vrot.slane %v2436_v6, 1  ;;  %249 = vst.msk [vmem:[#allocation2 + $0x68] sm:$0x3] %vm236_vm1, %v2346_v0  ;;  %v304_v29 = vsel %vm301_vm2, %v302_v22, %v303_v23  ;;  %v340_v22 = vrot.slane %v2430_v4, 2 }
  0x1c   : > { %v2445_v11 = vsel %vm301_vm2, %v314_v7, %v315_v8  ;;  %250 = vst.msk [vmem:[#allocation2 + $0x70] sm:$0xff] %vm234_vm0, %v2346_v0  ;;  %v339_v24 = vrot.slane %v2428_v3, 2  ;;  %v342_v48 = vrot.slane %v2434_v5, 2 }
  0x1d   : > { %v2450_v12 = vsel %vm301_vm2, %v317_v9, %v318_v10  ;;  %251 = vst.msk [vmem:[#allocation2 + $0x78] sm:$0x3] %vm236_vm1, %v2346_v0  ;;  %v2112_v9 = vld [vmem:[%s3277_s1 + $0x20] sm:$0xff] }
  0x1e   : > { %v2206_v13 = vpack.i.bf16 %v2450_v12, %v2445_v11  ;;  %252 = vst.msk [vmem:[#allocation2 + $0x80] sm:$0xff] %vm234_vm0, %v2346_v0  ;;  %2183 = vmatpush.bf16.msra.mxu2 %v2112_v9  ;;  %813 = vmatpush.bf16.msra.mxu0 %v2112_v9 }
  0x1f   : > { %253 = vst.msk [vmem:[#allocation2 + $0x88] sm:$0x3] %vm236_vm1, %v2346_v0 }
  0x20   : > { %2207 = vrot.lane.b32.xlu0 %v2206_v13, %s2347_s24  ;;  %254 = vst.msk [vmem:[#allocation2 + $0x90] sm:$0xff] %vm234_vm0, %v2346_v0  ;;  %v2120_v13 = vld [vmem:[%s3277_s1 + $0x60] sm:$0xff] }
  0x21   : > { %255 = vst.msk [vmem:[#allocation2 + $0x98] sm:$0x3] %vm236_vm1, %v2346_v0  ;;  %2191 = vmatpush.bf16.msra.mxu3 %v2120_v13  ;;  %842 = vmatpush.bf16.msra.mxu1 %v2120_v13 }
  0x22   : > { %963 = vst.msk [vmem:[#allocation3] sm:$0xff] %vm234_vm0, %v2346_v0 }
  0x23   : > { %964 = vst.msk [vmem:[#allocation3 + $0x8] sm:$0x3] %vm236_vm1, %v2346_v0 }
  0x24   : > { %965 = vst.msk [vmem:[#allocation3 + $0x10] sm:$0xff] %vm234_vm0, %v2346_v0 }
  0x25   : > { %966 = vst.msk [vmem:[#allocation3 + $0x18] sm:$0x3] %vm236_vm1, %v2346_v0 }
  0x26   : > { %967 = vst.msk [vmem:[#allocation3 + $0x20] sm:$0xff] %vm234_vm0, %v2346_v0 }
  0x27   : > { %968 = vst.msk [vmem:[#allocation3 + $0x28] sm:$0x3] %vm236_vm1, %v2346_v0  ;;  %v2632_v28 = vld [vmem:[#allocation2 + $0x90] sm:$0xff] }
  0x28   : > { %969 = vst.msk [vmem:[#allocation3 + $0x30] sm:$0xff] %vm234_vm0, %v2346_v0 }
  0x29   : > { %970 = vst.msk [vmem:[#allocation3 + $0x38] sm:$0x3] %vm236_vm1, %v2346_v0 }
  0x2a   : > { %971 = vst.msk [vmem:[#allocation3 + $0x40] sm:$0xff] %vm234_vm0, %v2346_v0 }
  0x2b   : > { %972 = vst.msk [vmem:[#allocation3 + $0x48] sm:$0x3] %vm236_vm1, %v2346_v0 }
  0x2c   : > { %973 = vst.msk [vmem:[#allocation3 + $0x50] sm:$0xff] %vm234_vm0, %v2346_v0 }
  0x2d   : > { %974 = vst.msk [vmem:[#allocation3 + $0x58] sm:$0x3] %vm236_vm1, %v2346_v0 }
  0x2e   : > { %975 = vst.msk [vmem:[#allocation3 + $0x60] sm:$0xff] %vm234_vm0, %v2346_v0 }
  0x2f   : > { %976 = vst.msk [vmem:[#allocation3 + $0x68] sm:$0x3] %vm236_vm1, %v2346_v0 }
  0x30   : > { %977 = vst.msk [vmem:[#allocation3 + $0x70] sm:$0xff] %vm234_vm0, %v2346_v0 }
  0x31   : > { %978 = vst.msk [vmem:[#allocation3 + $0x78] sm:$0x3] %vm236_vm1, %v2346_v0 }
  0x32   : > { %979 = vst.msk [vmem:[#allocation3 + $0x80] sm:$0xff] %vm234_vm0, %v2346_v0 }
  0x33   : > { %980 = vst.msk [vmem:[#allocation3 + $0x88] sm:$0x3] %vm236_vm1, %v2346_v0 }
  0x34   : > { %981 = vst.msk [vmem:[#allocation3 + $0x90] sm:$0xff] %vm234_vm0, %v2346_v0 }
  0x35   : > { %982 = vst.msk [vmem:[#allocation3 + $0x98] sm:$0x3] %vm236_vm1, %v2346_v0 }
  0x36   : > { %257 = vst.msk [vmem:[#allocation2 + $0x11] sm:$0xff] %vm234_vm0, %v2504_v14 }
  0x37   : > { %262 = vst.msk [vmem:[#allocation2 + $0x61] sm:$0xff] %vm234_vm0, %v2509_v15 }
  0x38   : > { %263 = vst.msk [vmem:[#allocation2 + $0x71] sm:$0xff] %vm234_vm0, %v2514_v16 }
  0x39   : > { %258 = vst.msk [vmem:[#allocation2 + $0x21] sm:$0xff] %vm234_vm0, %v2519_v17 }
  0x3a   : > { %259 = vst.msk [vmem:[#allocation2 + $0x31] sm:$0xff] %vm234_vm0, %v2528_v20 }
  0x3b   : > { %264 = vst.msk [vmem:[#allocation2 + $0x81] sm:$0xff] %vm234_vm0, %v2533_v21 }
  0x3d   : > { %v2549_v26 = vld [vmem:[#allocation2 + $0x10] sm:$0xff]  ;;  %v268_v27 = vld [vmem:[#allocation2 + $0x18] sm:$0x3] }
  0x3e   : > { %v305_v30 = vrot.slane %v2549_v26, 1  ;;  %v306_v31 = vrot.slane %v268_v27, 1  ;;  %v331_v32 = vrot.slane %v268_v27, 2  ;;  %v2556_v33 = vld [vmem:[#allocation2 + $0x60] sm:$0xff]  ;;  %v2558_v34 = vld [vmem:[#allocation2 + $0x68] sm:$0x3] }
  0x3f   : > { %v2211_v35 = vpack.i.bf16 %v2556_v33, %v2434_v5  ;;  %v2562_v36 = vld [vmem:[#allocation2 + $0x70] sm:$0xff]  ;;  %v2564_v37 = vld [vmem:[#allocation2 + $0x78] sm:$0x3]  ;;  %v320_v38 = vrot.slane %v2556_v33, 1  ;;  %v321_v39 = vrot.slane %v2558_v34, 1  ;;  %v330_v40 = vrot.slane %v2549_v26, 2 }
  0x40   : > { %v2570_v41 = vsel %vm301_vm2, %v305_v30, %v306_v31  ;;  %v323_v42 = vrot.slane %v2562_v36, 1  ;;  %v324_v43 = vrot.slane %v2564_v37, 1  ;;  %v270_v44 = vld [vmem:[#allocation2 + $0x28] sm:$0x3]  ;;  %v2576_v46 = vld [vmem:[#allocation2 + $0x20] sm:$0xff]  ;;  %v2111_v30 = vld [vmem:[%s3277_s1 + $0x18] sm:$0xff] }
  0x41   : > { %v2216_v45 = vpack.i.bf16 %v2570_v41, %v304_v29  ;;  %2212 = vrot.lane.b32.xlu0 %v2211_v35, %s2347_s24  ;;  %v272_v47 = vld [vmem:[#allocation2 + $0x38] sm:$0x3]  ;;  %v2582_v49 = vsel %vm326_vm3, %v330_v40, %v331_v32  ;;  %v333_v50 = vrot.slane %v2576_v46, 2  ;;  %v334_v51 = vrot.slane %v270_v44, 2  ;;  %v2594_v55 = vld [vmem:[#allocation2 + $0x30] sm:$0xff]  ;;  %2184 = vmatpush.bf16.msra.mxu2 %v2111_v30 }
  0x42   : > { %v2585_v52 = vld [vmem:[#allocation2 + $0x80] sm:$0xff]  ;;  %v2592_v54 = vsel %vm301_vm2, %v320_v38, %v321_v39  ;;  %v308_v57 = vrot.slane %v2576_v46, 1  ;;  %v309_v58 = vrot.slane %v270_v44, 1  ;;  %v2603_v60 = vsel %vm301_vm2, %v323_v42, %v324_v43  ;;  %v2634_v29 = vld [vmem:[#allocation2 + $0x98] sm:$0x3]  ;;  %v2110_v44 = vld [vmem:[%s3277_s1 + $0x10] sm:$0xff]  ;;  %814 = vmatpush.bf16.msra.mxu0 %v2111_v30 }
  0x43   : > { %2217 = vrot.lane.b32.xlu1 %v2216_v45, %s2347_s24  ;;  %v2226_v56 = vpack.i.bf16 %v2585_v52, %v2562_v36  ;;  %v2606_v61 = vsel %vm326_vm3, %v333_v50, %v334_v51  ;;  %v311_v62 = vrot.slane %v2594_v55, 1  ;;  %v312_v63 = vrot.slane %v272_v47, 1  ;;  %v282_v4 = vld [vmem:[#allocation2 + $0x88] sm:$0x3]  ;;  %v2119_v31 = vld [vmem:[%s3277_s1 + $0x58] sm:$0xff]  ;;  %v2118_v30 = vld [vmem:[%s3277_s1 + $0x50] sm:$0xff] }
  0x44   : > { %v2236_v0 = vpack.i.bf16 %v2606_v61, %v2582_v49  ;;  %v2613_v7 = vsel %vm301_vm2, %v308_v57, %v309_v58  ;;  %v2221_v10 = vpack.i.bf16 %v2603_v60, %v2592_v54  ;;  %v336_v25 = vrot.slane %v2594_v55, 2  ;;  %2192 = vmatpush.bf16.msra.mxu3 %v2119_v31  ;;  %843 = vmatpush.bf16.msra.mxu1 %v2119_v31 }
  0x45   : > { %2227 = vrot.lane.b32.xlu2 %v2226_v56, %s2347_s24  ;;  %v2616_v8 = vsel %vm301_vm2, %v311_v62, %v312_v63  ;;  %v337_v27 = vrot.slane %v272_v47, 2  ;;  %v2251_v32 = vpack.i.bf16 %v2428_v3, %v2594_v55  ;;  %v377_v35 = vrot.slane %v2632_v28, 1  ;;  %2185 = vmatpush.bf16.msra.mxu2 %v2110_v44 }
  0x46   : > { %v2231_v23 = vpack.i.bf16 %v2616_v8, %v2613_v7  ;;  %v378_v38 = vrot.slane %v2634_v29, 1  ;;  %v2652_v40 = vsel %vm326_vm3, %v339_v24, %v340_v22  ;;  %v361_v42 = vrot.slane %v2585_v52, 1  ;;  %815 = vmatpush.bf16.msra.mxu0 %v2110_v44  ;;  %v2138_v44 = vld [vmem:[%s3277_s1 + $0xf0] sm:$0xff] }
  0x47   : > { %v2649_v39 = vsel %vm326_vm3, %v336_v25, %v337_v27  ;;  %v362_v43 = vrot.slane %v282_v4, 1  ;;  %v2241_v45 = vpack.i.bf16 %v2576_v46, %v2549_v26  ;;  %v343_v47 = vrot.slane %v2436_v6, 2  ;;  %v2108_v27 = vld [vmem:[%s3277_s1] sm:$0xff] }
  0x48   : > { %v345_v50 = vrot.slane %v2556_v33, 2  ;;  %v346_v51 = vrot.slane %v2558_v34, 2  ;;  %v2246_v53 = vpack.i.bf16 %v2652_v40, %v2649_v39  ;;  %v379_v56 = vsel %vm301_vm2, %v377_v35, %v378_v38  ;;  %v2109_v34 = vld [vmem:[%s3277_s1 + $0x8] sm:$0xff]  ;;  %v2131_v35 = vld [vmem:[%s3277_s1 + $0xb8] sm:$0xff]  ;;  %2193 = vmatpush.bf16.msra.mxu3 %v2118_v30  ;;  %844 = vmatpush.bf16.msra.mxu1 %v2118_v30 }
  0x49   : > { %2237 = vrot.lane.b32.xlu0 %v2236_v0, %s2347_s24  ;;  %v348_v57 = vrot.slane %v2562_v36, 2  ;;  %v2670_v58 = vsel %vm301_vm2, %v361_v42, %v362_v43  ;;  %v349_v6 = vrot.slane %v2564_v37, 2  ;;  %v372_v59 = vrot.slane %v2585_v52, 2  ;;  %2186 = vmatpush.bf16.msra.mxu2 %v2109_v34  ;;  %v2117_v38 = vld [vmem:[%s3277_s1 + $0x48] sm:$0xff]  ;;  %v2139_v42 = vld [vmem:[%s3277_s1 + $0xf8] sm:$0xff] }
  0x4a   : > { %v373_v62 = vrot.slane %v282_v4, 2  ;;  %v2679_v63 = vsel %vm326_vm3, %v342_v48, %v343_v47  ;;  %v2682_v0 = vsel %vm326_vm3, %v345_v50, %v346_v51  ;;  %v2266_v37 = vpack.i.bf16 %v379_v56, %v2670_v58  ;;  %816 = vmatpush.bf16.msra.mxu0 %v2109_v34  ;;  %v2129_v43 = vld [vmem:[%s3277_s1 + $0xa8] sm:$0xff]  ;;  %v2127_v48 = vld [vmem:[%s3277_s1 + $0x98] sm:$0xff]  ;;  %v2136_v51 = vld [vmem:[%s3277_s1 + $0xe0] sm:$0xff] }
  0x4b   : > { %2222 = vrot.lane.b32.xlu1 %v2221_v10, %s2347_s24  ;;  %v2687_v9 = vsel %vm326_vm3, %v348_v57, %v349_v6  ;;  %v2256_v13 = vpack.i.bf16 %v2682_v0, %v2679_v63  ;;  %v2137_v47 = vld [vmem:[%s3277_s1 + $0xe8] sm:$0xff]  ;;  %v2143_v50 = vld [vmem:[%s3277_s1 + $0x118] sm:$0xff]  ;;  %v2142_v56 = vld [vmem:[%s3277_s1 + $0x110] sm:$0xff] }
  0x4c   : > { %v2690_v10 = vsel %vm326_vm3, %v372_v59, %v373_v62  ;;  %2194 = vmatpush.bf16.msra.mxu3 %v2117_v38  ;;  %845 = vmatpush.bf16.msra.mxu1 %v2117_v38  ;;  %v2135_v57 = vld [vmem:[%s3277_s1 + $0xd8] sm:$0xff]  ;;  %v2125_v6 = vld [vmem:[%s3277_s1 + $0x88] sm:$0xff] }
  0x4d   : > { %2232 = vrot.lane.b32.xlu2 %v2231_v23, %s2347_s24  ;;  %v2261_v22 = vpack.i.bf16 %v2690_v10, %v2687_v9  ;;  %2187 = vmatpush.bf16.msra.mxu2 %v2108_v27 }
  0x4e   : > { %817 = vmatpush.bf16.msra.mxu0 %v2108_v27 }
  0x51   : > { %2252 = vrot.lane.b32.xlu0 %v2251_v32, %s2347_s24  ;;  %868 = vmatpush.bf16.msrb.mxu2 %v2131_v35 }
  0x52   : > { %930 = vmatpush.bf16.msrb.mxu0 %v2143_v50 }
  0x53   : > { %2242 = vrot.lane.b32.xlu1 %v2241_v45, %s2347_s24  ;;  %v2128_v45 = vld [vmem:[%s3277_s1 + $0xa0] sm:$0xff] }
  0x55   : > { %2247 = vrot.lane.b32.xlu2 %v2246_v53, %s2347_s24  ;;  %v2126_v53 = vld [vmem:[%s3277_s1 + $0x90] sm:$0xff] }
  0x56   : > { %931 = vmatpush.bf16.msrb.mxu0 %v2142_v56 }
  0x59   : > { %2267 = vrot.lane.b32.xlu0 %v2266_v37, %s2347_s24 }
  0x5b   : > { %2257 = vrot.lane.b32.xlu1 %v2256_v13, %s2347_s24  ;;  %v2134_v13 = vld [vmem:[%s3277_s1 + $0xd0] sm:$0xff] }
  0x5d   : > { %2262 = vrot.lane.b32.xlu2 %v2261_v22, %s2347_s24  ;;  %v2124_v22 = vld [vmem:[%s3277_s1 + $0x80] sm:$0xff] }
  0x92   : > { %v2208_v23 = vpop.permute.xlu0 %2207 }
  0x93   : > { %v2210_v24 = vunpack.i.h.bf16 %v2208_v23  ;;  %v2209_v25 = vunpack.i.l.bf16 %v2208_v23 }
  0x95   : > { %v467_v4 = vsel %vm234_vm0, %v2428_v3, %v2209_v25  ;;  %v468_v31 = vsel %vm234_vm0, %v2434_v5, %v2210_v24  ;;  %v2116_v3 = vld [vmem:[%s3277_s1 + $0x40] sm:$0xff]  ;;  %v2130_v5 = vld [vmem:[%s3277_s1 + $0xb0] sm:$0xff] }
  0x96   : > { %v2709_v32 = vpack.c.bf16 %v468_v31, %v467_v4  ;;  %2195 = vmatpush.bf16.msra.mxu3 %v2116_v3  ;;  %869 = vmatpush.bf16.msrb.mxu2 %v2130_v5  ;;  %v2141_v5 = vld [vmem:[%s3277_s1 + $0x108] sm:$0xff] }
  0x97   : > { %846 = vmatpush.bf16.msra.mxu1 %v2116_v3  ;;  %v2133_v3 = vld [vmem:[%s3277_s1 + $0xc8] sm:$0xff]  ;;  %932 = vmatpush.bf16.msrb.mxu0 %v2141_v5 }
  0x98   : > { %828 = vmatmul.bf16.vlgmr.msra.gmra.mxu2 %v2709_v32 }
  0x9a   : > { %897 = vmatpush.bf16.msrb.mxu3 %v2139_v42  ;;  %870 = vmatpush.bf16.msrb.mxu2 %v2129_v43  ;;  %v2132_v42 = vld [vmem:[%s3277_s1 + $0xc0] sm:$0xff] }
  0x9e   : > { %898 = vmatpush.bf16.msrb.mxu3 %v2138_v44  ;;  %871 = vmatpush.bf16.msrb.mxu2 %v2128_v45 }
  0x9f   : > { %v2228_v62 = vpop.permute.xlu2 %2227 }
  0xa0   : > { %v2229_v50 = vunpack.i.l.bf16 %v2228_v62 }
  0xa2   : > { %899 = vmatpush.bf16.msrb.mxu3 %v2137_v47  ;;  %872 = vmatpush.bf16.msrb.mxu2 %v2127_v48  ;;  %v2230_v48 = vunpack.i.h.bf16 %v2228_v62 }
  0xa4   : > { %v478_v62 = vsel %vm234_vm0, %v2687_v9, %v2230_v48 }
  0xa6   : > { %900 = vmatpush.bf16.msrb.mxu3 %v2136_v51  ;;  %873 = vmatpush.bf16.msrb.mxu2 %v2126_v53 }
  0xa7   : > { %v2233_v44 = vpop.permute.xlu2 %2232 }
  0xa8   : > { %v2235_v56 = vunpack.i.h.bf16 %v2233_v44 }
  0xaa   : > { %901 = vmatpush.bf16.msrb.mxu3 %v2135_v57  ;;  %874 = vmatpush.bf16.msrb.mxu2 %v2125_v6  ;;  %v2234_v57 = vunpack.i.l.bf16 %v2233_v44  ;;  %v328_v6 = vrot.slane %v2523_v19, 2 }
  0xae   : > { %902 = vmatpush.bf16.msrb.mxu3 %v2134_v13  ;;  %875 = vmatpush.bf16.msrb.mxu2 %v2124_v22  ;;  %v466_v13 = vsel %vm234_vm0, %v2594_v55, %v2235_v56 }
  0xb2   : > { %903 = vmatpush.bf16.msrb.mxu3 %v2133_v3 }
  0xb3   : > { %v2213_v59 = vpop.permute.xlu0 %2212 }
  0xb4   : > { %v2215_v34 = vunpack.i.h.bf16 %v2213_v59  ;;  %v2214_v37 = vunpack.i.l.bf16 %v2213_v59 }
  0xb5   : > { %v2218_v23 = vpop.permute.xlu1 %2217 }
  0xb6   : > { %v2220_v24 = vunpack.i.h.bf16 %v2218_v23  ;;  %v2219_v25 = vunpack.i.l.bf16 %v2218_v23  ;;  %v475_v27 = vsel %vm234_vm0, %v2652_v40, %v2214_v37  ;;  %v476_v30 = vsel %vm234_vm0, %v2679_v63, %v2215_v34  ;;  %904 = vmatpush.bf16.msrb.mxu3 %v2132_v42 }
  0xb7   : > { %v498_v4 = vpack.c.bf16 %v476_v30, %v475_v27  ;;  %v327_v34 = vrot.slane %v2521_v18, 2  ;;  %v477_v37 = vsel %vm234_vm0, %v2682_v0, %v2229_v50 }
  0xb8   : > { %v463_v31 = vsel %vm234_vm0, %v2521_v18, %v2219_v25  ;;  %v464_v35 = vsel %vm234_vm0, %v2549_v26, %v2220_v24  ;;  %v2140_v26 = vld [vmem:[%s3277_s1 + $0x100] sm:$0xff]  ;;  %v502_v23 = vpack.c.bf16 %v478_v62, %v477_v37 }
  0xb9   : > { %v489_v38 = vpack.c.bf16 %v464_v35, %v463_v31  ;;  %857 = vmatmul.bf16.vlgmr.msra.gmra.mxu3 %v498_v4  ;;  %933 = vmatpush.bf16.msrb.mxu0 %v2140_v26  ;;  %v329_v19 = vsel %vm326_vm3, %v327_v34, %v328_v6  ;;  %v501_v6 = vpack.c.bf16 %v2687_v9, %v2682_v0 }
  0xbb   : > { %818 = vmatmul.bf16.vlgmr.msra.gmra.mxu0 %v489_v38 }
  0xbd   : > { %v2223_v43 = vpop.permute.xlu1 %2222 }
  0xbe   : > { %v2225_v45 = vunpack.i.h.bf16 %v2223_v43  ;;  %v2224_v47 = vunpack.i.l.bf16 %v2223_v43  ;;  %v2248_v43 = vpop.permute.xlu2 %2247 }
  0xc0   : > { %v469_v51 = vsel %vm234_vm0, %v2556_v33, %v2224_v47  ;;  %v470_v53 = vsel %vm234_vm0, %v2562_v36, %v2225_v45  ;;  %v2238_v33 = vpop.permute.xlu0 %2237  ;;  %v465_v36 = vsel %vm234_vm0, %v2576_v46, %v2234_v57  ;;  %v493_v45 = vpack.c.bf16 %v2649_v39, %v2606_v61 }
  0xc1   : > { %v500_v59 = vpack.c.bf16 %v470_v53, %v469_v51  ;;  %v492_v25 = vpack.c.bf16 %v466_v13, %v465_v36  ;;  %v2240_v4 = vunpack.i.h.bf16 %v2238_v33  ;;  %v2239_v31 = vunpack.i.l.bf16 %v2238_v33 }
  0xc2   : > { %v2249_v47 = vunpack.i.l.bf16 %v2248_v43  ;;  %v497_v53 = vpack.c.bf16 %v2679_v63, %v2652_v40  ;;  %v380_v33 = vrot.slane %v2632_v28, 2  ;;  %v381_v36 = vrot.slane %v2634_v29, 2 }
  0xc3   : > { %833 = vmatmul.bf16.gmra.mxu2 %v500_v59  ;;  %v479_v46 = vsel %vm234_vm0, %v2570_v41, %v2239_v31  ;;  %v480_v55 = vsel %vm234_vm0, %v2613_v7, %v2240_v4  ;;  %v2250_v41 = vunpack.i.h.bf16 %v2248_v43 }
  0xc4   : > { %v491_v3 = vpack.c.bf16 %v480_v55, %v479_v46  ;;  %v481_v7 = vsel %vm234_vm0, %v2616_v8, %v2249_v47 }
  0xc5   : > { %v2243_v22 = vpop.permute.xlu1 %2242  ;;  %v482_v48 = vsel %vm234_vm0, %v2445_v11, %v2250_v41 }
  0xc6   : > { %v2245_v24 = vunpack.i.h.bf16 %v2243_v22  ;;  %v2244_v18 = vunpack.i.l.bf16 %v2243_v22  ;;  %v495_v50 = vpack.c.bf16 %v482_v48, %v481_v7  ;;  %v2263_v11 = vpop.permute.xlu2 %2262 }
  0xc7   : > { %v2265_v34 = vunpack.i.h.bf16 %v2263_v11  ;;  %v2264_v40 = vunpack.i.l.bf16 %v2263_v11 }
  0xc8   : > { %v471_v27 = vsel %vm234_vm0, %v329_v19, %v2244_v18  ;;  %v472_v30 = vsel %vm234_vm0, %v2582_v49, %v2245_v24  ;;  %v2253_v38 = vpop.permute.xlu0 %2252 }
  0xc9   : > { %v490_v35 = vpack.c.bf16 %v472_v30, %v471_v27  ;;  %862 = vmatmul.bf16.gmra.mxu3 %v502_v23  ;;  %v2255_v5 = vunpack.i.h.bf16 %v2253_v38  ;;  %v2254_v42 = vunpack.i.l.bf16 %v2253_v38  ;;  %v2860_v30 = vld [vmem:[%s3278_s2] ss:$0 sm:$0xff] }
  0xcb   : > { %847 = vmatmul.bf16.vlgmr.msra.gmra.mxu1 %v490_v35  ;;  %823 = vmatmul.bf16.gmra.mxu0 %v492_v25  ;;  %v473_v49 = vsel %vm234_vm0, %v2606_v61, %v2254_v42  ;;  %v474_v26 = vsel %vm234_vm0, %v2649_v39, %v2255_v5 }
  0xcc   : > { %v494_v44 = vpack.c.bf16 %v474_v26, %v473_v49 }
  0xcd   : > { %v2258_v51 = vpop.permute.xlu1 %2257 }
  0xce   : > { %v2260_v56 = vunpack.i.h.bf16 %v2258_v51  ;;  %v2259_v61 = vunpack.i.l.bf16 %v2258_v51  ;;  %v2869_v51 = vld [vmem:[#allocation3 + $0x8] sm:$0x3] }
  0xd0   : > { %v483_v39 = vsel %vm234_vm0, %v2450_v12, %v2259_v61  ;;  %v484_v8 = vsel %vm234_vm0, %v2592_v54, %v2260_v56  ;;  %v2268_v63 = vpop.permute.xlu0 %2267  ;;  %v486_v12 = vsel %vm234_vm0, %v2670_v58, %v2265_v34 }
  0xd1   : > { %v499_v57 = vpack.c.bf16 %v484_v8, %v483_v39  ;;  %v2270_v37 = vunpack.i.h.bf16 %v2268_v63  ;;  %v2269_v54 = vunpack.i.l.bf16 %v2268_v63 }
  0xd3   : > { %876 = vmatmul.bf16.vlgmr.msrb.gmra.mxu2 %v491_v3  ;;  %v487_v0 = vsel %vm234_vm0, %v2585_v52, %v2269_v54  ;;  %v488_v9 = vsel %vm234_vm0, %v2632_v28, %v2270_v37 }
  0xd9   : > { %905 = vmatmul.bf16.vlgmr.msrb.gmra.mxu3 %v492_v25 }
  0xdb   : > { %852 = vmatmul.bf16.gmra.mxu1 %v494_v44  ;;  %1952 = vmatmul.msk.bf16.vlgmr.msrb.gmra.mxu0 %vm234_vm0, %v493_v45 }
  0xe3   : > { %881 = vmatmul.bf16.gmra.mxu2 %v495_v50  ;;  %v2867_v50 = vld [vmem:[#allocation3] sm:$0xff] }
  0xe4   : > { %v1028_v8 = vrot.slane %v2867_v50, 1 }
  0xe9   : > { %910 = vmatmul.bf16.gmra.mxu3 %v2709_v32  ;;  %v485_v32 = vsel %vm234_vm0, %v2603_v60, %v2264_v40  ;;  %v504_v60 = vpack.c.bf16 %v488_v9, %v487_v0 }
  0xea   : > { %v503_v62 = vpack.c.bf16 %v486_v12, %v485_v32 }
  0xeb   : > { %1953 = vmatmul.msk.bf16.gmra.mxu0 %vm234_vm0, %v497_v53 }
  0xf3   : > { %886 = vmatmul.bf16.gmra.mxu2 %v499_v57  ;;  %v1029_v57 = vrot.slane %v2869_v51, 1 }
  0xf5   : > { %v1030_v12 = vsel %vm301_vm2, %v1028_v8, %v1029_v57 }
  0xf9   : > { %915 = vmatmul.bf16.gmra.mxu3 %v500_v59  ;;  %v382_v59 = vsel %vm326_vm3, %v380_v33, %v381_v36 }
  0xfa   : > { %v505_v13 = vpack.c.bf16 %v382_v59, %v2690_v10 }
  0xfb   : > { %1954 = vmatmul.msk.bf16.gmra.mxu0 %vm234_vm0, %v501_v6 }
 0x103   : > { %891 = vmatmul.bf16.gmra.mxu2 %v503_v62 }
 0x109   : > { %920 = vmatmul.bf16.gmra.mxu3 %v504_v60 }
 0x10b   : > { %1955 = vmatmul.msk.bf16.gmra.mxu0 %vm234_vm0, %v505_v13 }
 0x11b   : > { %v2843_v58 = vpop.f32.mrf.mxu2 }
 0x123   : > { %v2845_v19 = vpop.f32.mrf.mxu2 }
 0x138   : > { %v819_v22 = vpop.f32.mrf.mxu0 }
 0x139   : > { %v820_v31 = vadd.f32 %v2860_v30, %v819_v22 }
 0x13c   : > { %v2847_v29 = vpop.f32.mrf.mxu3 }
 0x140   : > { %v821_v52 = vpop.f32.mrf.mxu0 }
 0x141   : > { %v822_v26 = vadd.f32 %v2860_v30, %v821_v52 }
 0x144   : > { %v2849_v23 = vpop.f32.mrf.mxu3 }
 0x146   : > { %v2851_v28 = vpop.f32.mrf.mxu2 }
 0x148   : > { %v824_v24 = vpop.f32.mrf.mxu0  ;;  %v848_v10 = vpop.f32.mrf.mxu1 }
 0x149   : > { %v849_v55 = vadd.f32 %v848_v10, %v820_v31  ;;  %v825_v53 = vadd.f32 %v2860_v30, %v824_v24 }
 0x14c   : > { %v2853_v18 = vpop.f32.mrf.mxu3 }
 0x14e   : > { %v2855_v25 = vpop.f32.mrf.mxu2 }
 0x150   : > { %v826_v27 = vpop.f32.mrf.mxu0  ;;  %v850_v38 = vpop.f32.mrf.mxu1 }
 0x151   : > { %v851_v45 = vadd.f32 %v850_v38, %v822_v26  ;;  %v827_v60 = vadd.f32 %v2860_v30, %v826_v27 }
 0x154   : > { %v2862_v4 = vpop.f32.mrf.mxu3 }
 0x156   : > { %v877_v35 = vpop.f32.mrf.mxu2 }
 0x157   : > { %v878_v3 = vadd.f32 %v877_v35, %v849_v55 }
 0x158   : > { %v935_v46 = vpop.f32.mrf.mxu0  ;;  %v853_v7 = vpop.f32.mrf.mxu1 }
 0x159   : > { %v854_v6 = vadd.f32 %v853_v7, %v825_v53 }
 0x15c   : > { %v906_v5 = vpop.f32.mrf.mxu3 }
 0x15d   : > { %v907_v42 = vadd.f32 %v906_v5, %v878_v3  ;;  %v830_v3 = vadd.f32 %v2860_v30, %v2843_v58 }
 0x15e   : > { %v879_v49 = vpop.f32.mrf.mxu2 }
 0x15f   : > { %v936_v43 = vadd.f32 %v935_v46, %v907_v42  ;;  %v880_v47 = vadd.f32 %v879_v49, %v851_v45  ;;  %v859_v42 = vadd.f32 %v2847_v29, %v830_v3 }
 0x160   : > { %v937_v44 = vpop.f32.mrf.mxu0  ;;  %v855_v0 = vpop.f32.mrf.mxu1 }
 0x161   : > { %v955_v41 = vmax.f32 %v936_v43, 0.0  ;;  %v856_v52 = vadd.f32 %v855_v0, %v827_v60 }
 0x163   : > { %984 = vst.msk [vmem:[#allocation3 + $0x11] sm:$0xff] %vm234_vm0, %v955_v41 }
 0x164   : > { %v908_v48 = vpop.f32.mrf.mxu3 }
 0x165   : > { %v909_v56 = vadd.f32 %v908_v48, %v880_v47 }
 0x166   : > { %v882_v61 = vpop.f32.mrf.mxu2 }
 0x167   : > { %v938_v39 = vadd.f32 %v937_v44, %v909_v56  ;;  %v883_v32 = vadd.f32 %v882_v61, %v854_v6 }
 0x168   : > { %v940_v11 = vpop.f32.mrf.mxu0 }
 0x169   : > { %v956_v34 = vmax.f32 %v938_v39, 0.0  ;;  %v832_v39 = vadd.f32 %v2860_v30, %v2845_v19 }
 0x16a   : > { %v2874_v40 = vld [vmem:[#allocation3 + $0x10] sm:$0xff]  ;;  %v2876_v63 = vld [vmem:[#allocation3 + $0x18] sm:$0x3] }
 0x16b   : > { %985 = vst.msk [vmem:[#allocation3 + $0x21] sm:$0xff] %vm234_vm0, %v956_v34  ;;  %v1031_v37 = vrot.slane %v2874_v40, 1  ;;  %v1032_v54 = vrot.slane %v2876_v63, 1  ;;  %v861_v57 = vadd.f32 %v2849_v23, %v832_v39  ;;  %v1055_v39 = vrot.slane %v2874_v40, 2 }
 0x16c   : > { %v911_v62 = vpop.f32.mrf.mxu3 }
 0x16d   : > { %v912_v33 = vadd.f32 %v911_v62, %v883_v32  ;;  %v2883_v36 = vsel %vm301_vm2, %v1031_v37, %v1032_v54  ;;  %v835_v32 = vadd.f32 %v2860_v30, %v2851_v28 }
 0x16e   : > { %v884_v9 = vpop.f32.mrf.mxu2  ;;  %v2271_v59 = vpack.i.bf16 %v2883_v36, %v1030_v12 }
 0x16f   : > { %v941_v13 = vadd.f32 %v940_v11, %v912_v33  ;;  %v885_v10 = vadd.f32 %v884_v9, %v856_v52 }
 0x170   : > { %v942_v22 = vpop.f32.mrf.mxu0  ;;  %2272 = vrot.lane.b32.xlu1 %v2271_v59, %s2347_s24  ;;  %v864_v59 = vadd.f32 %v2853_v18, %v835_v32 }
 0x171   : > { %v957_v24 = vmax.f32 %v941_v13, 0.0 }
 0x172   : > { %v2889_v55 = vld [vmem:[#allocation3 + $0x20] sm:$0xff]  ;;  %v2891_v38 = vld [vmem:[#allocation3 + $0x28] sm:$0x3] }
 0x173   : > { %986 = vst.msk [vmem:[#allocation3 + $0x31] sm:$0xff] %vm234_vm0, %v957_v24  ;;  %v1034_v26 = vrot.slane %v2889_v55, 1  ;;  %v1035_v43 = vrot.slane %v2891_v38, 1  ;;  %v2291_v19 = vpack.i.bf16 %v2889_v55, %v2874_v40 }
 0x174   : > { %v913_v31 = vpop.f32.mrf.mxu3 }
 0x175   : > { %v914_v35 = vadd.f32 %v913_v31, %v885_v10  ;;  %v2903_v53 = vsel %vm301_vm2, %v1034_v26, %v1035_v43 }
 0x176   : > { %v887_v46 = vpop.f32.mrf.mxu2 }
 0x177   : > { %v943_v27 = vadd.f32 %v942_v22, %v914_v35  ;;  %v888_v41 = vadd.f32 %v887_v46, %v859_v42 }
 0x178   : > { %v945_v5 = vpop.f32.mrf.mxu0 }
 0x179   : > { %v958_v49 = vmax.f32 %v943_v27, 0.0 }
 0x17a   : > { %v2898_v44 = vld [vmem:[#allocation3 + $0x30] sm:$0xff]  ;;  %v999_v45 = vld [vmem:[#allocation3 + $0x38] sm:$0x3] }
 0x17b   : > { %987 = vst.msk [vmem:[#allocation3 + $0x41] sm:$0xff] %vm234_vm0, %v958_v49  ;;  %v1037_v47 = vrot.slane %v2898_v44, 1  ;;  %v1038_v7 = vrot.slane %v999_v45, 1  ;;  %v1061_v60 = vrot.slane %v2898_v44, 2  ;;  %v1062_v52 = vrot.slane %v999_v45, 2 }
 0x17c   : > { %v916_v48 = vpop.f32.mrf.mxu3 }
 0x17d   : > { %v917_v58 = vadd.f32 %v916_v48, %v888_v41  ;;  %v2906_v29 = vsel %vm301_vm2, %v1037_v47, %v1038_v7  ;;  %v2943_v26 = vsel %vm326_vm3, %v1061_v60, %v1062_v52  ;;  %v837_v41 = vadd.f32 %v2860_v30, %v2855_v25  ;;  %v2150_v60 = vld [vmem:[%s3279_s3 + $0x30] sm:$0xff] }
 0x17e   : > { %v889_v56 = vpop.f32.mrf.mxu2  ;;  %v2276_v61 = vpack.i.bf16 %v2906_v29, %v2903_v53  ;;  %v1058_v7 = vrot.slane %v2889_v55, 2  ;;  %v1059_v48 = vrot.slane %v2891_v38, 2  ;;  %v2996_v52 = vld [vmem:[#allocation3 + $0x90] sm:$0xff] }
 0x17f   : > { %v946_v8 = vadd.f32 %v945_v5, %v917_v58  ;;  %v890_v34 = vadd.f32 %v889_v56, %v861_v57  ;;  %v866_v56 = vadd.f32 %v2862_v4, %v837_v41  ;;  %v1105_v41 = vrot.slane %v2996_v52, 2 }
 0x180   : > { %2277 = vrot.lane.b32.xlu2 %v2276_v61, %s2347_s24  ;;  %v947_v6 = vpop.f32.mrf.mxu0  ;;  %v2960_v25 = vsel %vm326_vm3, %v1058_v7, %v1059_v48 }
 0x181   : > { %v959_v11 = vmax.f32 %v946_v8, 0.0  ;;  %v1056_v8 = vrot.slane %v2876_v63, 2 }
 0x182   : > { %v2917_v37 = vld [vmem:[#allocation3 + $0x40] sm:$0xff]  ;;  %v1001_v54 = vld [vmem:[#allocation3 + $0x48] sm:$0x3] }
 0x183   : > { %988 = vst.msk [vmem:[#allocation3 + $0x51] sm:$0xff] %vm234_vm0, %v959_v11  ;;  %v1064_v23 = vrot.slane %v2917_v37, 2  ;;  %v1065_v9 = vrot.slane %v1001_v54, 2  ;;  %v1040_v13 = vrot.slane %v2917_v37, 1  ;;  %v1041_v22 = vrot.slane %v1001_v54, 1  ;;  %v2151_v54 = vld [vmem:[%s3279_s3 + $0x38] sm:$0xff] }
 0x184   : > { %v918_v12 = vpop.f32.mrf.mxu3  ;;  %v2963_v11 = vsel %vm326_vm3, %v1055_v39, %v1056_v8  ;;  %1535 = vmatpush.bf16.msrb.mxu1 %v2151_v54  ;;  %v2148_v39 = vld [vmem:[%s3279_s3 + $0x20] sm:$0xff]  ;;  %v2301_v54 = vpack.i.bf16 %v2917_v37, %v2898_v44 }
 0x185   : > { %v919_v62 = vadd.f32 %v918_v12, %v890_v34  ;;  %v2934_v46 = vsel %vm326_vm3, %v1064_v23, %v1065_v9  ;;  %v2937_v42 = vsel %vm301_vm2, %v1040_v13, %v1041_v22  ;;  %v2296_v4 = vpack.i.bf16 %v2960_v25, %v2963_v11  ;;  %v2175_v12 = vld [vmem:[%s3279_s3 + $0xf8] sm:$0xff]  ;;  %v2158_v22 = vld [vmem:[%s3279_s3 + $0x70] sm:$0xff] }
 0x186   : > { %v892_v33 = vpop.f32.mrf.mxu2  ;;  %v2306_v45 = vpack.i.bf16 %v2934_v46, %v2943_v26  ;;  %v2159_v23 = vld [vmem:[%s3279_s3 + $0x78] sm:$0xff]  ;;  %1622 = vmatpush.bf16.msra.mxu0 %v2175_v12 }
 0x187   : > { %v948_v0 = vadd.f32 %v947_v6, %v919_v62  ;;  %v893_v31 = vadd.f32 %v892_v33, %v864_v59  ;;  %1564 = vmatpush.bf16.msra.mxu2 %v2159_v23 }
 0x188   : > { %2292 = vrot.lane.b32.xlu2 %v2291_v19, %s2347_s24  ;;  %v950_v3 = vpop.f32.mrf.mxu0  ;;  %1536 = vmatpush.bf16.msrb.mxu1 %v2150_v60 }
 0x189   : > { %v960_v28 = vmax.f32 %v948_v0, 0.0  ;;  %v2174_v0 = vld [vmem:[%s3279_s3 + $0xf0] sm:$0xff] }
 0x18a   : > { %v2926_v24 = vld [vmem:[#allocation3 + $0x50] sm:$0xff]  ;;  %v2928_v10 = vld [vmem:[#allocation3 + $0x58] sm:$0x3]  ;;  %1623 = vmatpush.bf16.msra.mxu0 %v2174_v0 }
 0x18b   : > { %989 = vst.msk [vmem:[#allocation3 + $0x61] sm:$0xff] %vm234_vm0, %v960_v28  ;;  %v1043_v35 = vrot.slane %v2926_v24, 1  ;;  %v1044_v18 = vrot.slane %v2928_v10, 1  ;;  %1565 = vmatpush.bf16.msra.mxu2 %v2158_v22  ;;  %v1067_v60 = vrot.slane %v2926_v24, 2 }
 0x18c   : > { %v921_v27 = vpop.f32.mrf.mxu3 }
 0x18d   : > { %v922_v5 = vadd.f32 %v921_v27, %v893_v31  ;;  %v2940_v49 = vsel %vm301_vm2, %v1043_v35, %v1044_v18  ;;  %v2998_v31 = vld [vmem:[#allocation3 + $0x98] sm:$0x3] }
 0x18e   : > { %v2281_v43 = vpack.i.bf16 %v2940_v49, %v2937_v42  ;;  %v894_v58 = vpop.f32.mrf.mxu2 }
 0x18f   : > { %v951_v47 = vadd.f32 %v950_v3, %v922_v5  ;;  %v895_v57 = vadd.f32 %v894_v58, %v866_v56  ;;  %v2173_v5 = vld [vmem:[%s3279_s3 + $0xe8] sm:$0xff]  ;;  %v2172_v58 = vld [vmem:[%s3279_s3 + $0xe0] sm:$0xff] }
 0x190   : > { %2282 = vrot.lane.b32.xlu0 %v2281_v43, %s2347_s24  ;;  %2307 = vrot.lane.b32.xlu2 %v2306_v45, %s2347_s24  ;;  %v952_v6 = vpop.f32.mrf.mxu0  ;;  %v2149_v43 = vld [vmem:[%s3279_s3 + $0x28] sm:$0xff] }
 0x191   : > { %v961_v61 = vmax.f32 %v951_v47, 0.0  ;;  %v2157_v45 = vld [vmem:[%s3279_s3 + $0x68] sm:$0xff]  ;;  %v1106_v47 = vrot.slane %v2998_v31, 2  ;;  %1624 = vmatpush.bf16.msra.mxu0 %v2173_v5  ;;  %1537 = vmatpush.bf16.msrb.mxu1 %v2149_v43  ;;  %v1102_v43 = vrot.slane %v2996_v52, 1 }
 0x192   : > { %v2967_v34 = vld [vmem:[#allocation3 + $0x60] sm:$0xff]  ;;  %v2969_v32 = vld [vmem:[#allocation3 + $0x68] sm:$0x3]  ;;  %1566 = vmatpush.bf16.msra.mxu2 %v2157_v45  ;;  %v1103_v45 = vrot.slane %v2998_v31, 1  ;;  %v2154_v31 = vld [vmem:[%s3279_s3 + $0x50] sm:$0xff] }
 0x193   : > { %990 = vst.msk [vmem:[#allocation3 + $0x71] sm:$0xff] %vm234_vm0, %v961_v61  ;;  %v1046_v33 = vrot.slane %v2967_v34, 1  ;;  %v1047_v19 = vrot.slane %v2969_v32, 1  ;;  %v2311_v3 = vpack.i.bf16 %v2967_v34, %v2926_v24  ;;  %v1070_v0 = vrot.slane %v2967_v34, 2 }
 0x194   : > { %v923_v30 = vpop.f32.mrf.mxu3  ;;  %v1071_v23 = vrot.slane %v2969_v32, 2 }
 0x195   : > { %v924_v38 = vadd.f32 %v923_v30, %v895_v57  ;;  %v3001_v35 = vsel %vm301_vm2, %v1046_v33, %v1047_v19  ;;  %1625 = vmatpush.bf16.msra.mxu0 %v2172_v58  ;;  %1538 = vmatpush.bf16.msrb.mxu1 %v2148_v39  ;;  %v2147_v33 = vld [vmem:[%s3279_s3 + $0x18] sm:$0xff]  ;;  %v2168_v58 = vld [vmem:[%s3279_s3 + $0xc0] sm:$0xff]  ;;  %v2145_v39 = vld [vmem:[%s3279_s3 + $0x8] sm:$0xff] }
 0x196   : > { %v3073_v32 = vsel %vm326_vm3, %v1070_v0, %v1071_v23  ;;  %v2163_v0 = vld [vmem:[%s3279_s3 + $0x98] sm:$0xff] }
 0x197   : > { %v953_v63 = vadd.f32 %v952_v6, %v924_v38  ;;  %v2156_v38 = vld [vmem:[%s3279_s3 + $0x60] sm:$0xff]  ;;  %v3039_v6 = vsel %vm326_vm3, %v1105_v41, %v1106_v47  ;;  %v1104_v47 = vsel %vm301_vm2, %v1102_v43, %v1103_v45 }
 0x198   : > { %2297 = vrot.lane.b32.xlu0 %v2296_v4, %s2347_s24  ;;  %1567 = vmatpush.bf16.msra.mxu2 %v2156_v38  ;;  %v2166_v38 = vld [vmem:[%s3279_s3 + $0xb0] sm:$0xff] }
 0x199   : > { %v962_v62 = vmax.f32 %v953_v63, 0.0  ;;  %1539 = vmatpush.bf16.msrb.mxu1 %v2147_v33  ;;  %v2178_v33 = vld [vmem:[%s3279_s3 + $0x110] sm:$0xff] }
 0x19a   : > { %v2986_v9 = vld [vmem:[#allocation3 + $0x70] sm:$0xff]  ;;  %v1007_v59 = vld [vmem:[#allocation3 + $0x78] sm:$0x3] }
 0x19b   : > { %991 = vst.msk [vmem:[#allocation3 + $0x81] sm:$0xff] %vm234_vm0, %v962_v62  ;;  %v1049_v28 = vrot.slane %v2986_v9, 1  ;;  %v1050_v13 = vrot.slane %v1007_v59, 1  ;;  %v1073_v7 = vrot.slane %v2986_v9, 2  ;;  %v1074_v48 = vrot.slane %v1007_v59, 2  ;;  %v2171_v62 = vld [vmem:[%s3279_s3 + $0xd8] sm:$0xff] }
 0x19c   : > { %v2155_v59 = vld [vmem:[%s3279_s3 + $0x58] sm:$0xff]  ;;  %1626 = vmatpush.bf16.msra.mxu0 %v2171_v62  ;;  %v2164_v62 = vld [vmem:[%s3279_s3 + $0xa0] sm:$0xff] }
 0x19d   : > { %v3004_v18 = vsel %vm301_vm2, %v1049_v28, %v1050_v13  ;;  %v3043_v4 = vsel %vm326_vm3, %v1073_v7, %v1074_v48  ;;  %v1068_v28 = vrot.slane %v2928_v10, 2  ;;  %v2170_v13 = vld [vmem:[%s3279_s3 + $0xd0] sm:$0xff]  ;;  %1568 = vmatpush.bf16.msra.mxu2 %v2155_v59  ;;  %v2169_v10 = vld [vmem:[%s3279_s3 + $0xc8] sm:$0xff] }
 0x19e   : > { %v2286_v27 = vpack.i.bf16 %v3004_v18, %v3001_v35  ;;  %v2146_v48 = vld [vmem:[%s3279_s3 + $0x10] sm:$0xff] }
 0x19f   : > { %v3076_v22 = vsel %vm326_vm3, %v1067_v60, %v1068_v28  ;;  %1540 = vmatpush.bf16.msrb.mxu1 %v2146_v48 }
 0x1a0   : > { %2312 = vrot.lane.b32.xlu0 %v2311_v3, %s2347_s24  ;;  %2287 = vrot.lane.b32.xlu1 %v2286_v27, %s2347_s24  ;;  %v2316_v3 = vpack.i.bf16 %v3073_v32, %v3076_v22 }
 0x1a1   : > { %1627 = vmatpush.bf16.msra.mxu0 %v2170_v13  ;;  %1569 = vmatpush.bf16.msra.mxu2 %v2154_v31 }
 0x1a2   : > { %v3027_v56 = vld [vmem:[#allocation3 + $0x80] sm:$0xff]  ;;  %v1009_v61 = vld [vmem:[#allocation3 + $0x88] sm:$0x3] }
 0x1a3   : > { %v2321_v8 = vpack.i.bf16 %v3027_v56, %v2986_v9  ;;  %v1097_v57 = vrot.slane %v3027_v56, 2  ;;  %v1098_v30 = vrot.slane %v1009_v61, 2  ;;  %v1086_v27 = vrot.slane %v3027_v56, 1  ;;  %1541 = vmatpush.bf16.msrb.mxu1 %v2145_v39 }
 0x1a4   : > { %v1087_v5 = vrot.slane %v1009_v61, 1  ;;  %v2167_v61 = vld [vmem:[%s3279_s3 + $0xb8] sm:$0xff] }
 0x1a5   : > { %2322 = vrot.lane.b32.xlu2 %v2321_v8, %s2347_s24  ;;  %v3046_v63 = vsel %vm326_vm3, %v1097_v57, %v1098_v30  ;;  %1628 = vmatpush.bf16.msra.mxu0 %v2169_v10  ;;  %v2153_v8 = vld [vmem:[%s3279_s3 + $0x48] sm:$0xff]  ;;  %v2144_v57 = vld [vmem:[%s3279_s3] sm:$0xff] }
 0x1a6   : > { %v2326_v12 = vpack.i.bf16 %v3046_v63, %v3043_v4  ;;  %v1230_v19 = vpack.c.bf16 %v3039_v6, %v3046_v63  ;;  %v3088_v41 = vsel %vm301_vm2, %v1086_v27, %v1087_v5  ;;  %1593 = vmatpush.bf16.msra.mxu3 %v2167_v61  ;;  %1570 = vmatpush.bf16.msra.mxu2 %v2153_v8  ;;  %v2152_v30 = vld [vmem:[%s3279_s3 + $0x40] sm:$0xff]  ;;  %v1052_v27 = vrot.slane %v2867_v50, 2 }
 0x1a7   : > { %v2331_v7 = vpack.i.bf16 %v1104_v47, %v3088_v41  ;;  %1542 = vmatpush.bf16.msrb.mxu1 %v2144_v57  ;;  %v2177_v57 = vld [vmem:[%s3279_s3 + $0x108] sm:$0xff] }
 0x1a8   : > { %2327 = vrot.lane.b32.xlu0 %v2326_v12, %s2347_s24  ;;  %2302 = vrot.lane.b32.xlu1 %v2301_v54, %s2347_s24  ;;  %v2179_v12 = vld [vmem:[%s3279_s3 + $0x118] sm:$0xff]  ;;  %v2165_v54 = vld [vmem:[%s3279_s3 + $0xa8] sm:$0xff] }
 0x1a9   : > { %1629 = vmatpush.bf16.msra.mxu0 %v2168_v58 }
 0x1aa   : > { %1571 = vmatpush.bf16.msra.mxu2 %v2152_v30  ;;  %1594 = vmatpush.bf16.msra.mxu3 %v2166_v38  ;;  %v2161_v30 = vld [vmem:[%s3279_s3 + $0x88] sm:$0xff] }
 0x1ab   : > { %1655 = vmatpush.bf16.msra.mxu1 %v2179_v12 }
 0x1ae   : > { %1595 = vmatpush.bf16.msra.mxu3 %v2165_v54 }
 0x1af   : > { %1656 = vmatpush.bf16.msra.mxu1 %v2178_v33 }
 0x1b0   : > { %2317 = vrot.lane.b32.xlu1 %v2316_v3, %s2347_s24  ;;  %v1053_v3 = vrot.slane %v2869_v51, 2 }
 0x1b2   : > { %1596 = vmatpush.bf16.msra.mxu3 %v2164_v62  ;;  %v1054_v5 = vsel %vm326_vm3, %v1052_v27, %v1053_v3 }
 0x1b3   : > { %1657 = vmatpush.bf16.msra.mxu1 %v2177_v57 }
 0x1b6   : > { %1597 = vmatpush.bf16.msra.mxu3 %v2163_v0 }
 0x1b8   : > { %2332 = vrot.lane.b32.xlu1 %v2331_v7, %s2347_s24 }
 0x1da   : > { %v2278_v23 = vpop.permute.xlu2 %2277 }
 0x1db   : > { %v2280_v59 = vunpack.i.h.bf16 %v2278_v23  ;;  %v2279_v60 = vunpack.i.l.bf16 %v2278_v23 }
 0x1dd   : > { %v1191_v28 = vsel %vm234_vm0, %v2898_v44, %v2280_v59  ;;  %v1190_v13 = vsel %vm234_vm0, %v2889_v55, %v2279_v60  ;;  %v2162_v44 = vld [vmem:[%s3279_s3 + $0x90] sm:$0xff] }
 0x1de   : > { %v1217_v10 = vpack.c.bf16 %v1191_v28, %v1190_v13  ;;  %1598 = vmatpush.bf16.msra.mxu3 %v2162_v44 }
 0x1e0   : > { %1630 = vmatmul.bf16.vlgmr.msra.gmra.mxu0 %v1217_v10 }
 0x1e2   : > { %v2293_v43 = vpop.permute.xlu2 %2292  ;;  %v2273_v45 = vpop.permute.xlu1 %2272  ;;  %1599 = vmatpush.bf16.msra.mxu3 %v2161_v30 }
 0x1e3   : > { %v2295_v47 = vunpack.i.h.bf16 %v2293_v43  ;;  %v2294_v7 = vunpack.i.l.bf16 %v2293_v43  ;;  %v2275_v48 = vunpack.i.h.bf16 %v2273_v45  ;;  %v2274_v31 = vunpack.i.l.bf16 %v2273_v45 }
 0x1e5   : > { %v1196_v55 = vsel %vm234_vm0, %v1054_v5, %v2294_v7  ;;  %v1197_v51 = vsel %vm234_vm0, %v2963_v11, %v2295_v47  ;;  %v1188_v58 = vsel %vm234_vm0, %v2867_v50, %v2274_v31  ;;  %v1189_v61 = vsel %vm234_vm0, %v2874_v40, %v2275_v48  ;;  %v2160_v50 = vld [vmem:[%s3279_s3 + $0x80] sm:$0xff] }
 0x1e6   : > { %v1215_v39 = vpack.c.bf16 %v1197_v51, %v1196_v55  ;;  %v1214_v8 = vpack.c.bf16 %v1189_v61, %v1188_v58  ;;  %1600 = vmatpush.bf16.msra.mxu3 %v2160_v50  ;;  %v2176_v40 = vld [vmem:[%s3279_s3 + $0x100] sm:$0xff]  ;;  %v1218_v61 = vpack.c.bf16 %v2943_v26, %v2960_v25 }
 0x1e7   : > { %1658 = vmatpush.bf16.msra.mxu1 %v2176_v40 }
 0x1e8   : > { %1543 = vmatmul.bf16.vlgmr.msrb.gmra.mxu1 %v1214_v8  ;;  %1572 = vmatmul.bf16.vlgmr.msra.gmra.mxu2 %v1215_v39 }
 0x1ea   : > { %v2308_v27 = vpop.permute.xlu2 %2307 }
 0x1eb   : > { %v2310_v45 = vunpack.i.h.bf16 %v2308_v27  ;;  %v2309_v47 = vunpack.i.l.bf16 %v2308_v27 }
 0x1ed   : > { %v1206_v48 = vsel %vm234_vm0, %v2906_v29, %v2309_v47  ;;  %v1207_v31 = vsel %vm234_vm0, %v2937_v42, %v2310_v45 }
 0x1ee   : > { %v1220_v55 = vpack.c.bf16 %v1207_v31, %v1206_v48 }
 0x1f8   : > { %1548 = vmatmul.bf16.gmra.mxu1 %v1217_v10 }
 0x202   : > { %v2283_v11 = vpop.permute.xlu0 %2282 }
 0x203   : > { %v2285_v38 = vunpack.i.h.bf16 %v2283_v11  ;;  %v2284_v12 = vunpack.i.l.bf16 %v2283_v11 }
 0x205   : > { %v1192_v54 = vsel %vm234_vm0, %v2917_v37, %v2284_v12  ;;  %v1193_v62 = vsel %vm234_vm0, %v2926_v24, %v2285_v38 }
 0x206   : > { %v1221_v33 = vpack.c.bf16 %v1193_v62, %v1192_v54 }
 0x208   : > { %1553 = vmatmul.bf16.gmra.mxu1 %v1221_v33  ;;  %1635 = vmatmul.bf16.gmra.mxu0 %v1221_v33 }
 0x20a   : > { %v2298_v0 = vpop.permute.xlu0 %2297 }
 0x20b   : > { %v2300_v23 = vunpack.i.h.bf16 %v2298_v0  ;;  %v2299_v59 = vunpack.i.l.bf16 %v2298_v0  ;;  %v2323_v0 = vpop.permute.xlu2 %2322 }
 0x20d   : > { %v1205_v60 = vsel %vm234_vm0, %v2903_v53, %v2300_v23  ;;  %v1204_v28 = vsel %vm234_vm0, %v2883_v36, %v2299_v59  ;;  %v2325_v59 = vunpack.i.h.bf16 %v2323_v0 }
 0x20e   : > { %v1216_v13 = vpack.c.bf16 %v1205_v60, %v1204_v28  ;;  %v2324_v60 = vunpack.i.l.bf16 %v2323_v0 }
 0x210   : > { %1601 = vmatmul.bf16.vlgmr.msra.gmra.mxu3 %v1216_v13 }
 0x212   : > { %v2288_v3 = vpop.permute.xlu1 %2287  ;;  %v2313_v58 = vpop.permute.xlu0 %2312 }
 0x213   : > { %v2290_v10 = vunpack.i.h.bf16 %v2288_v3  ;;  %v2289_v37 = vunpack.i.l.bf16 %v2288_v3  ;;  %v2315_v39 = vunpack.i.h.bf16 %v2313_v58  ;;  %v2314_v29 = vunpack.i.l.bf16 %v2313_v58 }
 0x215   : > { %v1194_v24 = vsel %vm234_vm0, %v2967_v34, %v2289_v37  ;;  %v1195_v5 = vsel %vm234_vm0, %v2986_v9, %v2290_v10  ;;  %v1200_v30 = vsel %vm234_vm0, %v2934_v46, %v2314_v29  ;;  %v1201_v50 = vsel %vm234_vm0, %v3076_v22, %v2315_v39 }
 0x216   : > { %v1225_v43 = vpack.c.bf16 %v1195_v5, %v1194_v24  ;;  %v1223_v54 = vpack.c.bf16 %v1201_v50, %v1200_v30 }
 0x218   : > { %1558 = vmatmul.bf16.gmra.mxu1 %v1225_v43  ;;  %1640 = vmatmul.bf16.gmra.mxu0 %v1225_v43 }
 0x21a   : > { %v2303_v53 = vpop.permute.xlu1 %2302  ;;  %v2328_v23 = vpop.permute.xlu0 %2327 }
 0x21b   : > { %v2305_v7 = vunpack.i.h.bf16 %v2303_v53  ;;  %v2304_v36 = vunpack.i.l.bf16 %v2303_v53  ;;  %v2329_v28 = vunpack.i.l.bf16 %v2328_v23 }
 0x21d   : > { %v1198_v34 = vsel %vm234_vm0, %v2960_v25, %v2304_v36  ;;  %v1199_v9 = vsel %vm234_vm0, %v2943_v26, %v2305_v7  ;;  %v1210_v13 = vsel %vm234_vm0, %v3004_v18, %v2329_v28 }
 0x21e   : > { %v1219_v44 = vpack.c.bf16 %v1199_v9, %v1198_v34 }
 0x220   : > { %1577 = vmatmul.bf16.gmra.mxu2 %v1219_v44  ;;  %1606 = vmatmul.bf16.gmra.mxu3 %v1220_v55 }
 0x222   : > { %v2318_v51 = vpop.permute.xlu1 %2317 }
 0x223   : > { %v2320_v8 = vunpack.i.h.bf16 %v2318_v51  ;;  %v2319_v57 = vunpack.i.l.bf16 %v2318_v51 }
 0x225   : > { %v1208_v38 = vsel %vm234_vm0, %v2940_v49, %v2319_v57  ;;  %v1209_v26 = vsel %vm234_vm0, %v3001_v35, %v2320_v8  ;;  %v1222_v49 = vpack.c.bf16 %v3076_v22, %v2934_v46  ;;  %v2330_v35 = vunpack.i.h.bf16 %v2328_v23 }
 0x226   : > { %v1224_v62 = vpack.c.bf16 %v1209_v26, %v1208_v38  ;;  %v1226_v22 = vpack.c.bf16 %v3043_v4, %v3073_v32 }
 0x227   : > { %v1211_v3 = vsel %vm234_vm0, %v3088_v41, %v2330_v35 }
 0x228   : > { %2100 = vmatmul.msk.bf16.vlgmr.msra.gmra.mxu1 %vm234_vm0, %v1218_v61  ;;  %v1228_v46 = vpack.c.bf16 %v1211_v3, %v1210_v13 }
 0x22a   : > { %v2333_v42 = vpop.permute.xlu1 %2332 }
 0x22b   : > { %v2335_v40 = vunpack.i.h.bf16 %v2333_v42  ;;  %v2334_v11 = vunpack.i.l.bf16 %v2333_v42 }
 0x22d   : > { %v1212_v25 = vsel %vm234_vm0, %v3027_v56, %v2334_v11  ;;  %v1213_v12 = vsel %vm234_vm0, %v2996_v52, %v2335_v40  ;;  %v1202_v52 = vsel %vm234_vm0, %v3073_v32, %v2324_v60  ;;  %v1203_v56 = vsel %vm234_vm0, %v3043_v4, %v2325_v59  ;;  %v3222_v4 = vld [vmem:[%s3280_s4] ss:$0 sm:$0xff] }
 0x22e   : > { %v1229_v33 = vpack.c.bf16 %v1213_v12, %v1212_v25  ;;  %v1227_v10 = vpack.c.bf16 %v1203_v56, %v1202_v52 }
 0x230   : > { %1582 = vmatmul.bf16.gmra.mxu2 %v1223_v54  ;;  %1611 = vmatmul.bf16.gmra.mxu3 %v1224_v62 }
 0x231   : > { %1645 = vmatmul.bf16.gmra.mxu0 %v1229_v33 }
 0x238   : > { %2101 = vmatmul.msk.bf16.gmra.mxu1 %vm234_vm0, %v1222_v49 }
 0x240   : > { %1587 = vmatmul.bf16.gmra.mxu2 %v1227_v10  ;;  %1616 = vmatmul.bf16.gmra.mxu3 %v1228_v46 }
 0x248   : > { %2102 = vmatmul.msk.bf16.gmra.mxu1 %vm234_vm0, %v1226_v22 }
 0x258   : > { %2103 = vmatmul.msk.bf16.gmra.mxu1 %vm234_vm0, %v1230_v19 }
 0x25d   : > { %v1631_v32 = vpop.f32.mrf.mxu0 }
 0x265   : > { %v1544_v37 = vpop.f32.mrf.mxu1  ;;  %v1633_v48 = vpop.f32.mrf.mxu0 }
 0x266   : > { %v1545_v63 = vadd.f32 %v3222_v4, %v1544_v37 }
 0x26b   : > { %v1573_v43 = vpop.f32.mrf.mxu2 }
 0x26c   : > { %v1574_v7 = vadd.f32 %v1573_v43, %v1545_v63 }
 0x26d   : > { %v1546_v27 = vpop.f32.mrf.mxu1 }
 0x26e   : > { %v1547_v34 = vadd.f32 %v3222_v4, %v1546_v27 }
 0x273   : > { %v1575_v53 = vpop.f32.mrf.mxu2 }
 0x274   : > { %v1576_v51 = vadd.f32 %v1575_v53, %v1547_v34 }
 0x275   : > { %v1549_v18 = vpop.f32.mrf.mxu1 }
 0x276   : > { %v1550_v29 = vadd.f32 %v3222_v4, %v1549_v18 }
 0x27d   : > { %v1551_v24 = vpop.f32.mrf.mxu1 }
 0x27e   : > { %v1552_v12 = vadd.f32 %v3222_v4, %v1551_v24 }
 0x285   : > { %v1554_v5 = vpop.f32.mrf.mxu1  ;;  %v1636_v57 = vpop.f32.mrf.mxu0 }
 0x286   : > { %v1555_v52 = vadd.f32 %v3222_v4, %v1554_v5 }
 0x28d   : > { %v1556_v41 = vpop.f32.mrf.mxu1  ;;  %v1638_v23 = vpop.f32.mrf.mxu0 }
 0x28e   : > { %v1557_v24 = vadd.f32 %v3222_v4, %v1556_v41 }
 0x293   : > { %v1602_v45 = vpop.f32.mrf.mxu3 }
 0x294   : > { %v1603_v36 = vadd.f32 %v1602_v45, %v1574_v7 }
 0x295   : > { %v3217_v47 = vpop.f32.mrf.mxu1  ;;  %v1641_v37 = vpop.f32.mrf.mxu0 }
 0x296   : > { %v1632_v9 = vadd.f32 %v1631_v32, %v1603_v36 }
 0x29b   : > { %v1604_v6 = vpop.f32.mrf.mxu3 }
 0x29c   : > { %v1605_v61 = vadd.f32 %v1604_v6, %v1576_v51 }
 0x29d   : > { %v3225_v19 = vpop.f32.mrf.mxu1 }
 0x29e   : > { %v1634_v50 = vadd.f32 %v1633_v48, %v1605_v61  ;;  %v1643_v48 = vpop.f32.mrf.mxu0 }
 0x2a3   : > { %v1578_v31 = vpop.f32.mrf.mxu2  ;;  %v1607_v44 = vpop.f32.mrf.mxu3 }
 0x2a4   : > { %v1579_v30 = vadd.f32 %v1578_v31, %v1550_v29  ;;  %v1560_v31 = vadd.f32 %v3222_v4, %v3217_v47 }
 0x2a5   : > { %v1660_v55 = vpop.f32.mrf.mxu1 }
 0x2a6   : > { %v1661_v58 = vadd.f32 %v1660_v55, %v1632_v9  ;;  %v1608_v26 = vadd.f32 %v1607_v44, %v1579_v30 }
 0x2a8   : > { %v1680_v39 = vadd.f32 %v1661_v58, %v2504_v14  ;;  %v1637_v0 = vadd.f32 %v1636_v57, %v1608_v26 }
 0x2aa   : > { %v1688_v8 = vmax.f32 %v1680_v39, 0.0 }
 0x2ab   : > { %v1580_v42 = vpop.f32.mrf.mxu2  ;;  %v1609_v38 = vpop.f32.mrf.mxu3 }
 0x2ac   : > { %1704 = vrot.lane.b32.xlu2 %v1688_v8, %s2347_s24  ;;  %v1581_v33 = vadd.f32 %v1580_v42, %v1552_v12  ;;  %v1562_v8 = vadd.f32 %v3222_v4, %v3225_v19 }
 0x2ad   : > { %v1662_v40 = vpop.f32.mrf.mxu1 }
 0x2ae   : > { %v1663_v11 = vadd.f32 %v1662_v40, %v1634_v50  ;;  %v1610_v60 = vadd.f32 %v1609_v38, %v1581_v33  ;;  %v1646_v39 = vpop.f32.mrf.mxu0 }
 0x2b0   : > { %v1681_v25 = vadd.f32 %v1663_v11, %v2519_v17  ;;  %v1639_v3 = vadd.f32 %v1638_v23, %v1610_v60 }
 0x2b2   : > { %v1689_v54 = vmax.f32 %v1681_v25, 0.0 }
 0x2b3   : > { %v1583_v62 = vpop.f32.mrf.mxu2  ;;  %v1612_v28 = vpop.f32.mrf.mxu3 }
 0x2b4   : > { %1706 = vrot.lane.b32.xlu0 %v1689_v54, %s2347_s24  ;;  %v1584_v13 = vadd.f32 %v1583_v62, %v1555_v52 }
 0x2b5   : > { %v1665_v49 = vpop.f32.mrf.mxu1 }
 0x2b6   : > { %v1666_v59 = vadd.f32 %v1665_v49, %v1637_v0  ;;  %v1613_v27 = vadd.f32 %v1612_v28, %v1584_v13  ;;  %v1648_v25 = vpop.f32.mrf.mxu0 }
 0x2b8   : > { %v1682_v35 = vadd.f32 %v1666_v59, %v2528_v20  ;;  %v1642_v5 = vadd.f32 %v1641_v37, %v1613_v27 }
 0x2ba   : > { %v1690_v56 = vmax.f32 %v1682_v35, 0.0 }
 0x2bb   : > { %v1585_v10 = vpop.f32.mrf.mxu2  ;;  %v1614_v45 = vpop.f32.mrf.mxu3 }
 0x2bc   : > { %1708 = vrot.lane.b32.xlu1 %v1690_v56, %s2347_s24  ;;  %v1586_v32 = vadd.f32 %v1585_v10, %v1557_v24 }
 0x2bd   : > { %v1667_v46 = vpop.f32.mrf.mxu1 }
 0x2be   : > { %v1668_v22 = vadd.f32 %v1667_v46, %v1639_v3  ;;  %v1615_v7 = vadd.f32 %v1614_v45, %v1586_v32 }
 0x2c0   : > { %v1683_v18 = vadd.f32 %v1668_v22, %v2407_v1  ;;  %v1644_v41 = vadd.f32 %v1643_v48, %v1615_v7 }
 0x2c2   : > { %v1691_v43 = vmax.f32 %v1683_v18, 0.0 }
 0x2c3   : > { %v1588_v63 = vpop.f32.mrf.mxu2  ;;  %v1617_v44 = vpop.f32.mrf.mxu3 }
 0x2c4   : > { %1710 = vrot.lane.b32.xlu2 %v1691_v43, %s2347_s24  ;;  %v1589_v9 = vadd.f32 %v1588_v63, %v1560_v31 }
 0x2c5   : > { %v1670_v53 = vpop.f32.mrf.mxu1 }
 0x2c6   : > { %v1671_v6 = vadd.f32 %v1670_v53, %v1642_v5  ;;  %v1618_v58 = vadd.f32 %v1617_v44, %v1589_v9 }
 0x2c8   : > { %v1684_v36 = vadd.f32 %v1671_v6, %v2410_v2  ;;  %v1647_v47 = vadd.f32 %v1646_v39, %v1618_v58 }
 0x2ca   : > { %v1692_v34 = vmax.f32 %v1684_v36, 0.0 }
 0x2cb   : > { %v1590_v29 = vpop.f32.mrf.mxu2  ;;  %v1619_v40 = vpop.f32.mrf.mxu3 }
 0x2cc   : > { %1712 = vrot.lane.b32.xlu0 %v1692_v34, %s2347_s24  ;;  %v1591_v42 = vadd.f32 %v1590_v29, %v1562_v8 }
 0x2cd   : > { %v1672_v55 = vpop.f32.mrf.mxu1 }
 0x2ce   : > { %v1673_v51 = vadd.f32 %v1672_v55, %v1644_v41  ;;  %v1620_v11 = vadd.f32 %v1619_v40, %v1591_v42 }
 0x2d0   : > { %v1685_v61 = vadd.f32 %v1673_v51, %v2509_v15  ;;  %v1649_v12 = vadd.f32 %v1648_v25, %v1620_v11 }
 0x2d2   : > { %v1693_v57 = vmax.f32 %v1685_v61, 0.0 }
 0x2d4   : > { %1714 = vrot.lane.b32.xlu1 %v1693_v57, %s2347_s24 }
 0x2d5   : > { %v1675_v30 = vpop.f32.mrf.mxu1 }
 0x2d6   : > { %v1676_v50 = vadd.f32 %v1675_v30, %v1647_v47 }
 0x2d8   : > { %v1686_v38 = vadd.f32 %v1676_v50, %v2514_v16 }
 0x2da   : > { %v1694_v26 = vmax.f32 %v1686_v38, 0.0 }
 0x2dc   : > { %1716 = vrot.lane.b32.xlu2 %v1694_v26, %s2347_s24 }
 0x2dd   : > { %v1677_v54 = vpop.f32.mrf.mxu1 }
 0x2de   : > { %v1678_v62 = vadd.f32 %v1677_v54, %v1649_v12 }
 0x2e0   : > { %v1687_v4 = vadd.f32 %v1678_v62, %v2533_v21 }
 0x2e2   : > { %v1695_v19 = vmax.f32 %v1687_v4, 0.0 }
 0x2e4   : > { %1718 = vrot.lane.b32.xlu0 %v1695_v19, %s2347_s24 }
 0x306   : > { %v1705_v33 = vpop.permute.xlu2 %1704 }
 0x307   : > { %v1728_v0 = vsel %vm234_vm0, %v2504_v14, %v1705_v33 }
 0x308   : > { %1736 = vst [vmem:[%s224_s28] sm:$0xff] %v1728_v0 }
 0x31e   : > { %v1711_v23 = vpop.permute.xlu2 %1710 }
 0x31f   : > { %v1731_v49 = vsel %vm234_vm0, %v2407_v1, %v1711_v23 }
 0x320   : > { %1739 = vst [vmem:[%s224_s28 + $0x18] sm:$0xff] %v1731_v49 }
 0x326   : > { %v1707_v59 = vpop.permute.xlu0 %1706 }
 0x327   : > { %v1729_v60 = vsel %vm234_vm0, %v2519_v17, %v1707_v59 }
 0x328   : > { %1737 = vst [vmem:[%s224_s28 + $0x8] sm:$0xff] %v1729_v60 }
 0x32e   : > { %v1709_v35 = vpop.permute.xlu1 %1708 }
 0x32f   : > { %v1730_v28 = vsel %vm234_vm0, %v2528_v20, %v1709_v35 }
 0x330   : > { %1738 = vst [vmem:[%s224_s28 + $0x10] sm:$0xff] %v1730_v28 }
 0x336   : > { %v1717_v52 = vpop.permute.xlu2 %1716 }
 0x337   : > { %v1734_v14 = vsel %vm234_vm0, %v2514_v16, %v1717_v52 }
 0x338   : > { %1742 = vst [vmem:[%s224_s28 + $0x30] sm:$0xff] %v1734_v14 }
 0x33e   : > { %v1713_v56 = vpop.permute.xlu0 %1712 }
 0x33f   : > { %v1732_v1 = vsel %vm234_vm0, %v2410_v2, %v1713_v56 }
 0x340   : > { %1740 = vst [vmem:[%s224_s28 + $0x20] sm:$0xff] %v1732_v1 }
 0x346   : > { %v1715_v13 = vpop.permute.xlu1 %1714 }
 0x347   : > { %v1733_v17 = vsel %vm234_vm0, %v2509_v15, %v1715_v13 }
 0x348   : > { %1741 = vst [vmem:[%s224_s28 + $0x28] sm:$0xff] %v1733_v17 }
 0x356   : > { %v1719_v3 = vpop.permute.xlu0 %1718 }
 0x357   : > { %v1735_v20 = vsel %vm234_vm0, %v2533_v21, %v1719_v3 }
 0x358   : > { %1743 = vst [vmem:[%s224_s28 + $0x38] sm:$0xff] %v1735_v20 }
 0x359 PF: > { %s15_s18 = sadd.s32 1, %s2344_s18  }
 0x35a   : > { %p12_p4 = scmp.ge.s32.totalorder %s15_s18, 4  }
 0x35c   :  { %14 = sbr.rel (!%p12_p4) target bundleno = 1 (0x1), region = 72 }

</bundles_post_ra>
